<compile_context>
chip_gen: v7x
topology: tpu7x:2x2x1
jax: 0.10.0
libtpu: 0.0.40
codegen_flags: <defaults>
</compile_context>

<pallas_src>
import functools

import jax
import jax.numpy as jnp
from jax.experimental import pallas as pl
from jax.experimental.pallas import tpu as pltpu


HIDDEN = 1024


def _round_up(x, m):
    return ((x + m - 1) // m) * m


def _choose_tiling(R):
    """Pick (tile_r, R_pad). >=2 grid steps once R_pad >= 256 (v7x megacore);
    larger 256-row tiles for big R (amortize per-step overhead, v6e MXU M)."""
    R_pad = _round_up(max(R, 8), 128)
    tile = 256 if R_pad >= 1024 else 128
    R_pad = _round_up(R_pad, tile)
    return tile, R_pad


def _vmem_budget_bytes(tile_r, K_pad, nh_pad):
    """Honest VMEM budget: single-buffered weights + double-buffered x/out
    tiles + f32 intermediate slack, with headroom. Capped for v7x (64 MiB)."""
    weights = (K_pad * HIDDEN + HIDDEN * HIDDEN + HIDDEN * nh_pad) * 2   # bf16
    biases = (HIDDEN + HIDDEN + nh_pad) * 4                              # f32
    x_pipe = 2 * tile_r * K_pad * 2                                      # bf16, 2-buf
    out_pipe = 2 * tile_r * nh_pad * 4                                   # f32, 2-buf
    interm = 4 * tile_r * HIDDEN * 4                                     # f32 scratch
    total = weights + biases + x_pipe + out_pipe + interm
    budget = _round_up(int(total * 1.5) + (4 << 20), 1 << 20)
    return min(budget, 48 << 20)


# ----------------------------------------------------------------------------
# Plain-JAX glue: pyramid ROI align.  Single gather from each ROI's own level.
# ----------------------------------------------------------------------------
def pyramid_roi_align(rois, feature_maps, pool_size, image_shape):
    """rois: (R,4) normalized (y1,x1,y2,x2); feature_maps: list of (1,C,H_l,W_l)."""
    R = rois.shape[0]
    L = len(feature_maps)
    Hmax = max(fm.shape[2] for fm in feature_maps)
    Wmax = max(fm.shape[3] for fm in feature_maps)

    # Stack levels into one (L, C, Hmax, Wmax) tensor (zero-padded) so each ROI
    # gathers only from its own level — 1x the bilinear work instead of Lx.
    stacked = jnp.stack([
        jnp.pad(fm[0], ((0, 0), (0, Hmax - fm.shape[2]), (0, Wmax - fm.shape[3])))
        for fm in feature_maps])
    Hs = jnp.array([fm.shape[2] for fm in feature_maps], jnp.float32)
    Ws = jnp.array([fm.shape[3] for fm in feature_maps], jnp.float32)

    # ROI -> FPN level assignment (Mask R-CNN rule).
    y1, x1, y2, x2 = rois[:, 0], rois[:, 1], rois[:, 2], rois[:, 3]
    h = y2 - y1
    w = x2 - x1
    image_area = float(image_shape[0] * image_shape[1])
    roi_level = 4.0 + jnp.log2(jnp.sqrt(jnp.maximum(h * w, 1e-12))
                               / (224.0 / jnp.sqrt(image_area)))
    lvl = jnp.clip(jnp.round(roi_level), 2, 2 + L - 1).astype(jnp.int32) - 2   # (R,)

    Hl = Hs[lvl]                                                       # (R,)
    Wl = Ws[lvl]                                                       # (R,)

    t = jnp.arange(pool_size, dtype=jnp.float32) / max(pool_size - 1, 1)
    ys = (y1[:, None] + h[:, None] * t[None, :]) * (Hl[:, None] - 1.0)  # (R, ps)
    xs = (x1[:, None] + w[:, None] * t[None, :]) * (Wl[:, None] - 1.0)  # (R, ps)
    Y = jnp.broadcast_to(ys[:, :, None], (R, pool_size, pool_size))
    X = jnp.broadcast_to(xs[:, None, :], (R, pool_size, pool_size))

    Hc = Hl[:, None, None] - 1.0
    Wc = Wl[:, None, None] - 1.0
    y0 = jnp.clip(jnp.floor(Y), 0.0, Hc)
    x0 = jnp.clip(jnp.floor(X), 0.0, Wc)
    y1i = jnp.clip(y0 + 1.0, 0.0, Hc).astype(jnp.int32)
    x1i = jnp.clip(x0 + 1.0, 0.0, Wc).astype(jnp.int32)
    y0i = y0.astype(jnp.int32)
    x0i = x0.astype(jnp.int32)
    wy = jnp.clip(Y - y0, 0.0, 1.0)
    wx = jnp.clip(X - x0, 0.0, 1.0)

    lvl_b = lvl[:, None, None]                                         # (R,1,1)

    def gather(yi, xi):
        # Advanced indexing: (R,ps,ps) index dims come out front -> (R,ps,ps,C)
        return stacked[lvl_b, :, yi, xi]

    out = ((1 - wy) * (1 - wx))[..., None] * gather(y0i, x0i) \
        + ((1 - wy) * wx)[..., None] * gather(y0i, x1i) \
        + (wy * (1 - wx))[..., None] * gather(y1i, x0i) \
        + (wy * wx)[..., None] * gather(y1i, x1i)                      # (R,ps,ps,C)
    return jnp.transpose(out, (0, 3, 1, 2))                            # (R,C,ps,ps)


# ----------------------------------------------------------------------------
# Pallas kernel: fused FC chain + fused (class|bbox) head
# ----------------------------------------------------------------------------
def classifier_kernel(x_ref, w1_ref, b1_ref, w2_ref, b2_ref, wh_ref, bh_ref,
                      head_ref):
    # conv1 (kernel_size == pool_size) == dense matmul; BN scale folded into W1.
    h = jnp.dot(x_ref[...], w1_ref[...], preferred_element_type=jnp.float32)
    h = jnp.maximum(h + b1_ref[...], 0.0).astype(jnp.bfloat16)          # (tile_r, 1024)

    # conv2 (1x1 on 1x1 spatial) == dense matmul; BN scale folded into W2.
    h = jnp.dot(h, w2_ref[...], preferred_element_type=jnp.float32)
    h = jnp.maximum(h + b2_ref[...], 0.0).astype(jnp.bfloat16)          # (tile_r, 1024)

    # Fused [class | bbox] head: single lane-dense matmul, padded N.
    head_ref[...] = (jnp.dot(h, wh_ref[...], preferred_element_type=jnp.float32)
                     + bh_ref[...])                                     # (tile_r, nh_pad)


def run_classifier_head(x_pad, params, nh_pad, tile_r):
    R_pad, K_pad = x_pad.shape
    grid = (R_pad // tile_r,)

    # Weights/biases: whole-array, single-buffered VMEM residents (no pipeline).
    resident = pl.BlockSpec(memory_space=pltpu.MemorySpace.VMEM)

    fn = pl.pallas_call(
        classifier_kernel,
        out_shape=jax.ShapeDtypeStruct((R_pad, nh_pad), jnp.float32),
        grid=grid,
        in_specs=[
            pl.BlockSpec((tile_r, K_pad), lambda i: (i, 0)),   # x tile (pipelined)
            resident,                                           # w1 (BN folded, bf16)
            resident,                                           # b1 (f32)
            resident,                                           # w2 (BN folded, bf16)
            resident,                                           # b2 (f32)
            resident,                                           # fused head W (bf16)
            resident,                                           # fused head b (f32)
        ],
        out_specs=pl.BlockSpec((tile_r, nh_pad), lambda i: (i, 0)),
        compiler_params=pltpu.CompilerParams(
            dimension_semantics=("parallel",),
            vmem_limit_bytes=_vmem_budget_bytes(tile_r, K_pad, nh_pad),
        ),
    )
    return fn(x_pad, params["w1"], params["b1"], params["w2"], params["b2"],
              params["wh"], params["bh"])


# ----------------------------------------------------------------------------
# Parameter construction (deterministic, synthetic) with BN-fold + padding
# ----------------------------------------------------------------------------
def make_params(key, depth, pool_size, num_classes, hidden=HIDDEN):
    K = depth * pool_size * pool_size
    K_pad = _round_up(K, 128)
    nh = num_classes * 5
    nh_pad = _round_up(max(nh, 128), 128)

    ks = jax.random.split(key, 16)
    f32 = jnp.float32

    def bn_scale_shift(kg, kb, km, kv, conv_bias, eps=0.001):
        gamma = 1.0 + 0.01 * jax.random.normal(kg, (hidden,), f32)
        beta = 0.01 * jax.random.normal(kb, (hidden,), f32)
        mean = 0.01 * jax.random.normal(km, (hidden,), f32)
        var = 1.0 + 0.01 * jax.random.uniform(kv, (hidden,), f32)
        s = gamma / jnp.sqrt(var + eps)
        shift = s * (conv_bias - mean) + beta
        return s, shift

    # conv1 weight (1024, depth, ps, ps) flattened PyTorch-style -> (K, 1024)
    w1_t = 0.02 * jax.random.normal(ks[0], (hidden, depth, pool_size, pool_size), f32)
    w1 = jnp.transpose(w1_t.reshape(hidden, K))
    cb1 = 0.01 * jax.random.normal(ks[1], (hidden,), f32)
    s1, b1 = bn_scale_shift(ks[2], ks[3], ks[4], ks[5], cb1)
    w1 = w1 * s1[None, :]                                   # fold BN scale into columns
    w1 = jnp.pad(w1, ((0, K_pad - K), (0, 0))).astype(jnp.bfloat16)

    # conv2 weight (1024, 1024, 1, 1) -> (1024, 1024)
    w2_t = 0.02 * jax.random.normal(ks[6], (hidden, hidden), f32)
    w2 = jnp.transpose(w2_t)
    cb2 = 0.01 * jax.random.normal(ks[7], (hidden,), f32)
    s2, b2 = bn_scale_shift(ks[8], ks[9], ks[10], ks[11], cb2)
    w2 = (w2 * s2[None, :]).astype(jnp.bfloat16)

    # Fused head: [linear_class | linear_bbox] -> (1024, nh_pad), zero-padded.
    wc = jnp.transpose(0.02 * jax.random.normal(ks[12], (num_classes, hidden), f32))
    bc = 0.01 * jax.random.normal(ks[13], (num_classes,), f32)
    wb = jnp.transpose(0.02 * jax.random.normal(ks[14], (num_classes * 4, hidden), f32))
    bb = 0.01 * jax.random.normal(ks[15], (num_classes * 4,), f32)
    wh = jnp.concatenate([wc, wb], axis=1)
    wh = jnp.pad(wh, ((0, 0), (0, nh_pad - nh))).astype(jnp.bfloat16)
    bh = jnp.pad(jnp.concatenate([bc, bb]), (0, nh_pad - nh)).reshape(1, nh_pad)

    params = dict(w1=w1, b1=b1.reshape(1, hidden),
                  w2=w2, b2=b2.reshape(1, hidden),
                  wh=wh, bh=bh)
    return params, K_pad, nh_pad


# ----------------------------------------------------------------------------
# Full forward (pyramid_roi_align glue + Pallas head)
# ----------------------------------------------------------------------------
def classifier_forward(feature_maps, rois, params, pool_size, image_shape,
                       num_classes, K_pad, nh_pad):
    pooled = pyramid_roi_align(rois, feature_maps, pool_size, image_shape)  # (R,C,ps,ps) f32
    R = pooled.shape[0]
    K = pooled.shape[1] * pool_size * pool_size

    # Pad rows to the tile multiple and K to the padded contraction dim
    # (weights were zero-padded on the same K columns -> numerically exact).
    # Staging fused: reshape -> pad -> bf16 in one pass, no extra f32 round-trip.
    tile_r, R_pad = _choose_tiling(R)
    x_pad = jnp.pad(pooled.reshape(R, K),
                    ((0, R_pad - R), (0, K_pad - K))).astype(jnp.bfloat16)

    head = run_classifier_head(x_pad, params, nh_pad, tile_r)

    logits = head[:R, :num_classes]
    probs = jax.nn.softmax(logits, axis=1)          # exact softmax, tiny tensor
    bbox = head[:R, num_classes:num_classes * 5].reshape(R, num_classes, 4)
    return [logits, probs, bbox]


if __name__ == "__main__":
    depth = 4
    pool_size = 7
    image_shape = (64, 64, 3)
    num_classes = 8
    num_rois = 8

    key = jax.random.PRNGKey(0)
    k_feat, k_roi, k_par = jax.random.split(key, 3)

    # FPN feature maps P2..P5 in NCHW with batch=1
    fkeys = jax.random.split(k_feat, 4)
    feature_maps = [
        jax.random.normal(fkeys[0], (1, depth, 16, 16), jnp.float32),
        jax.random.normal(fkeys[1], (1, depth, 8, 8), jnp.float32),
        jax.random.normal(fkeys[2], (1, depth, 4, 4), jnp.float32),
        jax.random.normal(fkeys[3], (1, depth, 2, 2), jnp.float32),
    ]

    # ROIs: normalized (y1, x1, y2, x2)
    rk1, rk2 = jax.random.split(k_roi)
    tl = jax.random.uniform(rk1, (num_rois, 2), jnp.float32, 0.0, 0.6)
    sz = jax.random.uniform(rk2, (num_rois, 2), jnp.float32, 0.1, 0.4)
    rois = jnp.concatenate([tl, jnp.clip(tl + sz, 0.0, 1.0)], axis=1)      # (R, 4)

    params, K_pad, nh_pad = make_params(k_par, depth, pool_size, num_classes)

    fwd = jax.jit(functools.partial(
        classifier_forward, pool_size=pool_size, image_shape=image_shape,
        num_classes=num_classes, K_pad=K_pad, nh_pad=nh_pad))

    logits, probs, bbox = fwd(feature_maps, rois, params)
    jax.block_until_ready((logits, probs, bbox))

    assert logits.shape == (num_rois, num_classes)
    assert probs.shape == (num_rois, num_classes)
    assert bbox.shape == (num_rois, num_classes, 4)
    assert bool(jnp.all(jnp.isfinite(logits)))
    assert bool(jnp.all(jnp.isfinite(bbox)))
    assert bool(jnp.allclose(jnp.sum(probs, axis=1), 1.0, atol=1e-3))
    print("KERNEL_OK")
</pallas_src>

<mosaic_0001>
module attributes {stable_mosaic.version = 11 : i64} {
  func.func @classifier_kernel(%arg0: i32, %arg1: memref<128x256xbf16, #tpu.memory_space<vmem>>, %arg2: memref<256x1024xbf16, #tpu.memory_space<vmem>>, %arg3: memref<1x1024xf32, #tpu.memory_space<vmem>>, %arg4: memref<1024x1024xbf16, #tpu.memory_space<vmem>>, %arg5: memref<1x1024xf32, #tpu.memory_space<vmem>>, %arg6: memref<1024x128xbf16, #tpu.memory_space<vmem>>, %arg7: memref<1x128xf32, #tpu.memory_space<vmem>>, %arg8: memref<128x128xf32, #tpu.memory_space<vmem>>) attributes {dimension_semantics = [#tpu.dimension_semantics<parallel>], iteration_bounds = array<i64: 1>, scalar_prefetch = 0 : i64, scratch_operands = 0 : i64, tpu.core_type = #tpu.core_type<tc>, window_params = [{transform_indices = @transform_0, window_bounds = array<i64: 128, 256>}, {pipeline_mode = #tpu.pipeline_mode<synchronous>, transform_indices = @transform_1, window_bounds = array<i64: 256, 1024>}, {pipeline_mode = #tpu.pipeline_mode<synchronous>, transform_indices = @transform_2, window_bounds = array<i64: 1, 1024>}, {pipeline_mode = #tpu.pipeline_mode<synchronous>, transform_indices = @transform_3, window_bounds = array<i64: 1024, 1024>}, {pipeline_mode = #tpu.pipeline_mode<synchronous>, transform_indices = @transform_4, window_bounds = array<i64: 1, 1024>}, {pipeline_mode = #tpu.pipeline_mode<synchronous>, transform_indices = @transform_5, window_bounds = array<i64: 1024, 128>}, {pipeline_mode = #tpu.pipeline_mode<synchronous>, transform_indices = @transform_6, window_bounds = array<i64: 1, 128>}, {transform_indices = @transform_7, window_bounds = array<i64: 128, 128>}]} {
    %c0 = arith.constant 0 : index
    %c0_0 = arith.constant 0 : index
    %0 = vector.load %arg1[%c0, %c0_0] : memref<128x256xbf16, #tpu.memory_space<vmem>>, vector<128x256xbf16>
    %c0_1 = arith.constant 0 : index
    %c0_2 = arith.constant 0 : index
    %1 = vector.load %arg2[%c0_1, %c0_2] : memref<256x1024xbf16, #tpu.memory_space<vmem>>, vector<256x1024xbf16>
    %cst = arith.constant dense<0.000000e+00> : vector<128x1024xf32>
    %2 = tpu.matmul %0, %1, %cst {dimension_numbers = #tpu.dot_dimension_numbers<[1], [0], [0], [1], [0, 0, 1, 1], [], []>} : vector<128x256xbf16>, vector<256x1024xbf16>, vector<128x1024xf32> -> vector<128x1024xf32>
    %c0_3 = arith.constant 0 : index
    %c0_4 = arith.constant 0 : index
    %3 = vector.load %arg3[%c0_3, %c0_4] : memref<1x1024xf32, #tpu.memory_space<vmem>>, vector<1x1024xf32>
    %4 = vector.broadcast %3 : vector<1x1024xf32> to vector<128x1024xf32>
    %5 = arith.addf %2, %4 : vector<128x1024xf32>
    %cst_5 = arith.constant 0.000000e+00 : f32
    %6 = vector.broadcast %cst_5 : f32 to vector<128x1024xf32>
    %7 = arith.maximumf %5, %6 : vector<128x1024xf32>
    %8 = arith.truncf %7 : vector<128x1024xf32> to vector<128x1024xbf16>
    %c0_6 = arith.constant 0 : index
    %c0_7 = arith.constant 0 : index
    %9 = vector.load %arg4[%c0_6, %c0_7] : memref<1024x1024xbf16, #tpu.memory_space<vmem>>, vector<1024x1024xbf16>
    %cst_8 = arith.constant dense<0.000000e+00> : vector<128x1024xf32>
    %10 = tpu.matmul %8, %9, %cst_8 {dimension_numbers = #tpu.dot_dimension_numbers<[1], [0], [0], [1], [0, 0, 1, 1], [], []>} : vector<128x1024xbf16>, vector<1024x1024xbf16>, vector<128x1024xf32> -> vector<128x1024xf32>
    %c0_9 = arith.constant 0 : index
    %c0_10 = arith.constant 0 : index
    %11 = vector.load %arg5[%c0_9, %c0_10] : memref<1x1024xf32, #tpu.memory_space<vmem>>, vector<1x1024xf32>
    %12 = vector.broadcast %11 : vector<1x1024xf32> to vector<128x1024xf32>
    %13 = arith.addf %10, %12 : vector<128x1024xf32>
    %cst_11 = arith.constant 0.000000e+00 : f32
    %14 = vector.broadcast %cst_11 : f32 to vector<128x1024xf32>
    %15 = arith.maximumf %13, %14 : vector<128x1024xf32>
    %16 = arith.truncf %15 : vector<128x1024xf32> to vector<128x1024xbf16>
    %c0_12 = arith.constant 0 : index
    %c0_13 = arith.constant 0 : index
    %17 = vector.load %arg6[%c0_12, %c0_13] : memref<1024x128xbf16, #tpu.memory_space<vmem>>, vector<1024x128xbf16>
    %cst_14 = arith.constant dense<0.000000e+00> : vector<128x128xf32>
    %18 = tpu.matmul %16, %17, %cst_14 {dimension_numbers = #tpu.dot_dimension_numbers<[1], [0], [0], [1], [0, 0, 1, 1], [], []>} : vector<128x1024xbf16>, vector<1024x128xbf16>, vector<128x128xf32> -> vector<128x128xf32>
    %c0_15 = arith.constant 0 : index
    %c0_16 = arith.constant 0 : index
    %19 = vector.load %arg7[%c0_15, %c0_16] : memref<1x128xf32, #tpu.memory_space<vmem>>, vector<1x128xf32>
    %20 = vector.broadcast %19 : vector<1x128xf32> to vector<128x128xf32>
    %21 = arith.addf %18, %20 : vector<128x128xf32>
    %c0_17 = arith.constant 0 : index
    %c0_18 = arith.constant 0 : index
    %22 = vector.load %arg8[%c0_17, %c0_18] : memref<128x128xf32, #tpu.memory_space<vmem>>, vector<128x128xf32>
    tpu.vector_store %arg8[%c0_17, %c0_18], %21 {strides = array<i32>} : memref<128x128xf32, #tpu.memory_space<vmem>>, vector<128x128xf32>,
    return
  }
  func.func @transform_0(%arg0: i32) -> (i32, i32) {
    %c0_i32 = arith.constant 0 : i32
    %c0_i32_0 = arith.constant 0 : i32
    return %arg0, %c0_i32 : i32, i32
  }
  func.func @transform_1(%arg0: i32) -> (i32, i32) {
    %c0_i32 = arith.constant 0 : i32
    %c0_i32_0 = arith.constant 0 : i32
    %c0_i32_1 = arith.constant 0 : i32
    return %c0_i32, %c0_i32_0 : i32, i32
  }
  func.func @transform_2(%arg0: i32) -> (i32, i32) {
    %c0_i32 = arith.constant 0 : i32
    %c0_i32_0 = arith.constant 0 : i32
    %c0_i32_1 = arith.constant 0 : i32
    return %c0_i32, %c0_i32_0 : i32, i32
  }
  func.func @transform_3(%arg0: i32) -> (i32, i32) {
    %c0_i32 = arith.constant 0 : i32
    %c0_i32_0 = arith.constant 0 : i32
    %c0_i32_1 = arith.constant 0 : i32
    return %c0_i32, %c0_i32_0 : i32, i32
  }
  func.func @transform_4(%arg0: i32) -> (i32, i32) {
    %c0_i32 = arith.constant 0 : i32
    %c0_i32_0 = arith.constant 0 : i32
    %c0_i32_1 = arith.constant 0 : i32
    return %c0_i32, %c0_i32_0 : i32, i32
  }
  func.func @transform_5(%arg0: i32) -> (i32, i32) {
    %c0_i32 = arith.constant 0 : i32
    %c0_i32_0 = arith.constant 0 : i32
    %c0_i32_1 = arith.constant 0 : i32
    return %c0_i32, %c0_i32_0 : i32, i32
  }
  func.func @transform_6(%arg0: i32) -> (i32, i32) {
    %c0_i32 = arith.constant 0 : i32
    %c0_i32_0 = arith.constant 0 : i32
    %c0_i32_1 = arith.constant 0 : i32
    return %c0_i32, %c0_i32_0 : i32, i32
  }
  func.func @transform_7(%arg0: i32) -> (i32, i32) {
    %c0_i32 = arith.constant 0 : i32
    %c0_i32_0 = arith.constant 0 : i32
    return %arg0, %c0_i32 : i32, i32
  }
}

</mosaic_0001>

<bundles_post_ra>
// kernel: classifier_forward.1
= control target key start
LH: loop header
LB: loop body
LE: loop exit
PB: predicated region body
PF: predicated region fallthrough
CT: control target
= control target key end

     0   :  { %s13000_s1 = inlined_call_operand.vmem [shape: bf16[256,1024], index: 1, kind: input, shape index: {}]   ;;  %s13001_s0 = inlined_call_operand.vmem [shape: bf16[128,256], index: 0, kind: input, shape index: {}]   ;;  %s13002_s3 = inlined_call_operand.vmem [shape: bf16[1024,1024], index: 3, kind: input, shape index: {}]   ;;  %s13003_s2 = inlined_call_operand.vmem [shape: f32[1,1024], index: 2, kind: input, shape index: {}]   ;;  %s13004_s5 = inlined_call_operand.vmem [shape: bf16[1024,128], index: 5, kind: input, shape index: {}]   ;;  %s13005_s4 = inlined_call_operand.vmem [shape: f32[1,1024], index: 4, kind: input, shape index: {}]   ;;  %s13006_s6 = inlined_call_operand.vmem [shape: f32[1,128], index: 6, kind: input, shape index: {}]   ;;  %s13007_s7 = inlined_call_operand.vmem [shape: f32[128,128], index: 7, kind: output, shape index: {}]  }
   0x1   :  { %v43_v0 = vld [vmem:[%s13000_s1] sm:$0xff]  ;;  %v44_v17 = vld [vmem:[%s13000_s1 + $0x8] sm:$0xff] }
   0x2   :  { %v47_v1 = vld [vmem:[%s13000_s1 + $0x20] sm:$0xff]  ;;  %v48_v18 = vld [vmem:[%s13000_s1 + $0x28] sm:$0xff] }
   0x3   :  { %v51_v2 = vld [vmem:[%s13000_s1 + $0x40] sm:$0xff]  ;;  %v7635_v3 = vcombine.high %v43_v0, %v47_v1  ;;  %v7634_v4 = vcombine.low %v43_v0, %v47_v1  ;;  %v7637_v21 = vcombine.high %v44_v17, %v48_v18  ;;  %v7636_v22 = vcombine.low %v44_v17, %v48_v18  ;;  %v52_v24 = vld [vmem:[%s13000_s1 + $0x48] sm:$0xff] }
   0x4   :  { %v55_v5 = vld [vmem:[%s13000_s1 + $0x60] sm:$0xff]  ;;  %v56_v26 = vld [vmem:[%s13000_s1 + $0x68] sm:$0xff] }
   0x5   :  { %v7643_v6 = vcombine.high %v51_v2, %v55_v5  ;;  %v59_v7 = vld [vmem:[%s13000_s1 + $0x80] sm:$0xff]  ;;  %933 = vmatprep.subr.bf16.mxu0 %v7635_v3  ;;  %v7642_v9 = vcombine.low %v51_v2, %v55_v5  ;;  %v60_v27 = vld [vmem:[%s13000_s1 + $0x88] sm:$0xff]  ;;  %1046 = vmatprep.subr.bf16.mxu1 %v7637_v21  ;;  %v7645_v30 = vcombine.high %v52_v24, %v56_v26 }
   0x6   :  { %v63_v8 = vld [vmem:[%s13000_s1 + $0xa0] sm:$0xff]  ;;  %934 = vmatpush1.bf16.msra.mxu0 %v7634_v4  ;;  %v64_v28 = vld [vmem:[%s13000_s1 + $0xa8] sm:$0xff]  ;;  %1047 = vmatpush1.bf16.msra.mxu1 %v7636_v22  ;;  %v7644_v31 = vcombine.low %v52_v24, %v56_v26 }
   0x7   :  { %935 = vmatprep.subr.bf16.mxu0 %v7643_v6  ;;  %v7651_v10 = vcombine.high %v59_v7, %v63_v8  ;;  %v67_v11 = vld [vmem:[%s13000_s1 + $0xc0] sm:$0xff]  ;;  %v7650_v13 = vcombine.low %v59_v7, %v63_v8  ;;  %1048 = vmatprep.subr.bf16.mxu1 %v7645_v30  ;;  %v7653_v33 = vcombine.high %v60_v27, %v64_v28  ;;  %v68_v35 = vld [vmem:[%s13000_s1 + $0xc8] sm:$0xff] }
   0x8   :  { %v71_v12 = vld [vmem:[%s13000_s1 + $0xe0] sm:$0xff]  ;;  %v72_v36 = vld [vmem:[%s13000_s1 + $0xe8] sm:$0xff]  ;;  %v7652_v39 = vcombine.low %v60_v27, %v64_v28 }
   0x9   :  { %v7659_v14 = vcombine.high %v67_v11, %v71_v12  ;;  %v75_v15 = vld [vmem:[%s13000_s1 + $0x100] sm:$0xff]  ;;  %v7658_v19 = vcombine.low %v67_v11, %v71_v12  ;;  %v7661_v41 = vcombine.high %v68_v35, %v72_v36  ;;  %v76_v44 = vld [vmem:[%s13000_s1 + $0x108] sm:$0xff]  ;;  %v7660_v47 = vcombine.low %v68_v35, %v72_v36 }
   0xa   :  { %936 = vmatpush1.bf16.msra.mxu0 %v7642_v9  ;;  %v79_v16 = vld [vmem:[%s13000_s1 + $0x120] sm:$0xff]  ;;  %1049 = vmatpush1.bf16.msra.mxu1 %v7644_v31  ;;  %v80_v45 = vld [vmem:[%s13000_s1 + $0x128] sm:$0xff] }
   0xb   :  { %937 = vmatprep.subr.bf16.mxu0 %v7651_v10  ;;  %v83_v20 = vld [vmem:[%s13000_s1 + $0x140] sm:$0xff]  ;;  %v7667_v25 = vcombine.high %v75_v15, %v79_v16  ;;  %v7666_v32 = vcombine.low %v75_v15, %v79_v16  ;;  %1050 = vmatprep.subr.bf16.mxu1 %v7653_v33  ;;  %v7669_v49 = vcombine.high %v76_v44, %v80_v45  ;;  %v84_v51 = vld [vmem:[%s13000_s1 + $0x148] sm:$0xff] }
   0xc   :  { %v9278_v23 = vld [vmem:[%s13001_s0 + $0x4] ss:$8 sps:$4 sm:$0xff]   ;;  %v7668_v55 = vcombine.low %v76_v44, %v80_v45 }
   0xd   :  { %v87_v29 = vld [vmem:[%s13000_s1 + $0x160] sm:$0xff]  ;;  %965 = vmatprep.mubr.bf16.mxu0 %v9278_v23  ;;  %1078 = vmatprep.mubr.bf16.mxu1 %v9278_v23  ;;  %v88_v52 = vld [vmem:[%s13000_s1 + $0x168] sm:$0xff] }
   0xe   :  { %938 = vmatpush1.bf16.msra.mxu0 %v7650_v13  ;;  %v7675_v34 = vcombine.high %v83_v20, %v87_v29  ;;  %v91_v37 = vld [vmem:[%s13000_s1 + $0x180] sm:$0xff]  ;;  %v7674_v40 = vcombine.low %v83_v20, %v87_v29  ;;  %1051 = vmatpush1.bf16.msra.mxu1 %v7652_v39  ;;  %v7677_v57 = vcombine.high %v84_v51, %v88_v52  ;;  %v92_v60 = vld [vmem:[%s13000_s1 + $0x188] sm:$0xff] }
   0xf   :  { %939 = vmatprep.subr.bf16.mxu0 %v7659_v14  ;;  %v95_v38 = vld [vmem:[%s13000_s1 + $0x1a0] sm:$0xff]  ;;  %1052 = vmatprep.subr.bf16.mxu1 %v7661_v41  ;;  %v96_v61 = vld [vmem:[%s13000_s1 + $0x1a8] sm:$0xff]  ;;  %v7676_v63 = vcombine.low %v84_v51, %v88_v52 }
  0x10   :  { %v7683_v42 = vcombine.high %v91_v37, %v95_v38  ;;  %v99_v43 = vld [vmem:[%s13000_s1 + $0x1c0] sm:$0xff]  ;;  %v7682_v48 = vcombine.low %v91_v37, %v95_v38  ;;  %v7685_v1 = vcombine.high %v92_v60, %v96_v61  ;;  %v100_v3 = vld [vmem:[%s13000_s1 + $0x1c8] sm:$0xff]  ;;  %v7684_v7 = vcombine.low %v92_v60, %v96_v61 }
  0x11   :  { %v103_v46 = vld [vmem:[%s13000_s1 + $0x1e0] sm:$0xff]  ;;  %v104_v4 = vld [vmem:[%s13000_s1 + $0x1e8] sm:$0xff] }
  0x12   :  { %940 = vmatpush1.bf16.msra.mxu0 %v7658_v19  ;;  %v7691_v50 = vcombine.high %v99_v43, %v103_v46  ;;  %v107_v53 = vld [vmem:[%s13000_s1 + $0x200] sm:$0xff]  ;;  %1053 = vmatpush1.bf16.msra.mxu1 %v7660_v47  ;;  %v7690_v56 = vcombine.low %v99_v43, %v103_v46  ;;  %v7693_v9 = vcombine.high %v100_v3, %v104_v4  ;;  %v108_v11 = vld [vmem:[%s13000_s1 + $0x208] sm:$0xff] }
  0x13   :  { %941 = vmatprep.subr.bf16.mxu0 %v7667_v25  ;;  %v111_v54 = vld [vmem:[%s13000_s1 + $0x220] sm:$0xff]  ;;  %1054 = vmatprep.subr.bf16.mxu1 %v7669_v49  ;;  %v112_v12 = vld [vmem:[%s13000_s1 + $0x228] sm:$0xff]  ;;  %v7692_v15 = vcombine.low %v100_v3, %v104_v4 }
  0x14   :  { %v7699_v58 = vcombine.high %v107_v53, %v111_v54  ;;  %v115_v59 = vld [vmem:[%s13000_s1 + $0x240] sm:$0xff]  ;;  %v7698_v0 = vcombine.low %v107_v53, %v111_v54  ;;  %v7701_v17 = vcombine.high %v108_v11, %v112_v12  ;;  %v116_v19 = vld [vmem:[%s13000_s1 + $0x248] sm:$0xff]  ;;  %v7700_v24 = vcombine.low %v108_v11, %v112_v12  ;;  %v45_v54 = vld [vmem:[%s13000_s1 + $0x10] sm:$0xff] }
  0x15   :  { %v119_v62 = vld [vmem:[%s13000_s1 + $0x260] sm:$0xff]  ;;  %v120_v20 = vld [vmem:[%s13000_s1 + $0x268] sm:$0xff] }
  0x16   :  { %942 = vmatpush1.bf16.msra.mxu0 %v7666_v32  ;;  %1055 = vmatpush1.bf16.msra.mxu1 %v7668_v55  ;;  %v7707_v2 = vcombine.high %v115_v59, %v119_v62  ;;  %v123_v5 = vld [vmem:[%s13000_s1 + $0x280] sm:$0xff]  ;;  %v7706_v8 = vcombine.low %v115_v59, %v119_v62  ;;  %v7709_v26 = vcombine.high %v116_v19, %v120_v20  ;;  %v124_v28 = vld [vmem:[%s13000_s1 + $0x288] sm:$0xff]  ;;  %v49_v55 = vld [vmem:[%s13000_s1 + $0x30] sm:$0xff] }
  0x17   :  { %943 = vmatprep.subr.bf16.mxu0 %v7675_v34  ;;  %1056 = vmatprep.subr.bf16.mxu1 %v7677_v57  ;;  %v127_v6 = vld [vmem:[%s13000_s1 + $0x2a0] sm:$0xff]  ;;  %v128_v29 = vld [vmem:[%s13000_s1 + $0x2a8] sm:$0xff]  ;;  %v7708_v32 = vcombine.low %v116_v19, %v120_v20  ;;  %v7639_v61 = vcombine.high %v45_v54, %v49_v55  ;;  %v73_v19 = vld [vmem:[%s13000_s1 + $0xf0] sm:$0xff] }
  0x18   :  { %v7715_v10 = vcombine.high %v123_v5, %v127_v6  ;;  %v131_v13 = vld [vmem:[%s13000_s1 + $0x2c0] sm:$0xff]  ;;  %v7714_v16 = vcombine.low %v123_v5, %v127_v6  ;;  %v7717_v34 = vcombine.high %v124_v28, %v128_v29  ;;  %v132_v36 = vld [vmem:[%s13000_s1 + $0x2c8] sm:$0xff]  ;;  %v7638_v6 = vcombine.low %v45_v54, %v49_v55  ;;  %v101_v54 = vld [vmem:[%s13000_s1 + $0x1d0] sm:$0xff] }
  0x19   :  { %v135_v14 = vld [vmem:[%s13000_s1 + $0x2e0] sm:$0xff]  ;;  %v136_v37 = vld [vmem:[%s13000_s1 + $0x2e8] sm:$0xff]  ;;  %v105_v55 = vld [vmem:[%s13000_s1 + $0x1f0] sm:$0xff] }
  0x1a   :  { %944 = vmatpush1.bf16.msra.mxu0 %v7674_v40  ;;  %1057 = vmatpush1.bf16.msra.mxu1 %v7676_v63  ;;  %v7723_v18 = vcombine.high %v131_v13, %v135_v14  ;;  %v139_v21 = vld [vmem:[%s13000_s1 + $0x300] sm:$0xff]  ;;  %v7722_v25 = vcombine.low %v131_v13, %v135_v14  ;;  %v7716_v40 = vcombine.low %v124_v28, %v128_v29  ;;  %v140_v44 = vld [vmem:[%s13000_s1 + $0x308] sm:$0xff]  ;;  %v46_v13 = vld [vmem:[%s13000_s1 + $0x18] sm:$0xff] }
  0x1b   :  { %945 = vmatprep.subr.bf16.mxu0 %v7683_v42  ;;  %1058 = vmatprep.subr.bf16.mxu1 %v7685_v1  ;;  %v143_v22 = vld [vmem:[%s13000_s1 + $0x320] sm:$0xff]  ;;  %v7725_v42 = vcombine.high %v132_v36, %v136_v37  ;;  %v144_v45 = vld [vmem:[%s13000_s1 + $0x328] sm:$0xff]  ;;  %v57_v1 = vld [vmem:[%s13000_s1 + $0x70] sm:$0xff] }
  0x1c   :  { %v7731_v27 = vcombine.high %v139_v21, %v143_v22  ;;  %v147_v30 = vld [vmem:[%s13000_s1 + $0x340] sm:$0xff]  ;;  %v7730_v33 = vcombine.low %v139_v21, %v143_v22  ;;  %v148_v52 = vld [vmem:[%s13000_s1 + $0x348] sm:$0xff]  ;;  %v50_v14 = vld [vmem:[%s13000_s1 + $0x38] sm:$0xff] }
  0x1d   :  { %v151_v31 = vld [vmem:[%s13000_s1 + $0x360] sm:$0xff]  ;;  %v152_v53 = vld [vmem:[%s13000_s1 + $0x368] sm:$0xff]  ;;  %v7641_v21 = vcombine.high %v46_v13, %v50_v14  ;;  %v81_v28 = vld [vmem:[%s13000_s1 + $0x130] sm:$0xff]  ;;  %v7640_v29 = vcombine.low %v46_v13, %v50_v14 }
  0x1e   :  { %946 = vmatpush1.bf16.msra.mxu0 %v7682_v48  ;;  %1059 = vmatpush1.bf16.msra.mxu1 %v7684_v7  ;;  %v7739_v35 = vcombine.high %v147_v30, %v151_v31  ;;  %v155_v38 = vld [vmem:[%s13000_s1 + $0x380] sm:$0xff]  ;;  %v7738_v41 = vcombine.low %v147_v30, %v151_v31  ;;  %v7724_v48 = vcombine.low %v132_v36, %v136_v37  ;;  %v156_v59 = vld [vmem:[%s13000_s1 + $0x388] sm:$0xff]  ;;  %v85_v36 = vld [vmem:[%s13000_s1 + $0x150] sm:$0xff] }
  0x1f   :  { %947 = vmatprep.subr.bf16.mxu0 %v7691_v50  ;;  %1060 = vmatprep.subr.bf16.mxu1 %v7693_v9  ;;  %v159_v39 = vld [vmem:[%s13000_s1 + $0x3a0] sm:$0xff]  ;;  %v7733_v50 = vcombine.high %v140_v44, %v144_v45  ;;  %v160_v60 = vld [vmem:[%s13000_s1 + $0x3a8] sm:$0xff]  ;;  %v7740_v63 = vcombine.low %v148_v52, %v152_v53  ;;  %v61_v9 = vld [vmem:[%s13000_s1 + $0x90] sm:$0xff] }
  0x20   :  { %v7747_v43 = vcombine.high %v155_v38, %v159_v39  ;;  %v163_v46 = vld [vmem:[%s13000_s1 + $0x3c0] sm:$0xff]  ;;  %v7746_v49 = vcombine.low %v155_v38, %v159_v39  ;;  %v7749_v3 = vcombine.high %v156_v59, %v160_v60  ;;  %v164_v4 = vld [vmem:[%s13000_s1 + $0x3c8] sm:$0xff]  ;;  %v89_v37 = vld [vmem:[%s13000_s1 + $0x170] sm:$0xff] }
  0x21   :  { %v167_v47 = vld [vmem:[%s13000_s1 + $0x3e0] sm:$0xff]  ;;  %v168_v5 = vld [vmem:[%s13000_s1 + $0x3e8] sm:$0xff]  ;;  %v9523_v39 = vld [vmem:[%s13001_s0 + $0x34] ss:$8 sps:$4 sm:$0xff]  }
  0x22   :  { %948 = vmatpush1.bf16.msra.mxu0 %v7690_v56  ;;  %1061 = vmatpush1.bf16.msra.mxu1 %v7692_v15  ;;  %v7755_v51 = vcombine.high %v163_v46, %v167_v47  ;;  %v7732_v56 = vcombine.low %v140_v44, %v144_v45  ;;  %v7754_v57 = vcombine.low %v163_v46, %v167_v47  ;;  %v9438_v62 = vld [vmem:[%s13001_s0] ss:$8 sps:$4 sm:$0xff]   ;;  %v9485_v20 = vld [vmem:[%s13001_s0 + $0x24] ss:$8 sps:$4 sm:$0xff]   ;;  %v93_v45 = vld [vmem:[%s13000_s1 + $0x190] sm:$0xff] }
  0x23   :  { %949 = vmatprep.subr.bf16.mxu0 %v7699_v58  ;;  %1062 = vmatprep.subr.bf16.mxu1 %v7701_v17  ;;  %v7741_v58 = vcombine.high %v148_v52, %v152_v53  ;;  %v7757_v11 = vcombine.high %v164_v4, %v168_v5  ;;  %v7756_v17 = vcombine.low %v164_v4, %v168_v5  ;;  %v97_v46 = vld [vmem:[%s13000_s1 + $0x1b0] sm:$0xff] }
  0x24   :  { %v7679_v44 = vcombine.high %v85_v36, %v89_v37  ;;  %v7687_v52 = vcombine.high %v93_v45, %v97_v46  ;;  %v9549_v53 = vld [vmem:[%s13001_s0 + $0x30] ss:$8 sps:$4 sm:$0xff]   ;;  %v7694_v5 = vcombine.low %v101_v54, %v105_v55  ;;  %v9599_v13 = vld [vmem:[%s13001_s0 + $0x54] ss:$8 sps:$4 sm:$0xff]  }
  0x26   :  { %950 = vmatpush1.bf16.msra.mxu0 %v7698_v0  ;;  %1063 = vmatpush1.bf16.msra.mxu1 %v7700_v24  ;;  %v53_v0 = vld [vmem:[%s13000_s1 + $0x50] sm:$0xff]  ;;  %v54_v24 = vld [vmem:[%s13000_s1 + $0x58] sm:$0xff] }
  0x27   :  { %951 = vmatprep.subr.bf16.mxu0 %v7707_v2  ;;  %1064 = vmatprep.subr.bf16.mxu1 %v7709_v26  ;;  %v9449_v2 = vld [vmem:[%s13001_s0 + $0x14] ss:$8 sps:$4 sm:$0xff]   ;;  %v7647_v7 = vcombine.high %v53_v0, %v57_v1  ;;  %v7646_v12 = vcombine.low %v53_v0, %v57_v1 }
  0x28   :  { %v109_v0 = vld [vmem:[%s13000_s1 + $0x210] sm:$0xff] }
  0x29   :  { %v113_v1 = vld [vmem:[%s13000_s1 + $0x230] sm:$0xff] }
  0x2a   :  { %952 = vmatpush1.bf16.msra.mxu0 %v7706_v8  ;;  %1065 = vmatpush1.bf16.msra.mxu1 %v7708_v32  ;;  %v7748_v8 = vcombine.low %v156_v59, %v160_v60  ;;  %v62_v32 = vld [vmem:[%s13000_s1 + $0x98] sm:$0xff]  ;;  %v7686_v59 = vcombine.low %v93_v45, %v97_v46 }
  0x2b   :  { %953 = vmatprep.subr.bf16.mxu0 %v7715_v10  ;;  %1066 = vmatprep.subr.bf16.mxu1 %v7717_v34  ;;  %v65_v10 = vld [vmem:[%s13000_s1 + $0xb0] sm:$0xff]  ;;  %v86_v60 = vld [vmem:[%s13000_s1 + $0x158] sm:$0xff] }
  0x2c   :  { %v7655_v15 = vcombine.high %v61_v9, %v65_v10  ;;  %v7654_v22 = vcombine.low %v61_v9, %v65_v10  ;;  %v9587_v9 = vld [vmem:[%s13001_s0 + $0x40] ss:$8 sps:$4 sm:$0xff]   ;;  %v117_v10 = vld [vmem:[%s13000_s1 + $0x250] sm:$0xff] }
  0x2e   :  { %954 = vmatpush1.bf16.msra.mxu0 %v7714_v16  ;;  %1067 = vmatpush1.bf16.msra.mxu1 %v7716_v40  ;;  %v9474_v16 = vld [vmem:[%s13001_s0 + $0x10] ss:$8 sps:$4 sm:$0xff]  }
  0x2f   :  { %955 = vmatprep.subr.bf16.mxu0 %v7723_v18  ;;  %1068 = vmatprep.subr.bf16.mxu1 %v7725_v42  ;;  %v69_v18 = vld [vmem:[%s13000_s1 + $0xd0] sm:$0xff]  ;;  %v70_v42 = vld [vmem:[%s13000_s1 + $0xd8] sm:$0xff] }
  0x30   :  { %v7663_v26 = vcombine.high %v69_v18, %v73_v19  ;;  %v7662_v31 = vcombine.low %v69_v18, %v73_v19  ;;  %v106_v18 = vld [vmem:[%s13000_s1 + $0x1f8] sm:$0xff] }
  0x32   :  { %956 = vmatpush1.bf16.msra.mxu0 %v7722_v25  ;;  %1069 = vmatpush1.bf16.msra.mxu1 %v7724_v48  ;;  %v58_v25 = vld [vmem:[%s13000_s1 + $0x78] sm:$0xff] }
  0x33   :  { %957 = vmatprep.subr.bf16.mxu0 %v7731_v27  ;;  %1070 = vmatprep.subr.bf16.mxu1 %v7733_v50  ;;  %v77_v27 = vld [vmem:[%s13000_s1 + $0x110] sm:$0xff]  ;;  %v7649_v30 = vcombine.high %v54_v24, %v58_v25  ;;  %v7648_v38 = vcombine.low %v54_v24, %v58_v25  ;;  %v78_v50 = vld [vmem:[%s13000_s1 + $0x118] sm:$0xff] }
  0x34   :  { %v7671_v34 = vcombine.high %v77_v27, %v81_v28 }
  0x36   :  { %958 = vmatpush1.bf16.msra.mxu0 %v7730_v33  ;;  %1071 = vmatpush1.bf16.msra.mxu1 %v7732_v56  ;;  %v66_v33 = vld [vmem:[%s13000_s1 + $0xb8] sm:$0xff] }
  0x37   :  { %959 = vmatprep.subr.bf16.mxu0 %v7739_v35  ;;  %1072 = vmatprep.subr.bf16.mxu1 %v7741_v58  ;;  %v9511_v35 = vld [vmem:[%s13001_s0 + $0x20] ss:$8 sps:$4 sm:$0xff]   ;;  %v7657_v40 = vcombine.high %v62_v32, %v66_v33  ;;  %v7656_v47 = vcombine.low %v62_v32, %v66_v33  ;;  %v137_v32 = vld [vmem:[%s13000_s1 + $0x2f0] sm:$0xff] }
  0x3a   :  { %960 = vmatpush1.bf16.msra.mxu0 %v7738_v41  ;;  %1073 = vmatpush1.bf16.msra.mxu1 %v7740_v63  ;;  %v7670_v41 = vcombine.low %v77_v27, %v81_v28  ;;  %v7695_v63 = vcombine.high %v101_v54, %v105_v55  ;;  %v110_v27 = vld [vmem:[%s13000_s1 + $0x218] sm:$0xff] }
  0x3b   :  { %961 = vmatprep.subr.bf16.mxu0 %v7747_v43  ;;  %1074 = vmatprep.subr.bf16.mxu1 %v7749_v3  ;;  %v74_v43 = vld [vmem:[%s13000_s1 + $0xf8] sm:$0xff] }
  0x3c   :  { %v7665_v48 = vcombine.high %v70_v42, %v74_v43  ;;  %v7664_v56 = vcombine.low %v70_v42, %v74_v43  ;;  %v114_v28 = vld [vmem:[%s13000_s1 + $0x238] sm:$0xff]  ;;  %v141_v42 = vld [vmem:[%s13000_s1 + $0x310] sm:$0xff] }
  0x3d   :  { %v145_v43 = vld [vmem:[%s13000_s1 + $0x330] sm:$0xff] }
  0x3e   :  { %962 = vmatpush1.bf16.msra.mxu0 %v7746_v49  ;;  %1075 = vmatpush1.bf16.msra.mxu1 %v7748_v8  ;;  %v7678_v49 = vcombine.low %v85_v36, %v89_v37  ;;  %v7703_v8 = vcombine.high %v109_v0, %v113_v1  ;;  %v7705_v36 = vcombine.high %v110_v27, %v114_v28  ;;  %v9675_v55 = vld [vmem:[%s13001_s0 + $0x74] ss:$8 sps:$4 sm:$0xff]  }
  0x3f   :  { %963 = vmatprep.subr.bf16.mxu0 %v7755_v51  ;;  %1076 = vmatprep.subr.bf16.mxu1 %v7757_v11  ;;  %v82_v51 = vld [vmem:[%s13000_s1 + $0x138] sm:$0xff]  ;;  %v121_v11 = vld [vmem:[%s13000_s1 + $0x270] sm:$0xff] }
  0x40   :  { %v7673_v58 = vcombine.high %v78_v50, %v82_v51  ;;  %v7672_v3 = vcombine.low %v78_v50, %v82_v51  ;;  %v7711_v19 = vcombine.high %v117_v10, %v121_v11  ;;  %v9663_v50 = vld [vmem:[%s13001_s0 + $0x60] ss:$8 sps:$4 sm:$0xff]   ;;  %v149_v51 = vld [vmem:[%s13000_s1 + $0x350] sm:$0xff] }
  0x42   :  { %964 = vmatpush1.bf16.msra.mxu0 %v7754_v57  ;;  %1077 = vmatpush1.bf16.msra.mxu1 %v7756_v17  ;;  %v9561_v57 = vld [vmem:[%s13001_s0 + $0x44] ss:$8 sps:$4 sm:$0xff]   ;;  %v102_v17 = vld [vmem:[%s13000_s1 + $0x1d8] sm:$0xff] }
  0x43   :  { %1159 = vmatprep.subr.bf16.mxu0 %v7639_v61  ;;  %1272 = vmatprep.subr.bf16.mxu1 %v7641_v21  ;;  %v90_v61 = vld [vmem:[%s13000_s1 + $0x178] sm:$0xff]  ;;  %v125_v21 = vld [vmem:[%s13000_s1 + $0x290] sm:$0xff]  ;;  %v7697_v25 = vcombine.high %v102_v17, %v106_v18  ;;  %v7696_v33 = vcombine.low %v102_v17, %v106_v18 }
  0x44   :  { %v7681_v4 = vcombine.high %v86_v60, %v90_v61  ;;  %v150_v17 = vld [vmem:[%s13000_s1 + $0x358] sm:$0xff] }
  0x45   :  { %966 = vmatmul.mubr.bf16.vlgmr.msra.gmra.mrb[0].mxu0 %v9438_v62  ;;  %1079 = vmatmul.mubr.bf16.vlgmr.msra.gmra.mrb[0].mxu1 %v9438_v62  ;;  %v154_v18 = vld [vmem:[%s13000_s1 + $0x378] sm:$0xff] }
  0x46   :  { %975 = vmatprep.mubr.bf16.mxu0 %v9449_v2  ;;  %1160 = vmatpush1.bf16.msra.mxu0 %v7638_v6  ;;  %v94_v6 = vld [vmem:[%s13000_s1 + $0x198] sm:$0xff] }
  0x47   :  { %1161 = vmatprep.subr.bf16.mxu0 %v7647_v7  ;;  %1088 = vmatprep.mubr.bf16.mxu1 %v9449_v2  ;;  %v98_v7 = vld [vmem:[%s13000_s1 + $0x1b8] sm:$0xff] }
  0x48   :  { %1273 = vmatpush1.bf16.msra.mxu1 %v7640_v29  ;;  %v7689_v14 = vcombine.high %v94_v6, %v98_v7  ;;  %v7688_v24 = vcombine.low %v94_v6, %v98_v7  ;;  %v146_v6 = vld [vmem:[%s13000_s1 + $0x338] sm:$0xff] }
  0x49   :  { %1274 = vmatprep.subr.bf16.mxu1 %v7649_v30  ;;  %v9625_v30 = vld [vmem:[%s13001_s0 + $0x50] ss:$8 sps:$4 sm:$0xff]  }
  0x4a   :  { %1162 = vmatpush1.bf16.msra.mxu0 %v7646_v12  ;;  %v7680_v12 = vcombine.low %v86_v60, %v90_v61  ;;  %v138_v60 = vld [vmem:[%s13000_s1 + $0x2f8] sm:$0xff] }
  0x4b   :  { %1163 = vmatprep.subr.bf16.mxu0 %v7655_v15  ;;  %v7702_v15 = vcombine.low %v109_v0, %v113_v1  ;;  %v161_v0 = vld [vmem:[%s13000_s1 + $0x3b0] sm:$0xff] }
  0x4c   :  { %1275 = vmatpush1.bf16.msra.mxu1 %v7648_v38  ;;  %v118_v38 = vld [vmem:[%s13000_s1 + $0x258] sm:$0xff] }
  0x4d   :  { %976 = vmatmul.mubr.bf16.gmra.mrb[4].mxu0 %v9474_v16  ;;  %1276 = vmatprep.subr.bf16.mxu1 %v7657_v40  ;;  %v122_v40 = vld [vmem:[%s13000_s1 + $0x278] sm:$0xff] }
  0x4e   :  { %985 = vmatprep.mubr.bf16.mxu0 %v9485_v20  ;;  %1164 = vmatpush1.bf16.msra.mxu0 %v7654_v22  ;;  %v129_v22 = vld [vmem:[%s13000_s1 + $0x2b0] sm:$0xff]  ;;  %v7713_v45 = vcombine.high %v118_v38, %v122_v40  ;;  %v7712_v54 = vcombine.low %v118_v38, %v122_v40  ;;  %v170_v38 = vld [vmem:[%s13000_s1 + $0x3f8] sm:$0xff] }
  0x4f   :  { %1165 = vmatprep.subr.bf16.mxu0 %v7663_v26  ;;  %1089 = vmatmul.mubr.bf16.gmra.mrb[4].mxu1 %v9474_v16  ;;  %v7710_v26 = vcombine.low %v117_v10, %v121_v11  ;;  %v7719_v29 = vcombine.high %v125_v21, %v129_v22  ;;  %v7718_v37 = vcombine.low %v125_v21, %v129_v22  ;;  %v165_v10 = vld [vmem:[%s13000_s1 + $0x3d0] sm:$0xff]  ;;  %v1577_v22 = vld [vmem:[%s13002_s3] sm:$0xff] }
  0x50   :  { %1098 = vmatprep.mubr.bf16.mxu1 %v9485_v20  ;;  %1277 = vmatpush1.bf16.msra.mxu1 %v7656_v47  ;;  %v126_v47 = vld [vmem:[%s13000_s1 + $0x298] sm:$0xff]  ;;  %v169_v11 = vld [vmem:[%s13000_s1 + $0x3f0] sm:$0xff] }
  0x51   :  { %1278 = vmatprep.subr.bf16.mxu1 %v7665_v48  ;;  %v130_v48 = vld [vmem:[%s13000_s1 + $0x2b8] sm:$0xff] }
  0x52   :  { %1166 = vmatpush1.bf16.msra.mxu0 %v7662_v31  ;;  %v133_v31 = vld [vmem:[%s13000_s1 + $0x2d0] sm:$0xff]  ;;  %v7720_v1 = vcombine.low %v126_v47, %v130_v48 }
  0x53   :  { %1167 = vmatprep.subr.bf16.mxu0 %v7671_v34  ;;  %v9637_v34 = vld [vmem:[%s13001_s0 + $0x64] ss:$8 sps:$4 sm:$0xff]   ;;  %v7726_v46 = vcombine.low %v133_v31, %v137_v32 }
  0x54   :  { %1279 = vmatpush1.bf16.msra.mxu1 %v7664_v56  ;;  %v7721_v56 = vcombine.high %v126_v47, %v130_v48  ;;  %v1582_v47 = vld [vmem:[%s13002_s3 + $0x28] sm:$0xff] }
  0x55   :  { %986 = vmatmul.mubr.bf16.gmra.mrb[8].mxu0 %v9511_v35  ;;  %1280 = vmatprep.subr.bf16.mxu1 %v7673_v58  ;;  %v7734_v58 = vcombine.low %v141_v42, %v145_v43 }
  0x56   :  { %995 = vmatprep.mubr.bf16.mxu0 %v9523_v39  ;;  %1168 = vmatpush1.bf16.msra.mxu0 %v7670_v41  ;;  %v7727_v41 = vcombine.high %v133_v31, %v137_v32  ;;  %v7744_v31 = vcombine.low %v150_v17, %v154_v18  ;;  %v1585_v32 = vld [vmem:[%s13002_s3 + $0x40] sm:$0xff] }
  0x57   :  { %1169 = vmatprep.subr.bf16.mxu0 %v7679_v44  ;;  %1099 = vmatmul.mubr.bf16.gmra.mrb[8].mxu1 %v9511_v35  ;;  %v7704_v44 = vcombine.low %v110_v27, %v114_v28  ;;  %v158_v27 = vld [vmem:[%s13000_s1 + $0x398] sm:$0xff] }
  0x58   :  { %1108 = vmatprep.mubr.bf16.mxu1 %v9523_v39  ;;  %1281 = vmatpush1.bf16.msra.mxu1 %v7672_v3  ;;  %v162_v28 = vld [vmem:[%s13000_s1 + $0x3b8] sm:$0xff] }
  0x59   :  { %1282 = vmatprep.subr.bf16.mxu1 %v7681_v4 }
  0x5a   :  { %1170 = vmatpush1.bf16.msra.mxu0 %v7678_v49  ;;  %v7735_v49 = vcombine.high %v141_v42, %v145_v43  ;;  %v7752_v42 = vcombine.low %v158_v27, %v162_v28  ;;  %v1593_v43 = vld [vmem:[%s13002_s3 + $0x80] sm:$0xff] }
  0x5b   :  { %1171 = vmatprep.subr.bf16.mxu0 %v7687_v52  ;;  %v153_v52 = vld [vmem:[%s13000_s1 + $0x370] sm:$0xff] }
  0x5c   :  { %1283 = vmatpush1.bf16.msra.mxu1 %v7680_v12  ;;  %v7743_v61 = vcombine.high %v149_v51, %v153_v52  ;;  %v7742_v4 = vcombine.low %v149_v51, %v153_v52  ;;  %v1601_v52 = vld [vmem:[%s13002_s3 + $0xc0] sm:$0xff] }
  0x5d   :  { %996 = vmatmul.mubr.bf16.gmra.mrb[12].mxu0 %v9549_v53  ;;  %1284 = vmatprep.subr.bf16.mxu1 %v7689_v14 }
  0x5e   :  { %1005 = vmatprep.mubr.bf16.mxu0 %v9561_v57  ;;  %1172 = vmatpush1.bf16.msra.mxu0 %v7686_v59  ;;  %v134_v59 = vld [vmem:[%s13000_s1 + $0x2d8] sm:$0xff] }
  0x5f   :  { %1173 = vmatprep.subr.bf16.mxu0 %v7695_v63  ;;  %1109 = vmatmul.mubr.bf16.gmra.mrb[12].mxu1 %v9549_v53  ;;  %v157_v63 = vld [vmem:[%s13000_s1 + $0x390] sm:$0xff]  ;;  %v7729_v3 = vcombine.high %v134_v59, %v138_v60  ;;  %v7728_v12 = vcombine.low %v134_v59, %v138_v60  ;;  %v1590_v59 = vld [vmem:[%s13002_s3 + $0x68] sm:$0xff] }
  0x60   :  { %1118 = vmatprep.mubr.bf16.mxu1 %v9561_v57  ;;  %1285 = vmatpush1.bf16.msra.mxu1 %v7688_v24  ;;  %v7751_v7 = vcombine.high %v157_v63, %v161_v0  ;;  %v1581_v24 = vld [vmem:[%s13002_s3 + $0x20] sm:$0xff] }
  0x61   :  { %1286 = vmatprep.subr.bf16.mxu1 %v7697_v25  ;;  %v7745_v25 = vcombine.high %v150_v17, %v154_v18  ;;  %v7762_v40 = vcombine.low %v1577_v22, %v1581_v24  ;;  %v1625_v18 = vld [vmem:[%s13002_s3 + $0x180] sm:$0xff] }
  0x62   :  { %1174 = vmatpush1.bf16.msra.mxu0 %v7694_v5  ;;  %v142_v5 = vld [vmem:[%s13000_s1 + $0x318] sm:$0xff] }
  0x63   :  { %1175 = vmatprep.subr.bf16.mxu0 %v7703_v8  ;;  %v9701_v8 = vld [vmem:[%s13001_s0 + $0x70] ss:$8 sps:$4 sm:$0xff]   ;;  %v7737_v14 = vcombine.high %v142_v5, %v146_v6  ;;  %v7736_v21 = vcombine.low %v142_v5, %v146_v6 }
  0x64   :  { %1287 = vmatpush1.bf16.msra.mxu1 %v7696_v33  ;;  %v1589_v33 = vld [vmem:[%s13002_s3 + $0x60] sm:$0xff] }
  0x65   :  { %1006 = vmatmul.mubr.bf16.gmra.mrb[16].mxu0 %v9587_v9  ;;  %1288 = vmatprep.subr.bf16.mxu1 %v7705_v36  ;;  %v7753_v36 = vcombine.high %v158_v27, %v162_v28  ;;  %v7770_v48 = vcombine.low %v1585_v32, %v1589_v33  ;;  %v1633_v28 = vld [vmem:[%s13002_s3 + $0x1c0] sm:$0xff] }
  0x66   :  { %1015 = vmatprep.mubr.bf16.mxu0 %v9599_v13  ;;  %1176 = vmatpush1.bf16.msra.mxu0 %v7702_v15  ;;  %v7750_v15 = vcombine.low %v157_v63, %v161_v0  ;;  %v1609_v63 = vld [vmem:[%s13002_s3 + $0x100] sm:$0xff] }
  0x67   :  { %1177 = vmatprep.subr.bf16.mxu0 %v7711_v19  ;;  %1119 = vmatmul.mubr.bf16.gmra.mrb[16].mxu1 %v9587_v9  ;;  %v7759_v19 = vcombine.high %v165_v10, %v169_v11  ;;  %v1613_v0 = vld [vmem:[%s13002_s3 + $0x120] sm:$0xff] }
  0x68   :  { %1128 = vmatprep.mubr.bf16.mxu1 %v9599_v13  ;;  %1289 = vmatpush1.bf16.msra.mxu1 %v7704_v44  ;;  %v1597_v44 = vld [vmem:[%s13002_s3 + $0xa0] sm:$0xff]  ;;  %v7795_v6 = vcombine.high %v1609_v63, %v1613_v0 }
  0x69   :  { %1290 = vmatprep.subr.bf16.mxu1 %v7713_v45 }
  0x6a   :  { %1178 = vmatpush1.bf16.msra.mxu0 %v7710_v26  ;;  %v7758_v26 = vcombine.low %v165_v10, %v169_v11  ;;  %v1617_v10 = vld [vmem:[%s13002_s3 + $0x140] sm:$0xff] }
  0x6b   :  { %1179 = vmatprep.subr.bf16.mxu0 %v7719_v29  ;;  %v7763_v29 = vcombine.high %v1577_v22, %v1581_v24  ;;  %v1621_v11 = vld [vmem:[%s13002_s3 + $0x160] sm:$0xff]  ;;  %v1610_v22 = vld [vmem:[%s13002_s3 + $0x108] sm:$0xff] }
  0x6c   :  { %1291 = vmatpush1.bf16.msra.mxu1 %v7712_v54  ;;  %v1605_v54 = vld [vmem:[%s13002_s3 + $0xe0] sm:$0xff]  ;;  %v1614_v24 = vld [vmem:[%s13002_s3 + $0x128] sm:$0xff] }
  0x6d   :  { %1016 = vmatmul.mubr.bf16.gmra.mrb[20].mxu0 %v9625_v30  ;;  %1292 = vmatprep.subr.bf16.mxu1 %v7721_v56  ;;  %v7787_v60 = vcombine.high %v1601_v52, %v1605_v54  ;;  %v7786_v5 = vcombine.low %v1601_v52, %v1605_v54 }
  0x6e   :  { %1025 = vmatprep.mubr.bf16.mxu0 %v9637_v34  ;;  %1180 = vmatpush1.bf16.msra.mxu0 %v7718_v37  ;;  %v166_v37 = vld [vmem:[%s13000_s1 + $0x3d8] sm:$0xff] }
  0x6f   :  { %1181 = vmatprep.subr.bf16.mxu0 %v7727_v41  ;;  %1129 = vmatmul.mubr.bf16.gmra.mrb[20].mxu1 %v9625_v30  ;;  %v7771_v41 = vcombine.high %v1585_v32, %v1589_v33  ;;  %v7761_v45 = vcombine.high %v166_v37, %v170_v38  ;;  %v7760_v51 = vcombine.low %v166_v37, %v170_v38  ;;  %v1622_v32 = vld [vmem:[%s13002_s3 + $0x168] sm:$0xff]  ;;  %v1641_v37 = vld [vmem:[%s13002_s3 + $0x200] sm:$0xff] }
  0x70   :  { %1138 = vmatprep.mubr.bf16.mxu1 %v9637_v34  ;;  %1293 = vmatpush1.bf16.msra.mxu1 %v7720_v1  ;;  %v1645_v38 = vld [vmem:[%s13002_s3 + $0x220] sm:$0xff] }
  0x71   :  { %1294 = vmatprep.subr.bf16.mxu1 %v7729_v3  ;;  %v1594_v3 = vld [vmem:[%s13002_s3 + $0x88] sm:$0xff] }
  0x72   :  { %1182 = vmatpush1.bf16.msra.mxu0 %v7726_v46  ;;  %v1578_v46 = vld [vmem:[%s13002_s3 + $0x8] sm:$0xff] }
  0x73   :  { %1183 = vmatprep.subr.bf16.mxu0 %v7735_v49  ;;  %v7779_v49 = vcombine.high %v1593_v43, %v1597_v44  ;;  %v7765_v56 = vcombine.high %v1578_v46, %v1582_v47 }
  0x74   :  { %1295 = vmatpush1.bf16.msra.mxu1 %v7728_v12 }
  0x75   :  { %1026 = vmatmul.mubr.bf16.gmra.mrb[24].mxu0 %v9663_v50  ;;  %1296 = vmatprep.subr.bf16.mxu1 %v7737_v14  ;;  %v1606_v14 = vld [vmem:[%s13002_s3 + $0xe8] sm:$0xff] }
  0x76   :  { %1035 = vmatprep.mubr.bf16.mxu0 %v9675_v55  ;;  %1184 = vmatpush1.bf16.msra.mxu0 %v7734_v58  ;;  %v1586_v58 = vld [vmem:[%s13002_s3 + $0x48] sm:$0xff] }
  0x77   :  { %1185 = vmatprep.subr.bf16.mxu0 %v7743_v61  ;;  %1139 = vmatmul.mubr.bf16.gmra.mrb[24].mxu1 %v9663_v50  ;;  %v7764_v61 = vcombine.low %v1578_v46, %v1582_v47  ;;  %v7773_v1 = vcombine.high %v1586_v58, %v1590_v59  ;;  %v9851_v46 = vld [vmem:[%s13002_s3 + $0x420] sm:$0xff]  ;;  %v9856_v47 = vld [vmem:[%s13002_s3 + $0x408] sm:$0xff] }
  0x78   :  { %1148 = vmatprep.mubr.bf16.mxu1 %v9675_v55  ;;  %1297 = vmatpush1.bf16.msra.mxu1 %v7736_v21 }
  0x79   :  { %1298 = vmatprep.subr.bf16.mxu1 %v7745_v25  ;;  %v7802_v25 = vcombine.low %v1617_v10, %v1621_v11 }
  0x7a   :  { %1186 = vmatpush1.bf16.msra.mxu0 %v7742_v4  ;;  %v1598_v4 = vld [vmem:[%s13002_s3 + $0xa8] sm:$0xff] }
  0x7b   :  { %1187 = vmatprep.subr.bf16.mxu0 %v7751_v7  ;;  %v7772_v7 = vcombine.low %v1586_v58, %v1590_v59  ;;  %v7781_v12 = vcombine.high %v1594_v3, %v1598_v4  ;;  %v7780_v17 = vcombine.low %v1594_v3, %v1598_v4  ;;  %v1638_v58 = vld [vmem:[%s13002_s3 + $0x1e8] sm:$0xff]  ;;  %v7826_v59 = vcombine.low %v1641_v37, %v1645_v38 }
  0x7c   :  { %1299 = vmatpush1.bf16.msra.mxu1 %v7744_v31  ;;  %v7797_v31 = vcombine.high %v1610_v22, %v1614_v24  ;;  %v1646_v3 = vld [vmem:[%s13002_s3 + $0x228] sm:$0xff] }
  0x7d   :  { %1036 = vmatmul.mubr.bf16.gmra.mrb[28].mxu0 %v9701_v8  ;;  %1300 = vmatprep.subr.bf16.mxu1 %v7753_v36  ;;  %v7796_v36 = vcombine.low %v1610_v22, %v1614_v24 }
  0x7e   :  { %1191 = vmatprep.mubr.bf16.mxu0 %v9278_v23  ;;  %1188 = vmatpush1.bf16.msra.mxu0 %v7750_v15  ;;  %v7803_v15 = vcombine.high %v1617_v10, %v1621_v11  ;;  %v1669_v10 = vld [vmem:[%s13002_s3 + $0x2e0] sm:$0xff] }
  0x7f   :  { %1189 = vmatprep.subr.bf16.mxu0 %v7759_v19  ;;  %1149 = vmatmul.mubr.bf16.gmra.mrb[28].mxu1 %v9701_v8  ;;  %v1629_v19 = vld [vmem:[%s13002_s3 + $0x1a0] sm:$0xff] }
  0x80   :  { %1301 = vmatpush1.bf16.msra.mxu1 %v7752_v42  ;;  %1304 = vmatprep.mubr.bf16.mxu1 %v9278_v23  ;;  %v7778_v23 = vcombine.low %v1593_v43, %v1597_v44  ;;  %v1630_v42 = vld [vmem:[%s13002_s3 + $0x1a8] sm:$0xff]  ;;  %v7827_v44 = vcombine.high %v1641_v37, %v1645_v38 }
  0x81   :  { %1302 = vmatprep.subr.bf16.mxu1 %v7761_v45  ;;  %v9846_v45 = vld [vmem:[%s13002_s3 + $0x400] sm:$0xff] }
  0x82   :  { %1190 = vmatpush1.bf16.msra.mxu0 %v7758_v26  ;;  %v7811_v26 = vcombine.high %v1625_v18, %v1629_v19  ;;  %v7890_v54 = vcombine.low %v9846_v45, %v9851_v46 }
  0x83   :  { %4691 = vmatprep.subr.bf16.mxu0 %v7763_v29  ;;  %v1637_v29 = vld [vmem:[%s13002_s3 + $0x1e0] sm:$0xff] }
  0x84   :  { %1303 = vmatpush1.bf16.msra.mxu1 %v7760_v51  ;;  %v7819_v33 = vcombine.high %v1633_v28, %v1637_v29  ;;  %v7818_v43 = vcombine.low %v1633_v28, %v1637_v29  ;;  %v9868_v51 = vld [vmem:[%s13002_s3 + $0x428] sm:$0xff] }
  0x85   :  { %1192 = vmatmul.mubr.bf16.vlgmr.msra.gmra.mrb[32].mxu0 %v9438_v62  ;;  %5143 = vmatprep.subr.bf16.mxu1 %v7765_v56  ;;  %v1634_v56 = vld [vmem:[%s13002_s3 + $0x1c8] sm:$0xff] }
  0x86   :  { %1201 = vmatprep.mubr.bf16.mxu0 %v9449_v2  ;;  %4692 = vmatpush1.bf16.msra.mxu0 %v7762_v40  ;;  %v1670_v28 = vld [vmem:[%s13002_s3 + $0x2e8] sm:$0xff] }
  0x87   :  { %4693 = vmatprep.subr.bf16.mxu0 %v7771_v41  ;;  %1305 = vmatmul.mubr.bf16.vlgmr.msra.gmra.mrb[32].mxu1 %v9438_v62  ;;  %v1602_v62 = vld [vmem:[%s13002_s3 + $0xc8] sm:$0xff] }
  0x88   :  { %5144 = vmatpush1.bf16.msra.mxu1 %v7764_v61  ;;  %1314 = vmatprep.mubr.bf16.mxu1 %v9449_v2  ;;  %v7794_v2 = vcombine.low %v1609_v63, %v1613_v0  ;;  %v7789_v21 = vcombine.high %v1602_v62, %v1606_v14  ;;  %v7788_v27 = vcombine.low %v1602_v62, %v1606_v14  ;;  %v1626_v41 = vld [vmem:[%s13002_s3 + $0x188] sm:$0xff]  ;;  %v1657_v61 = vld [vmem:[%s13002_s3 + $0x280] sm:$0xff] }
  0x89   :  { %5145 = vmatprep.subr.bf16.mxu1 %v7773_v1  ;;  %v7813_v52 = vcombine.high %v1626_v41, %v1630_v42  ;;  %v1661_v63 = vld [vmem:[%s13002_s3 + $0x2a0] sm:$0xff]  ;;  %v7821_v0 = vcombine.high %v1634_v56, %v1638_v58  ;;  %v1642_v1 = vld [vmem:[%s13002_s3 + $0x208] sm:$0xff] }
  0x8a   :  { %4694 = vmatpush1.bf16.msra.mxu0 %v7770_v48  ;;  %v7829_v11 = vcombine.high %v1642_v1, %v1646_v3  ;;  %v7828_v14 = vcombine.low %v1642_v1, %v1646_v3  ;;  %v7893_v1 = vcombine.high %v9856_v47, %v9868_v51  ;;  %v173_v3 = vlaneseq }
  0x8b   :  { %4695 = vmatprep.subr.bf16.mxu0 %v7779_v49  ;;  %v1653_v49 = vld [vmem:[%s13002_s3 + $0x260] sm:$0xff] }
  0x8c   :  { %5146 = vmatpush1.bf16.msra.mxu1 %v7772_v7  ;;  %v1665_v7 = vld [vmem:[%s13002_s3 + $0x2c0] sm:$0xff] }
  0x8d   :  { %1202 = vmatmul.mubr.bf16.gmra.mrb[36].mxu0 %v9474_v16  ;;  %5147 = vmatprep.subr.bf16.mxu1 %v7781_v12  ;;  %v1654_v12 = vld [vmem:[%s13002_s3 + $0x268] sm:$0xff]  ;;  %v7851_v62 = vcombine.high %v1665_v7, %v1669_v10 }
  0x8e   :  { %1211 = vmatprep.mubr.bf16.mxu0 %v9485_v20  ;;  %4696 = vmatpush1.bf16.msra.mxu0 %v7778_v23 }
  0x8f   :  { %4697 = vmatprep.subr.bf16.mxu0 %v7787_v60  ;;  %1315 = vmatmul.mubr.bf16.gmra.mrb[36].mxu1 %v9474_v16  ;;  %v1618_v16 = vld [vmem:[%s13002_s3 + $0x148] sm:$0xff]  ;;  %v7812_v60 = vcombine.low %v1626_v41, %v1630_v42  ;;  %v1697_v41 = vld [vmem:[%s13002_s3 + $0x3c0] sm:$0xff] }
  0x90   :  { %5148 = vmatpush1.bf16.msra.mxu1 %v7780_v17  ;;  %1324 = vmatprep.mubr.bf16.mxu1 %v9485_v20  ;;  %v7810_v20 = vcombine.low %v1625_v18, %v1629_v19  ;;  %v7805_v40 = vcombine.high %v1618_v16, %v1622_v32  ;;  %v7804_v48 = vcombine.low %v1618_v16, %v1622_v32  ;;  %v1658_v18 = vld [vmem:[%s13002_s3 + $0x288] sm:$0xff]  ;;  %v1689_v16 = vld [vmem:[%s13002_s3 + $0x380] sm:$0xff] }
  0x91   :  { %5149 = vmatprep.subr.bf16.mxu1 %v7789_v21  ;;  %v1662_v19 = vld [vmem:[%s13002_s3 + $0x2a8] sm:$0xff]  ;;  %v7850_v21 = vcombine.low %v1665_v7, %v1669_v10  ;;  %v1693_v32 = vld [vmem:[%s13002_s3 + $0x3a0] sm:$0xff] }
  0x92   :  { %4698 = vmatpush1.bf16.msra.mxu0 %v7786_v5  ;;  %v7843_v5 = vcombine.high %v1657_v61, %v1661_v63  ;;  %v7875_v38 = vcombine.high %v1689_v16, %v1693_v32  ;;  %v1701_v42 = vld [vmem:[%s13002_s3 + $0x3e0] sm:$0xff] }
  0x93   :  { %4699 = vmatprep.subr.bf16.mxu0 %v7795_v6  ;;  %v7820_v6 = vcombine.low %v1634_v56, %v1638_v58  ;;  %v1694_v56 = vld [vmem:[%s13002_s3 + $0x3a8] sm:$0xff]  ;;  %v7882_v58 = vcombine.low %v1697_v41, %v1701_v42 }
  0x94   :  { %5150 = vmatpush1.bf16.msra.mxu1 %v7788_v27  ;;  %v7845_v27 = vcombine.high %v1658_v18, %v1662_v19 }
  0x95   :  { %1212 = vmatmul.mubr.bf16.gmra.mrb[40].mxu0 %v9511_v35  ;;  %5151 = vmatprep.subr.bf16.mxu1 %v7797_v31  ;;  %v7844_v31 = vcombine.low %v1658_v18, %v1662_v19 }
  0x96   :  { %1221 = vmatprep.mubr.bf16.mxu0 %v9523_v39  ;;  %4700 = vmatpush1.bf16.msra.mxu0 %v7794_v2  ;;  %v1673_v2 = vld [vmem:[%s13002_s3 + $0x300] sm:$0xff] }
  0x97   :  { %4701 = vmatprep.subr.bf16.mxu0 %v7803_v15  ;;  %1325 = vmatmul.mubr.bf16.gmra.mrb[40].mxu1 %v9511_v35  ;;  %v1649_v35 = vld [vmem:[%s13002_s3 + $0x240] sm:$0xff] }
  0x98   :  { %5152 = vmatpush1.bf16.msra.mxu1 %v7796_v36  ;;  %1334 = vmatprep.mubr.bf16.mxu1 %v9523_v39  ;;  %v7892_v39 = vcombine.low %v9856_v47, %v9868_v51  ;;  %v7835_v23 = vcombine.high %v1649_v35, %v1653_v49  ;;  %v7834_v4 = vcombine.low %v1649_v35, %v1653_v49  ;;  %v1677_v15 = vld [vmem:[%s13002_s3 + $0x320] sm:$0xff]  ;;  %v1678_v36 = vld [vmem:[%s13002_s3 + $0x328] sm:$0xff] }
  0x99   :  { %5153 = vmatprep.subr.bf16.mxu1 %v7805_v40  ;;  %v7859_v22 = vcombine.high %v1673_v2, %v1677_v15 }
  0x9a   :  { %4702 = vmatpush1.bf16.msra.mxu0 %v7802_v25  ;;  %v1681_v25 = vld [vmem:[%s13002_s3 + $0x340] sm:$0xff] }
  0x9b   :  { %4703 = vmatprep.subr.bf16.mxu0 %v7811_v26  ;;  %v1685_v26 = vld [vmem:[%s13002_s3 + $0x360] sm:$0xff] }
  0x9c   :  { %5154 = vmatpush1.bf16.msra.mxu1 %v7804_v48  ;;  %v7867_v29 = vcombine.high %v1681_v25, %v1685_v26  ;;  %v7866_v37 = vcombine.low %v1681_v25, %v1685_v26  ;;  %v7883_v48 = vcombine.high %v1697_v41, %v1701_v42  ;;  %v1717_v26 = vld [vmem:[%s13002_s3 + $0x460] sm:$0xff]  ;;  %v10052_v42 = vld [vmem:[%s13002_s3 + $0x488] sm:$0xff] }
  0x9d   :  { %1222 = vmatmul.mubr.bf16.gmra.mrb[44].mxu0 %v9549_v53  ;;  %5155 = vmatprep.subr.bf16.mxu1 %v7813_v52  ;;  %v1690_v52 = vld [vmem:[%s13002_s3 + $0x388] sm:$0xff] }
  0x9e   :  { %1231 = vmatprep.mubr.bf16.mxu0 %v9561_v57  ;;  %4704 = vmatpush1.bf16.msra.mxu0 %v7810_v20 }
  0x9f   :  { %4705 = vmatprep.subr.bf16.mxu0 %v7819_v33  ;;  %1335 = vmatmul.mubr.bf16.gmra.mrb[44].mxu1 %v9549_v53  ;;  %v1650_v53 = vld [vmem:[%s13002_s3 + $0x248] sm:$0xff] }
  0xa0   :  { %5156 = vmatpush1.bf16.msra.mxu1 %v7812_v60  ;;  %1344 = vmatprep.mubr.bf16.mxu1 %v9561_v57  ;;  %v7842_v57 = vcombine.low %v1657_v61, %v1661_v63  ;;  %v7837_v17 = vcombine.high %v1650_v53, %v1654_v12  ;;  %v7836_v24 = vcombine.low %v1650_v53, %v1654_v12  ;;  %v1674_v33 = vld [vmem:[%s13002_s3 + $0x308] sm:$0xff] }
  0xa1   :  { %5157 = vmatprep.subr.bf16.mxu1 %v7821_v0  ;;  %v7860_v35 = vcombine.low %v1674_v33, %v1678_v36  ;;  %v7877_v60 = vcombine.high %v1690_v52, %v1694_v56  ;;  %v1698_v61 = vld [vmem:[%s13002_s3 + $0x3c8] sm:$0xff] }
  0xa2   :  { %4706 = vmatpush1.bf16.msra.mxu0 %v7818_v43  ;;  %v7861_v43 = vcombine.high %v1674_v33, %v1678_v36  ;;  %v1702_v63 = vld [vmem:[%s13002_s3 + $0x3e8] sm:$0xff]  ;;  %v10034_v36 = vld [vmem:[%s13002_s3 + $0x480] sm:$0xff] }
  0xa3   :  { %4707 = vmatprep.subr.bf16.mxu0 %v7827_v44  ;;  %v1686_v44 = vld [vmem:[%s13002_s3 + $0x368] sm:$0xff]  ;;  %v7885_v0 = vcombine.high %v1698_v61, %v1702_v63 }
  0xa4   :  { %5158 = vmatpush1.bf16.msra.mxu1 %v7820_v6  ;;  %v9990_v6 = vld [vmem:[%s13003_s2] sm:$0xff] }
  0xa5   :  { %1232 = vmatmul.mubr.bf16.gmra.mrb[48].mxu0 %v9587_v9  ;;  %5159 = vmatprep.subr.bf16.mxu1 %v7829_v11 }
  0xa6   :  { %1241 = vmatprep.mubr.bf16.mxu0 %v9599_v13  ;;  %4708 = vmatpush1.bf16.msra.mxu0 %v7826_v59  ;;  %v7891_v59 = vcombine.high %v9846_v45, %v9851_v46  ;;  %v10077_v45 = vld [vmem:[%s13002_s3 + $0x4c0] sm:$0xff] }
  0xa7   :  { %4709 = vmatprep.subr.bf16.mxu0 %v7835_v23  ;;  %1345 = vmatmul.mubr.bf16.gmra.mrb[48].mxu1 %v9587_v9  ;;  %v1666_v9 = vld [vmem:[%s13002_s3 + $0x2c8] sm:$0xff]  ;;  %v10082_v46 = vld [vmem:[%s13002_s3 + $0x4e0] sm:$0xff] }
  0xa8   :  { %5160 = vmatpush1.bf16.msra.mxu1 %v7828_v14  ;;  %1354 = vmatprep.mubr.bf16.mxu1 %v9599_v13  ;;  %v7858_v13 = vcombine.low %v1673_v2, %v1677_v15  ;;  %v7853_v20 = vcombine.high %v1666_v9, %v1670_v28  ;;  %v7852_v40 = vcombine.low %v1666_v9, %v1670_v28  ;;  %v1718_v9 = vld [vmem:[%s13002_s3 + $0x468] sm:$0xff] }
  0xa9   :  { %5161 = vmatprep.subr.bf16.mxu1 %v7837_v17 }
  0xaa   :  { %4710 = vmatpush1.bf16.msra.mxu0 %v7834_v4  ;;  %v9984_v4 = vshrl.u32 %v173_v3, 7 }
  0xab   :  { %4711 = vmatprep.subr.bf16.mxu0 %v7843_v5 }
  0xac   :  { %5162 = vmatpush1.bf16.msra.mxu1 %v7836_v24  ;;  %13069 = vst [vmem:[#allocation2_spill] sm:$0xff] %v9984_v4  ;;  %v13013_v5 = vsub.s32 0, %v9984_v4  ;;  %v13012_v17 = vsub.s32 2, %v9984_v4 }
  0xad   :  { %1242 = vmatmul.mubr.bf16.gmra.mrb[52].mxu0 %v9625_v30  ;;  %5163 = vmatprep.subr.bf16.mxu1 %v7845_v27  ;;  %v1714_v27 = vld [vmem:[%s13002_s3 + $0x448] sm:$0xff] }
  0xae   :  { %1251 = vmatprep.mubr.bf16.mxu0 %v9637_v34  ;;  %4712 = vmatpush1.bf16.msra.mxu0 %v7842_v57  ;;  %v9996_v7 = vrot.slane %v9990_v6, %v13013_v5  ;;  %v7901_v33 = vcombine.high %v1714_v27, %v1718_v9 }
  0xaf   :  { %4713 = vmatprep.subr.bf16.mxu0 %v7851_v62  ;;  %1355 = vmatmul.mubr.bf16.gmra.mrb[52].mxu1 %v9625_v30  ;;  %v1682_v30 = vld [vmem:[%s13002_s3 + $0x348] sm:$0xff] }
  0xb0   :  { %5164 = vmatpush1.bf16.msra.mxu1 %v7844_v31  ;;  %1364 = vmatprep.mubr.bf16.mxu1 %v9637_v34  ;;  %v7874_v34 = vcombine.low %v1689_v16, %v1693_v32  ;;  %v7869_v49 = vcombine.high %v1682_v30, %v1686_v44  ;;  %v7868_v23 = vcombine.low %v1682_v30, %v1686_v44 }
  0xb1   :  { %5165 = vmatprep.subr.bf16.mxu1 %v7853_v20  ;;  %v10028_v31 = vrot.slane %v9990_v6, %v13012_v17 }
  0xb2   :  { %4714 = vmatpush1.bf16.msra.mxu0 %v7850_v21  ;;  %v1713_v21 = vld [vmem:[%s13002_s3 + $0x440] sm:$0xff] }
  0xb3   :  { %4715 = vmatprep.subr.bf16.mxu0 %v7859_v22  ;;  %v13010_v22 = vsub.s32 3, %v9984_v4  ;;  %v7899_v20 = vcombine.high %v1713_v21, %v1717_v26 }
  0xb4   :  { %5166 = vmatpush1.bf16.msra.mxu1 %v7852_v40 }
  0xb5   :  { %1252 = vmatmul.mubr.bf16.gmra.mrb[56].mxu0 %v9663_v50  ;;  %5167 = vmatprep.subr.bf16.mxu1 %v7861_v43  ;;  %v10057_v43 = vld [vmem:[%s13002_s3 + $0x4a8] sm:$0xff] }
  0xb6   :  { %1261 = vmatprep.mubr.bf16.mxu0 %v9675_v55  ;;  %4716 = vmatpush1.bf16.msra.mxu0 %v7858_v13 }
  0xb7   :  { %4717 = vmatprep.subr.bf16.mxu0 %v7867_v29  ;;  %1365 = vmatmul.mubr.bf16.gmra.mrb[56].mxu1 %v9663_v50  ;;  %v7876_v50 = vcombine.low %v1690_v52, %v1694_v56 }
  0xb8   :  { %5168 = vmatpush1.bf16.msra.mxu1 %v7860_v35  ;;  %1374 = vmatprep.mubr.bf16.mxu1 %v9675_v55  ;;  %v7884_v55 = vcombine.low %v1698_v61, %v1702_v63  ;;  %v10088_v61 = vld [vmem:[%s13002_s3 + $0x4c8] sm:$0xff] }
  0xb9   :  { %5169 = vmatprep.subr.bf16.mxu1 %v7869_v49  ;;  %v10093_v63 = vld [vmem:[%s13002_s3 + $0x4e8] sm:$0xff] }
  0xba   :  { %4718 = vmatpush1.bf16.msra.mxu0 %v7866_v37  ;;  %v10039_v37 = vld [vmem:[%s13002_s3 + $0x4a0] sm:$0xff] }
  0xbb   :  { %4719 = vmatprep.subr.bf16.mxu0 %v7875_v38  ;;  %v10044_v38 = vrot.slane %v9990_v6, %v13010_v22  ;;  %v7907_v52 = vcombine.high %v10034_v36, %v10039_v37  ;;  %v13015_v22 = vsub.s32 6, %v9984_v4 }
  0xbc   :  { %5170 = vmatpush1.bf16.msra.mxu1 %v7868_v23 }
  0xbd   :  { %1262 = vmatmul.mubr.bf16.gmra.mrb[60].mxu0 %v9701_v8  ;;  %5171 = vmatprep.subr.bf16.mxu1 %v7877_v60  ;;  %v7909_v60 = vcombine.high %v10052_v42, %v10057_v43 }
  0xbe   :  { %4720 = vmatpush1.bf16.msra.mxu0 %v7874_v34  ;;  %v7898_v34 = vcombine.low %v1713_v21, %v1717_v26  ;;  %v10113_v21 = vld [vmem:[%s13002_s3 + $0x500] sm:$0xff] }
  0xbf   :  { %4721 = vmatprep.subr.bf16.mxu0 %v7883_v48  ;;  %1375 = vmatmul.mubr.bf16.gmra.mrb[60].mxu1 %v9701_v8  ;;  %v13011_v8 = vsub.s32 1, %v9984_v4  ;;  %v7900_v48 = vcombine.low %v1714_v27, %v1718_v9  ;;  %v7914_v9 = vcombine.low %v10077_v45, %v10082_v46 }
  0xc0   :  { %5172 = vmatpush1.bf16.msra.mxu1 %v7876_v50 }
  0xc1   :  { %5173 = vmatprep.subr.bf16.mxu1 %v7885_v0  ;;  %v10001_v10 = vrot.slane %v9990_v6, %v13011_v8 }
  0xc2   :  { %4722 = vmatpush1.bf16.msra.mxu0 %v7882_v58 }
  0xc3   :  { %4804 = vmatprep.subr.bf16.mxu0 %v7891_v59 }
  0xc4   :  { %5174 = vmatpush1.bf16.msra.mxu1 %v7884_v55 }
  0xc5   :  { %5256 = vmatprep.subr.bf16.mxu1 %v7893_v1 }
 0x118   :  { %v967_v11 = vpop.f32.mrb[0].mxu0  ;;  %v1080_v35 = vpop.f32.mrb[0].mxu1 }
 0x119   :  { %v968_v53 = vadd.f32 %v967_v11, %v9996_v7  ;;  %v969_v12 = vpop.f32.mrb[1].mxu0  ;;  %v1081_v56 = vadd.f32 %v1080_v35, %v10028_v31  ;;  %v1082_v58 = vpop.f32.mrb[1].mxu1  ;;  %v10153_v35 = vld [vmem:[%s13002_s3 + $0x540] sm:$0xff] }
 0x11a   :  { %v970_v57 = vadd.f32 %v969_v12, %v10001_v10  ;;  %v971_v62 = vpop.f32.mrb[2].mxu0  ;;  %v1083_v47 = vadd.f32 %v1082_v58, %v10044_v38  ;;  %v1084_v51 = vpop.f32.mrb[2].mxu1 }
 0x11b   :  { %v972_v14 = vadd.f32 %v971_v62, %v9996_v7  ;;  %v973_v2 = vpop.f32.mrb[3].mxu0  ;;  %v1385_v18 = vmax.f32 %v968_v53, 0.0  ;;  %v1387_v50 = vmax.f32 %v1081_v56, 0.0  ;;  %v1085_v0 = vadd.f32 %v1084_v51, %v10028_v31  ;;  %v1086_v55 = vpop.f32.mrb[3].mxu1 }
 0x11c   :  { %v974_v15 = vadd.f32 %v973_v2, %v10001_v10  ;;  %v1386_v24 = vmax.f32 %v970_v57, 0.0  ;;  %v1388_v3 = vmax.f32 %v1083_v47, 0.0  ;;  %v1087_v11 = vadd.f32 %v1086_v55, %v10044_v38 }
 0x11d   :  { %v1393_v19 = vmax.f32 %v972_v14, 0.0  ;;  %v7906_v57 = vcombine.low %v10034_v36, %v10039_v37  ;;  %v7908_v62 = vcombine.low %v10052_v42, %v10057_v43  ;;  %v1395_v14 = vmax.f32 %v1085_v0, 0.0 }
 0x11e   :  { %v1394_v25 = vmax.f32 %v974_v15, 0.0  ;;  %v7916_v36 = vcombine.low %v10088_v61, %v10093_v63 }
 0x11f   :  { %v10021_v28 = vpack.c.bf16 %v1393_v19, %v1385_v18  ;;  %v7915_v18 = vcombine.high %v10077_v45, %v10082_v46  ;;  %v7917_v19 = vcombine.high %v10088_v61, %v10093_v63 }
 0x120   :  { %v10023_v13 = vpack.c.bf16 %v1394_v25, %v1386_v24  ;;  %v977_v29 = vpop.f32.mrb[4].mxu0  ;;  %v10118_v24 = vld [vmem:[%s13002_s3 + $0x520] sm:$0xff]  ;;  %v1396_v25 = vmax.f32 %v1087_v11, 0.0 }
 0x121   :  { %v978_v16 = vadd.f32 %v977_v29, %v9996_v7  ;;  %v979_v32 = vpop.f32.mrb[5].mxu0  ;;  %v10128_v29 = vld [vmem:[%s13002_s3 + $0x508] sm:$0xff]  ;;  %v7923_v42 = vcombine.high %v10113_v21, %v10118_v24 }
 0x122   :  { %v980_v40 = vadd.f32 %v979_v32, %v10001_v10  ;;  %v981_v41 = vpop.f32.mrb[6].mxu0  ;;  %4723 = vmatprep.mubr.bf16.mxu0 %v10023_v13  ;;  %5175 = vmatprep.mubr.bf16.mxu1 %v10023_v13  ;;  %v10135_v32 = vpack.c.bf16 %v1395_v14, %v1387_v50  ;;  %v10142_v37 = vpack.c.bf16 %v1396_v25, %v1388_v3  ;;  %v10194_v14 = vld [vmem:[%s13002_s3 + $0x5a0] sm:$0xff] }
 0x123   :  { %v982_v30 = vadd.f32 %v981_v41, %v9996_v7  ;;  %v983_v44 = vpop.f32.mrb[7].mxu0  ;;  %4724 = vmatmul.mubr.bf16.vlgmr.msra.gmra.mrb[64].mxu0 %v10021_v28  ;;  %5176 = vmatmul.mubr.bf16.vlgmr.msra.gmra.mrb[64].mxu1 %v10021_v28  ;;  %v1401_v59 = vmax.f32 %v978_v16, 0.0  ;;  %v10133_v16 = vld [vmem:[%s13002_s3 + $0x528] sm:$0xff]  ;;  %v7922_v50 = vcombine.low %v10113_v21, %v10118_v24 }
 0x124   :  { %v984_v49 = vadd.f32 %v983_v44, %v10001_v10  ;;  %4805 = vmatpush1.bf16.msra.mxu0 %v7890_v54  ;;  %5257 = vmatpush1.bf16.msra.mxu1 %v7892_v39  ;;  %v1402_v54 = vmax.f32 %v980_v40, 0.0  ;;  %13070 = vst [vmem:[#allocation3_spill] sm:$0xff] %v10135_v32  ;;  %13071 = vst [vmem:[#allocation4_spill] sm:$0xff] %v10142_v37  ;;  %v1090_v40 = vpop.f32.mrb[4].mxu1  ;;  %v7924_v0 = vcombine.low %v10128_v29, %v10133_v16  ;;  %v10204_v21 = vld [vmem:[%s13002_s3 + $0x588] sm:$0xff] }
 0x125   :  { %v1409_v23 = vmax.f32 %v982_v30, 0.0  ;;  %4806 = vmatprep.subr.bf16.mxu0 %v7899_v20  ;;  %5258 = vmatprep.subr.bf16.mxu1 %v7901_v33  ;;  %v1091_v43 = vadd.f32 %v1090_v40, %v10028_v31  ;;  %v1092_v30 = vpop.f32.mrb[5].mxu1  ;;  %v10209_v24 = vld [vmem:[%s13002_s3 + $0x5a8] sm:$0xff] }
 0x126   :  { %v1410_v39 = vmax.f32 %v984_v49, 0.0  ;;  %v10158_v49 = vld [vmem:[%s13002_s3 + $0x560] sm:$0xff]  ;;  %v1094_v56 = vpop.f32.mrb[6].mxu1 }
 0x127   :  { %v10096_v1 = vpack.c.bf16 %v1409_v23, %v1401_v59  ;;  %v10164_v23 = vld [vmem:[%s13002_s3 + $0x548] sm:$0xff]  ;;  %v1403_v45 = vmax.f32 %v1091_v43, 0.0  ;;  %v1095_v46 = vadd.f32 %v1094_v56, %v10028_v31  ;;  %v1096_v47 = vpop.f32.mrb[7].mxu1  ;;  %v7941_v43 = vcombine.high %v10204_v21, %v10209_v24 }
 0x128   :  { %v10099_v53 = vpack.c.bf16 %v1410_v39, %v1402_v54  ;;  %4807 = vmatpush1.bf16.msra.mxu0 %v7898_v34  ;;  %v987_v12 = vpop.f32.mrb[8].mxu0  ;;  %5259 = vmatpush1.bf16.msra.mxu1 %v7900_v48  ;;  %v7925_v48 = vcombine.high %v10128_v29, %v10133_v16  ;;  %v1097_v39 = vadd.f32 %v1096_v47, %v10044_v38  ;;  %v10245_v56 = vld [vmem:[%s13002_s3 + $0x5e8] sm:$0xff] }
 0x129   :  { %v988_v2 = vadd.f32 %v987_v12, %v9996_v7  ;;  %v989_v15 = vpop.f32.mrb[9].mxu0  ;;  %4808 = vmatprep.subr.bf16.mxu0 %v7907_v52  ;;  %5260 = vmatprep.subr.bf16.mxu1 %v7909_v60  ;;  %v1093_v52 = vadd.f32 %v1092_v30, %v10044_v38  ;;  %v10169_v60 = vld [vmem:[%s13002_s3 + $0x568] sm:$0xff]  ;;  %v1411_v55 = vmax.f32 %v1095_v46, 0.0  ;;  %v7931_v12 = vcombine.high %v10153_v35, %v10158_v49  ;;  %v10229_v30 = vld [vmem:[%s13002_s3 + $0x5c0] sm:$0xff] }
 0x12a   :  { %v990_v26 = vadd.f32 %v989_v15, %v10001_v10  ;;  %v991_v27 = vpop.f32.mrb[10].mxu0  ;;  %4733 = vmatprep.mubr.bf16.mxu0 %v10099_v53  ;;  %5185 = vmatprep.mubr.bf16.mxu1 %v10099_v53  ;;  %v1100_v16 = vpop.f32.mrb[8].mxu1 }
 0x12b   :  { %v992_v20 = vadd.f32 %v991_v27, %v9996_v7  ;;  %v993_v33 = vpop.f32.mrb[11].mxu0  ;;  %4734 = vmatmul.mubr.bf16.gmra.mrb[68].mxu0 %v10096_v1  ;;  %5186 = vmatmul.mubr.bf16.gmra.mrb[68].mxu1 %v10096_v1  ;;  %v1417_v44 = vmax.f32 %v988_v2, 0.0  ;;  %v1404_v54 = vmax.f32 %v1093_v52, 0.0  ;;  %v1412_v2 = vmax.f32 %v1097_v39, 0.0  ;;  %v1102_v40 = vpop.f32.mrb[9].mxu1  ;;  %v10240_v52 = vld [vmem:[%s13002_s3 + $0x5c8] sm:$0xff] }
 0x12c   :  { %v994_v41 = vadd.f32 %v993_v33, %v10001_v10  ;;  %4809 = vmatpush1.bf16.msra.mxu0 %v7906_v57  ;;  %5261 = vmatpush1.bf16.msra.mxu1 %v7908_v62  ;;  %v1418_v58 = vmax.f32 %v990_v26, 0.0  ;;  %v7933_v57 = vcombine.high %v10164_v23, %v10169_v60  ;;  %v10189_v62 = vld [vmem:[%s13002_s3 + $0x580] sm:$0xff]  ;;  %v10211_v25 = vpack.c.bf16 %v1411_v55, %v1403_v45 }
 0x12d   :  { %v1425_v34 = vmax.f32 %v992_v20, 0.0  ;;  %4810 = vmatprep.subr.bf16.mxu0 %v7915_v18  ;;  %5262 = vmatprep.subr.bf16.mxu1 %v7917_v19  ;;  %v7930_v19 = vcombine.low %v10153_v35, %v10158_v49  ;;  %v10218_v29 = vpack.c.bf16 %v1412_v2, %v1404_v54  ;;  %v7939_v33 = vcombine.high %v10189_v62, %v10194_v14 }
 0x12e   :  { %v1426_v59 = vmax.f32 %v994_v41, 0.0  ;;  %13072 = vst [vmem:[#allocation5_spill] sm:$0xff] %v10211_v25  ;;  %v7938_v39 = vcombine.low %v10189_v62, %v10194_v14 }
 0x12f   :  { %v10172_v51 = vpack.c.bf16 %v1425_v34, %v1417_v44  ;;  %13073 = vst [vmem:[#allocation6_spill] sm:$0xff] %v10218_v29  ;;  %v10234_v44 = vld [vmem:[%s13002_s3 + $0x5e0] sm:$0xff]  ;;  %v1103_v34 = vadd.f32 %v1102_v40, %v10044_v38 }
 0x130   :  { %v10175_v61 = vpack.c.bf16 %v1426_v59, %v1418_v58  ;;  %4811 = vmatpush1.bf16.msra.mxu0 %v7914_v9  ;;  %v997_v63 = vpop.f32.mrb[12].mxu0  ;;  %5263 = vmatpush1.bf16.msra.mxu1 %v7916_v36  ;;  %v7932_v9 = vcombine.low %v10164_v23, %v10169_v60  ;;  %v1101_v36 = vadd.f32 %v1100_v16, %v10028_v31 }
 0x131   :  { %v998_v3 = vadd.f32 %v997_v63, %v9996_v7  ;;  %v999_v11 = vpop.f32.mrb[13].mxu0  ;;  %4812 = vmatprep.subr.bf16.mxu0 %v7923_v42  ;;  %5264 = vmatprep.subr.bf16.mxu1 %v7925_v48  ;;  %v1104_v48 = vpop.f32.mrb[10].mxu1  ;;  %v1420_v45 = vmax.f32 %v1103_v34, 0.0  ;;  %v7940_v63 = vcombine.low %v10204_v21, %v10209_v24 }
 0x132   :  { %v1000_v15 = vadd.f32 %v999_v11, %v10001_v10  ;;  %v1001_v18 = vpop.f32.mrb[14].mxu0  ;;  %4743 = vmatprep.mubr.bf16.mxu0 %v10175_v61  ;;  %5195 = vmatprep.mubr.bf16.mxu1 %v10175_v61  ;;  %v1419_v58 = vmax.f32 %v1101_v36, 0.0  ;;  %v1105_v59 = vadd.f32 %v1104_v48, %v10028_v31  ;;  %v1106_v23 = vpop.f32.mrb[11].mxu1  ;;  %v7949_v11 = vcombine.high %v10240_v52, %v10245_v56 }
 0x133   :  { %v1002_v26 = vadd.f32 %v1001_v18, %v9996_v7  ;;  %v1003_v27 = vpop.f32.mrb[15].mxu0  ;;  %4744 = vmatmul.mubr.bf16.gmra.mrb[72].mxu0 %v10172_v51  ;;  %5196 = vmatmul.mubr.bf16.gmra.mrb[72].mxu1 %v10172_v51  ;;  %v1433_v41 = vmax.f32 %v998_v3, 0.0  ;;  %v1107_v46 = vadd.f32 %v1106_v23, %v10044_v38  ;;  %v7947_v3 = vcombine.high %v10229_v30, %v10234_v44  ;;  %v10280_v18 = vld [vmem:[%s13002_s3 + $0x608] sm:$0xff]  ;;  %v1110_v16 = vpop.f32.mrb[12].mxu1 }
 0x134   :  { %v1004_v20 = vadd.f32 %v1003_v27, %v10001_v10  ;;  %4813 = vmatpush1.bf16.msra.mxu0 %v7922_v50  ;;  %5265 = vmatpush1.bf16.msra.mxu1 %v7924_v0  ;;  %v1434_v35 = vmax.f32 %v1000_v15, 0.0  ;;  %v1427_v50 = vmax.f32 %v1105_v59, 0.0  ;;  %v7946_v15 = vcombine.low %v10229_v30, %v10234_v44  ;;  %v1112_v40 = vpop.f32.mrb[13].mxu1  ;;  %v10305_v30 = vld [vmem:[%s13002_s3 + $0x640] sm:$0xff] }
 0x135   :  { %v1441_v42 = vmax.f32 %v1002_v26, 0.0  ;;  %4814 = vmatprep.subr.bf16.mxu0 %v7931_v12  ;;  %5266 = vmatprep.subr.bf16.mxu1 %v7933_v57  ;;  %v10265_v12 = vld [vmem:[%s13002_s3 + $0x600] sm:$0xff]  ;;  %v1428_v62 = vmax.f32 %v1107_v46, 0.0  ;;  %v7948_v27 = vcombine.low %v10240_v52, %v10245_v56  ;;  %v1111_v36 = vadd.f32 %v1110_v16, %v10028_v31  ;;  %v1114_v48 = vpop.f32.mrb[14].mxu1  ;;  %v10316_v52 = vld [vmem:[%s13002_s3 + $0x648] sm:$0xff] }
 0x136   :  { %v1442_v49 = vmax.f32 %v1004_v20, 0.0  ;;  %v10270_v57 = vld [vmem:[%s13002_s3 + $0x620] sm:$0xff]  ;;  %v10287_v21 = vpack.c.bf16 %v1427_v50, %v1419_v58  ;;  %v1113_v34 = vadd.f32 %v1112_v40, %v10044_v38  ;;  %v10321_v56 = vld [vmem:[%s13002_s3 + $0x668] sm:$0xff]  ;;  %v1115_v59 = vadd.f32 %v1114_v48, %v10028_v31  ;;  %v1116_v23 = vpop.f32.mrb[15].mxu1 }
 0x137   :  { %v10248_v60 = vpack.c.bf16 %v1441_v42, %v1433_v41  ;;  %v10310_v44 = vld [vmem:[%s13002_s3 + $0x660] sm:$0xff]  ;;  %v1435_v58 = vmax.f32 %v1111_v36, 0.0  ;;  %v7954_v46 = vcombine.low %v10265_v12, %v10270_v57 }
 0x138   :  { %v10251_v47 = vpack.c.bf16 %v1442_v49, %v1434_v35  ;;  %4815 = vmatpush1.bf16.msra.mxu0 %v7930_v19  ;;  %v1007_v54 = vpop.f32.mrb[16].mxu0  ;;  %5267 = vmatpush1.bf16.msra.mxu1 %v7932_v9  ;;  %v10285_v19 = vld [vmem:[%s13002_s3 + $0x628] sm:$0xff]  ;;  %13076 = vst [vmem:[#allocation9_spill] sm:$0xff] %v10287_v21  ;;  %v10294_v9 = vpack.c.bf16 %v1428_v62, %v1420_v45 }
 0x139   :  { %13074 = vst [vmem:[#allocation7_spill] sm:$0xff] %v10248_v60  ;;  %v1008_v0 = vadd.f32 %v1007_v54, %v9996_v7  ;;  %v1009_v55 = vpop.f32.mrb[17].mxu0  ;;  %4816 = vmatprep.subr.bf16.mxu0 %v7939_v33  ;;  %5268 = vmatprep.subr.bf16.mxu1 %v7941_v43  ;;  %v7955_v33 = vcombine.high %v10265_v12, %v10270_v57  ;;  %v1436_v54 = vmax.f32 %v1113_v34, 0.0  ;;  %v1443_v12 = vmax.f32 %v1115_v59, 0.0 }
 0x13a   :  { %13075 = vst [vmem:[#allocation8_spill] sm:$0xff] %v10251_v47  ;;  %v1010_v14 = vadd.f32 %v1009_v55, %v10001_v10  ;;  %v1011_v2 = vpop.f32.mrb[18].mxu0  ;;  %4753 = vmatprep.mubr.bf16.mxu0 %v10251_v47  ;;  %5205 = vmatprep.mubr.bf16.mxu1 %v10251_v47  ;;  %13077 = vst [vmem:[#allocation10_spill] sm:$0xff] %v10294_v9  ;;  %v7957_v43 = vcombine.high %v10280_v18, %v10285_v19 }
 0x13b   :  { %v1012_v24 = vadd.f32 %v1011_v2, %v9996_v7  ;;  %v1013_v26 = vpop.f32.mrb[19].mxu0  ;;  %4754 = vmatmul.mubr.bf16.gmra.mrb[76].mxu0 %v10248_v60  ;;  %5206 = vmatmul.mubr.bf16.gmra.mrb[76].mxu1 %v10248_v60  ;;  %v1449_v41 = vmax.f32 %v1008_v0, 0.0  ;;  %v7956_v0 = vcombine.low %v10280_v18, %v10285_v19  ;;  %v7963_v55 = vcombine.high %v10305_v30, %v10310_v44 }
 0x13c   :  { %v1014_v20 = vadd.f32 %v1013_v26, %v10001_v10  ;;  %4817 = vmatpush1.bf16.msra.mxu0 %v7938_v39  ;;  %5269 = vmatpush1.bf16.msra.mxu1 %v7940_v63  ;;  %v1450_v35 = vmax.f32 %v1010_v14, 0.0  ;;  %v1117_v39 = vadd.f32 %v1116_v23, %v10044_v38  ;;  %v7962_v14 = vcombine.low %v10305_v30, %v10310_v44  ;;  %v10358_v26 = vld [vmem:[%s13002_s3 + $0x688] sm:$0xff] }
 0x13d   :  { %v1457_v42 = vmax.f32 %v1012_v24, 0.0  ;;  %4818 = vmatprep.subr.bf16.mxu0 %v7947_v3  ;;  %5270 = vmatprep.subr.bf16.mxu1 %v7949_v11  ;;  %v10338_v3 = vld [vmem:[%s13002_s3 + $0x680] sm:$0xff]  ;;  %v7965_v2 = vcombine.high %v10316_v52, %v10321_v56  ;;  %v7964_v24 = vcombine.low %v10316_v52, %v10321_v56  ;;  %v10365_v16 = vpack.c.bf16 %v1443_v12, %v1435_v58 }
 0x13e   :  { %v1458_v49 = vmax.f32 %v1014_v20, 0.0  ;;  %v10343_v11 = vld [vmem:[%s13002_s3 + $0x6a0] sm:$0xff] }
 0x13f   :  { %v10324_v45 = vpack.c.bf16 %v1457_v42, %v1449_v41  ;;  %13080 = vst [vmem:[#allocation13_spill] sm:$0xff] %v10365_v16  ;;  %v7971_v36 = vcombine.high %v10338_v3, %v10343_v11  ;;  %v1120_v41 = vpop.f32.mrb[16].mxu1  ;;  %v10388_v52 = vld [vmem:[%s13002_s3 + $0x6e0] sm:$0xff] }
 0x140   :  { %v10329_v63 = vpack.c.bf16 %v1458_v49, %v1450_v35  ;;  %4819 = vmatpush1.bf16.msra.mxu0 %v7946_v15  ;;  %v1017_v50 = vpop.f32.mrb[20].mxu0  ;;  %5271 = vmatpush1.bf16.msra.mxu1 %v7948_v27  ;;  %v1444_v15 = vmax.f32 %v1117_v39, 0.0  ;;  %v10363_v27 = vld [vmem:[%s13002_s3 + $0x6a8] sm:$0xff]  ;;  %v1121_v30 = vadd.f32 %v1120_v41, %v10028_v31  ;;  %v1122_v44 = vpop.f32.mrb[17].mxu1  ;;  %v10383_v49 = vld [vmem:[%s13002_s3 + $0x6c0] sm:$0xff] }
 0x141   :  { %13078 = vst [vmem:[#allocation11_spill] sm:$0xff] %v10324_v45  ;;  %v1018_v57 = vadd.f32 %v1017_v50, %v9996_v7  ;;  %v1019_v62 = vpop.f32.mrb[21].mxu0  ;;  %4820 = vmatprep.subr.bf16.mxu0 %v7955_v33  ;;  %5272 = vmatprep.subr.bf16.mxu1 %v7957_v43  ;;  %v7970_v43 = vcombine.low %v10338_v3, %v10343_v11  ;;  %v1124_v58 = vpop.f32.mrb[18].mxu1  ;;  %v10409_v11 = vld [vmem:[%s13002_s3 + $0x700] sm:$0xff]  ;;  %v10436_v41 = vld [vmem:[%s13002_s3 + $0x728] sm:$0xff] }
 0x142   :  { %13079 = vst [vmem:[#allocation12_spill] sm:$0xff] %v10329_v63  ;;  %v1020_v18 = vadd.f32 %v1019_v62, %v10001_v10  ;;  %v1021_v19 = vpop.f32.mrb[22].mxu0  ;;  %4763 = vmatprep.mubr.bf16.mxu0 %v10329_v63  ;;  %5215 = vmatprep.mubr.bf16.mxu1 %v10329_v63  ;;  %v10372_v40 = vpack.c.bf16 %v1444_v15, %v1436_v54  ;;  %v10399_v54 = vld [vmem:[%s13002_s3 + $0x6e8] sm:$0xff]  ;;  %v1451_v39 = vmax.f32 %v1121_v30, 0.0  ;;  %v10414_v12 = vld [vmem:[%s13002_s3 + $0x720] sm:$0xff] }
 0x143   :  { %v1022_v20 = vadd.f32 %v1021_v19, %v9996_v7  ;;  %v1023_v33 = vpop.f32.mrb[23].mxu0  ;;  %4764 = vmatmul.mubr.bf16.gmra.mrb[80].mxu0 %v10324_v45  ;;  %5216 = vmatmul.mubr.bf16.gmra.mrb[80].mxu1 %v10324_v45  ;;  %v1465_v34 = vmax.f32 %v1018_v57, 0.0  ;;  %v7973_v35 = vcombine.high %v10358_v26, %v10363_v27  ;;  %v1123_v56 = vadd.f32 %v1122_v44, %v10044_v38 }
 0x144   :  { %13081 = vst [vmem:[#allocation14_spill] sm:$0xff] %v10372_v40  ;;  %v1024_v42 = vadd.f32 %v1023_v33, %v10001_v10  ;;  %4821 = vmatpush1.bf16.msra.mxu0 %v7954_v46  ;;  %5273 = vmatpush1.bf16.msra.mxu1 %v7956_v0  ;;  %v1466_v59 = vmax.f32 %v1020_v18, 0.0  ;;  %v10394_v46 = vld [vmem:[%s13002_s3 + $0x6c8] sm:$0xff]  ;;  %v1125_v50 = vadd.f32 %v1124_v58, %v10028_v31  ;;  %v1126_v0 = vpop.f32.mrb[19].mxu1 }
 0x145   :  { %v1473_v48 = vmax.f32 %v1022_v20, 0.0  ;;  %4822 = vmatprep.subr.bf16.mxu0 %v7963_v55  ;;  %5274 = vmatprep.subr.bf16.mxu1 %v7965_v2  ;;  %v7972_v3 = vcombine.low %v10358_v26, %v10363_v27  ;;  %v1452_v57 = vmax.f32 %v1123_v56, 0.0  ;;  %v1127_v62 = vadd.f32 %v1126_v0, %v10044_v38  ;;  %v1130_v56 = vpop.f32.mrb[20].mxu1 }
 0x146   :  { %v1474_v23 = vmax.f32 %v1024_v42, 0.0  ;;  %v7978_v18 = vcombine.low %v10383_v49, %v10388_v52  ;;  %v7979_v19 = vcombine.high %v10383_v49, %v10388_v52  ;;  %v1459_v26 = vmax.f32 %v1125_v50, 0.0 }
 0x147   :  { %v10402_v55 = vpack.c.bf16 %v1473_v48, %v1465_v34  ;;  %v7980_v33 = vcombine.low %v10394_v46, %v10399_v54  ;;  %v1460_v42 = vmax.f32 %v1127_v62, 0.0  ;;  %v7987_v44 = vcombine.high %v10409_v11, %v10414_v12 }
 0x148   :  { %v10417_v2 = vpack.c.bf16 %v1474_v23, %v1466_v59  ;;  %4823 = vmatpush1.bf16.msra.mxu0 %v7962_v14  ;;  %v1027_v15 = vpop.f32.mrb[24].mxu0  ;;  %5275 = vmatpush1.bf16.msra.mxu1 %v7964_v24  ;;  %v7981_v14 = vcombine.high %v10394_v46, %v10399_v54  ;;  %v10431_v24 = vld [vmem:[%s13002_s3 + $0x708] sm:$0xff]  ;;  %v10443_v34 = vpack.c.bf16 %v1459_v26, %v1451_v39  ;;  %v10458_v23 = vld [vmem:[%s13002_s3 + $0x740] sm:$0xff]  ;;  %v1132_v39 = vpop.f32.mrb[21].mxu1 }
 0x149   :  { %13082 = vst [vmem:[#allocation15_spill] sm:$0xff] %v10402_v55  ;;  %v1028_v27 = vadd.f32 %v1027_v15, %v9996_v7  ;;  %v1029_v20 = vpop.f32.mrb[25].mxu0  ;;  %4824 = vmatprep.subr.bf16.mxu0 %v7971_v36  ;;  %5276 = vmatprep.subr.bf16.mxu1 %v7973_v35  ;;  %v7986_v49 = vcombine.low %v10409_v11, %v10414_v12  ;;  %v10463_v46 = vld [vmem:[%s13002_s3 + $0x760] sm:$0xff]  ;;  %v10476_v11 = vld [vmem:[%s13002_s3 + $0x768] sm:$0xff] }
 0x14a   :  { %13083 = vst [vmem:[#allocation16_spill] sm:$0xff] %v10417_v2  ;;  %v1030_v36 = vadd.f32 %v1029_v20, %v10001_v10  ;;  %v1031_v30 = vpop.f32.mrb[26].mxu0  ;;  %4773 = vmatprep.mubr.bf16.mxu0 %v10417_v2  ;;  %5225 = vmatprep.mubr.bf16.mxu1 %v10417_v2  ;;  %13084 = vst [vmem:[#allocation17_spill] sm:$0xff] %v10443_v34  ;;  %v10450_v52 = vpack.c.bf16 %v1460_v42, %v1452_v57  ;;  %v1134_v57 = vpop.f32.mrb[22].mxu1 }
 0x14b   :  { %v1032_v48 = vadd.f32 %v1031_v30, %v9996_v7  ;;  %v1033_v35 = vpop.f32.mrb[27].mxu0  ;;  %4774 = vmatmul.mubr.bf16.gmra.mrb[84].mxu0 %v10402_v55  ;;  %5226 = vmatmul.mubr.bf16.gmra.mrb[84].mxu1 %v10402_v55  ;;  %v7988_v59 = vcombine.low %v10431_v24, %v10436_v41  ;;  %v1131_v54 = vadd.f32 %v1130_v56, %v10028_v31  ;;  %v1481_v50 = vmax.f32 %v1028_v27, 0.0  ;;  %v1136_v27 = vpop.f32.mrb[23].mxu1 }
 0x14c   :  { %13085 = vst [vmem:[#allocation18_spill] sm:$0xff] %v10450_v52  ;;  %v1034_v58 = vadd.f32 %v1033_v35, %v10001_v10  ;;  %4825 = vmatpush1.bf16.msra.mxu0 %v7970_v43  ;;  %5277 = vmatpush1.bf16.msra.mxu1 %v7972_v3  ;;  %v7989_v43 = vcombine.high %v10431_v24, %v10436_v41  ;;  %v10471_v3 = vld [vmem:[%s13002_s3 + $0x748] sm:$0xff]  ;;  %v1482_v62 = vmax.f32 %v1030_v36, 0.0  ;;  %v10487_v24 = vld [vmem:[%s13002_s3 + $0x780] sm:$0xff] }
 0x14d   :  { %v1489_v0 = vmax.f32 %v1032_v48, 0.0  ;;  %4826 = vmatprep.subr.bf16.mxu0 %v7979_v19  ;;  %5278 = vmatprep.subr.bf16.mxu1 %v7981_v14  ;;  %v1133_v12 = vadd.f32 %v1132_v39, %v10044_v38  ;;  %v1467_v19 = vmax.f32 %v1131_v54, 0.0  ;;  %v1135_v26 = vadd.f32 %v1134_v57, %v10028_v31  ;;  %v10492_v41 = vld [vmem:[%s13002_s3 + $0x7a0] sm:$0xff] }
 0x14e   :  { %v1490_v15 = vmax.f32 %v1034_v58, 0.0  ;;  %v7995_v14 = vcombine.high %v10458_v23, %v10463_v46  ;;  %v1137_v36 = vadd.f32 %v1136_v27, %v10044_v38  ;;  %v7994_v35 = vcombine.low %v10458_v23, %v10463_v46 }
 0x14f   :  { %v10480_v20 = vpack.c.bf16 %v1489_v0, %v1481_v50  ;;  %v1468_v42 = vmax.f32 %v1133_v12, 0.0  ;;  %v7996_v56 = vcombine.low %v10471_v3, %v10476_v11  ;;  %v1475_v58 = vmax.f32 %v1135_v26, 0.0 }
 0x150   :  { %v10495_v30 = vpack.c.bf16 %v1490_v15, %v1482_v62  ;;  %4827 = vmatpush1.bf16.msra.mxu0 %v7978_v18  ;;  %v1037_v48 = vpop.f32.mrb[28].mxu0  ;;  %5279 = vmatpush1.bf16.msra.mxu1 %v7980_v33  ;;  %v7997_v50 = vcombine.high %v10471_v3, %v10476_v11  ;;  %v10507_v18 = vld [vmem:[%s13002_s3 + $0x788] sm:$0xff]  ;;  %v1476_v23 = vmax.f32 %v1137_v36, 0.0  ;;  %v13009_v46 = vsub.s32 4, %v9984_v4  ;;  %v1140_v15 = vpop.f32.mrb[24].mxu1 }
 0x151   :  { %13086 = vst [vmem:[#allocation19_spill] sm:$0xff] %v10480_v20  ;;  %v1038_v54 = vadd.f32 %v1037_v48, %v9996_v7  ;;  %v1039_v39 = vpop.f32.mrb[29].mxu0  ;;  %4828 = vmatprep.subr.bf16.mxu0 %v7987_v44  ;;  %5280 = vmatprep.subr.bf16.mxu1 %v7989_v43  ;;  %v10512_v33 = vld [vmem:[%s13002_s3 + $0x7a8] sm:$0xff]  ;;  %v8003_v43 = vcombine.high %v10487_v24, %v10492_v41  ;;  %v13008_v26 = vsub.s32 5, %v9984_v4  ;;  %v1142_v36 = vpop.f32.mrb[25].mxu1 }
 0x152   :  { %13087 = vst [vmem:[#allocation20_spill] sm:$0xff] %v10495_v30  ;;  %v1040_v0 = vadd.f32 %v1039_v39, %v10001_v10  ;;  %v1041_v44 = vpop.f32.mrb[30].mxu0  ;;  %4783 = vmatprep.mubr.bf16.mxu0 %v10495_v30  ;;  %5235 = vmatprep.mubr.bf16.mxu1 %v10495_v30  ;;  %v10520_v3 = vpack.c.bf16 %v1475_v58, %v1467_v19  ;;  %v10558_v39 = vld [vmem:[%s13002_s3 + $0x7e8] sm:$0xff] }
 0x153   :  { %v1042_v11 = vadd.f32 %v1041_v44, %v9996_v7  ;;  %v1043_v12 = vpop.f32.mrb[31].mxu0  ;;  %4784 = vmatmul.mubr.bf16.gmra.mrb[88].mxu0 %v10480_v20  ;;  %5236 = vmatmul.mubr.bf16.gmra.mrb[88].mxu1 %v10480_v20  ;;  %v8002_v57 = vcombine.low %v10487_v24, %v10492_v41  ;;  %v10527_v62 = vpack.c.bf16 %v1476_v23, %v1468_v42  ;;  %v1497_v48 = vmax.f32 %v1038_v54, 0.0  ;;  %v10537_v24 = vld [vmem:[%s13002_s3 + $0x7c0] sm:$0xff]  ;;  %v10553_v54 = vld [vmem:[%s13002_s3 + $0x7c8] sm:$0xff] }
 0x154   :  { %13088 = vst [vmem:[#allocation21_spill] sm:$0xff] %v10520_v3  ;;  %v1044_v27 = vadd.f32 %v1043_v12, %v10001_v10  ;;  %4829 = vmatpush1.bf16.msra.mxu0 %v7986_v49  ;;  %5281 = vmatpush1.bf16.msra.mxu1 %v7988_v59  ;;  %v8005_v7 = vcombine.high %v10507_v18, %v10512_v33  ;;  %v10542_v10 = vld [vmem:[%s13002_s3 + $0x7e0] sm:$0xff]  ;;  %v1144_v59 = vpop.f32.mrb[26].mxu1 }
 0x155   :  { %13089 = vst [vmem:[#allocation22_spill] sm:$0xff] %v10527_v62  ;;  %v1141_v19 = vadd.f32 %v1140_v15, %v10028_v31  ;;  %v1505_v58 = vmax.f32 %v1042_v11, 0.0  ;;  %4830 = vmatprep.subr.bf16.mxu0 %v7995_v14  ;;  %5282 = vmatprep.subr.bf16.mxu1 %v7997_v50  ;;  %v1143_v49 = vadd.f32 %v1142_v36, %v10044_v38  ;;  %v1498_v14 = vmax.f32 %v1040_v0, 0.0  ;;  %v1146_v44 = vpop.f32.mrb[27].mxu1  ;;  %v10566_v0 = vld [vmem:[%s13002_s3 + $0x800] sm:$0xff] }
 0x156   :  { %v10548_v41 = vrot.slane %v9990_v6, %v13009_v46  ;;  %v1506_v42 = vmax.f32 %v1044_v27, 0.0  ;;  %v1145_v23 = vadd.f32 %v1144_v59, %v10028_v31  ;;  %v10571_v12 = vld [vmem:[%s13002_s3 + $0x820] sm:$0xff]  ;;  %v1147_v27 = vadd.f32 %v1146_v44, %v10044_v38  ;;  %v10593_v59 = vld [vmem:[%s13002_s3 + $0x828] sm:$0xff] }
 0x157   :  { %v1483_v50 = vmax.f32 %v1141_v19, 0.0  ;;  %v10561_v11 = vpack.c.bf16 %v1505_v58, %v1497_v48  ;;  %v1484_v15 = vmax.f32 %v1143_v49, 0.0  ;;  %v10577_v19 = vrot.slane %v9990_v6, %v13008_v26  ;;  %v10588_v49 = vld [vmem:[%s13002_s3 + $0x808] sm:$0xff] }
 0x158   :  { %v10579_v36 = vpack.c.bf16 %v1506_v42, %v1498_v14  ;;  %4831 = vmatpush1.bf16.msra.mxu0 %v7994_v35  ;;  %5283 = vmatpush1.bf16.msra.mxu1 %v7996_v56  ;;  %v8004_v48 = vcombine.low %v10507_v18, %v10512_v33  ;;  %v8010_v58 = vcombine.low %v10537_v24, %v10542_v10  ;;  %v1491_v14 = vmax.f32 %v1145_v23, 0.0  ;;  %v1193_v42 = vpop.f32.mrb[32].mxu0 }
 0x159   :  { %13090 = vst [vmem:[#allocation23_spill] sm:$0xff] %v10561_v11  ;;  %4832 = vmatprep.subr.bf16.mxu0 %v8003_v43  ;;  %5284 = vmatprep.subr.bf16.mxu1 %v8005_v7  ;;  %v8011_v35 = vcombine.high %v10537_v24, %v10542_v10  ;;  %v8012_v56 = vcombine.low %v10553_v54, %v10558_v39  ;;  %v1492_v33 = vmax.f32 %v1147_v27, 0.0  ;;  %v1195_v24 = vpop.f32.mrb[33].mxu0 }
 0x15a   :  { %13091 = vst [vmem:[#allocation24_spill] sm:$0xff] %v10579_v36  ;;  %v8013_v18 = vcombine.high %v10553_v54, %v10558_v39  ;;  %4793 = vmatprep.mubr.bf16.mxu0 %v10579_v36  ;;  %5245 = vmatprep.mubr.bf16.mxu1 %v10579_v36  ;;  %v8019_v23 = vcombine.high %v10566_v0, %v10571_v12  ;;  %v1150_v39 = vpop.f32.mrb[28].mxu1  ;;  %v1197_v27 = vpop.f32.mrb[34].mxu0 }
 0x15b   :  { %v10605_v43 = vpack.c.bf16 %v1491_v14, %v1483_v50  ;;  %v1194_v7 = vadd.f32 %v1193_v42, %v10548_v41  ;;  %4794 = vmatmul.mubr.bf16.gmra.mrb[92].mxu0 %v10561_v11  ;;  %5246 = vmatmul.mubr.bf16.gmra.mrb[92].mxu1 %v10561_v11  ;;  %v8021_v10 = vcombine.high %v10588_v49, %v10593_v59  ;;  %v1152_v14 = vpop.f32.mrb[29].mxu1  ;;  %v1199_v46 = vpop.f32.mrb[35].mxu0 }
 0x15c   :  { %v10612_v54 = vpack.c.bf16 %v1492_v33, %v1484_v15  ;;  %v1196_v44 = vadd.f32 %v1195_v24, %v10577_v19  ;;  %4833 = vmatpush1.bf16.msra.mxu0 %v8002_v57  ;;  %5285 = vmatpush1.bf16.msra.mxu1 %v8004_v48  ;;  %v1151_v50 = vadd.f32 %v1150_v39, %v10028_v31  ;;  %v1154_v33 = vpop.f32.mrb[30].mxu1  ;;  %v13014_v57 = vsub.s32 7, %v9984_v4  ;;  %v10626_v48 = vld [vmem:[%s13002_s3 + $0x840] sm:$0xff] }
 0x15d   :  { %13092 = vst [vmem:[#allocation25_spill] sm:$0xff] %v10605_v43  ;;  %v1389_v42 = vmax.f32 %v1194_v7, 0.0  ;;  %v1198_v26 = vadd.f32 %v1197_v27, %v10548_v41  ;;  %4834 = vmatprep.subr.bf16.mxu0 %v8011_v35  ;;  %4836 = vmatprep.mubr.bf16.mxu0 %v10142_v37  ;;  %v1153_v15 = vadd.f32 %v1152_v14, %v10044_v38  ;;  %v10631_v35 = vld [vmem:[%s13002_s3 + $0x860] sm:$0xff]  ;;  %v10639_v27 = vld [vmem:[%s13002_s3 + $0x848] sm:$0xff] }
 0x15e   :  { %13093 = vst [vmem:[#allocation26_spill] sm:$0xff] %v10612_v54  ;;  %v1390_v8 = vmax.f32 %v1196_v44, 0.0  ;;  %v1200_v24 = vadd.f32 %v1199_v46, %v10577_v19  ;;  %5286 = vmatprep.subr.bf16.mxu1 %v8013_v18  ;;  %5288 = vmatprep.mubr.bf16.mxu1 %v10142_v37  ;;  %v1499_v7 = vmax.f32 %v1151_v50, 0.0  ;;  %v1155_v39 = vadd.f32 %v1154_v33, %v10028_v31  ;;  %v1156_v44 = vpop.f32.mrb[31].mxu1  ;;  %v1846_v14 = vld [vmem:[%s13002_s3 + $0x868] sm:$0xff] }
 0x15f   :  { %v1397_v46 = vmax.f32 %v1198_v26, 0.0  ;;  %v8018_v18 = vcombine.low %v10566_v0, %v10571_v12  ;;  %v1500_v17 = vmax.f32 %v1153_v15, 0.0  ;;  %v1157_v5 = vadd.f32 %v1156_v44, %v10044_v38  ;;  %v10659_v38 = vld [vmem:[%s13002_s3 + $0x880] sm:$0xff]  ;;  %v10679_v33 = vld [vmem:[%s13002_s3 + $0x888] sm:$0xff] }
 0x160   :  { %v1398_v50 = vmax.f32 %v1200_v24, 0.0  ;;  %4835 = vmatpush1.bf16.msra.mxu0 %v8010_v58  ;;  %5287 = vmatpush1.bf16.msra.mxu1 %v8012_v56  ;;  %v8020_v31 = vcombine.low %v10588_v49, %v10593_v59  ;;  %v1507_v26 = vmax.f32 %v1155_v39, 0.0  ;;  %v10652_v12 = vrot.slane %v9990_v6, %v13015_v22  ;;  %v10664_v58 = vld [vmem:[%s13002_s3 + $0x8a0] sm:$0xff]  ;;  %v1203_v56 = vpop.f32.mrb[36].mxu0 }
 0x161   :  { %v10647_v0 = vpack.c.bf16 %v1397_v46, %v1389_v42  ;;  %4917 = vmatprep.subr.bf16.mxu0 %v8019_v23  ;;  %5369 = vmatprep.subr.bf16.mxu1 %v8021_v10  ;;  %v8027_v15 = vcombine.high %v10626_v48, %v10631_v35  ;;  %v1508_v49 = vmax.f32 %v1157_v5, 0.0  ;;  %v10671_v23 = vrot.slane %v9990_v6, %v13014_v57  ;;  %v10684_v5 = vld [vmem:[%s13002_s3 + $0x8a8] sm:$0xff]  ;;  %v1205_v24 = vpop.f32.mrb[37].mxu0  ;;  %v1306_v46 = vpop.f32.mrb[32].mxu1 }
 0x162   :  { %v10666_v59 = vpack.c.bf16 %v1398_v50, %v1390_v8  ;;  %v8026_v10 = vcombine.low %v10626_v48, %v10631_v35  ;;  %v8029_v42 = vcombine.high %v10639_v27, %v1846_v14  ;;  %v10686_v8 = vpack.c.bf16 %v1507_v26, %v1499_v7  ;;  %v1207_v44 = vpop.f32.mrb[38].mxu0  ;;  %v1308_v22 = vpop.f32.mrb[33].mxu1 }
 0x163   :  { %v1204_v6 = vadd.f32 %v1203_v56, %v10548_v41  ;;  %4837 = vmatmul.mubr.bf16.vlgmr.msra.gmra.mrb[64].mxu0 %v10135_v32  ;;  %5289 = vmatmul.mubr.bf16.vlgmr.msra.gmra.mrb[64].mxu1 %v10135_v32  ;;  %v8028_v48 = vcombine.low %v10639_v27, %v1846_v14  ;;  %v10692_v35 = vpack.c.bf16 %v1508_v49, %v1500_v17  ;;  %v1209_v56 = vpop.f32.mrb[39].mxu0  ;;  %v10708_v49 = vld [vmem:[%s13002_s3 + $0x8c0] sm:$0xff] }
 0x164   :  { %v1206_v39 = vadd.f32 %v1205_v24, %v10577_v19  ;;  %4918 = vmatpush1.bf16.msra.mxu0 %v8018_v18  ;;  %5370 = vmatpush1.bf16.msra.mxu1 %v8020_v31  ;;  %v8035_v7 = vcombine.high %v10659_v38, %v10664_v58  ;;  %v1208_v26 = vadd.f32 %v1207_v44, %v10548_v41  ;;  %v1310_v31 = vpop.f32.mrb[34].mxu1 }
 0x165   :  { %13094 = vst [vmem:[#allocation27_spill] sm:$0xff] %v10692_v35  ;;  %v1405_v50 = vmax.f32 %v1204_v6, 0.0  ;;  %v1307_v57 = vadd.f32 %v1306_v46, %v10652_v12  ;;  %4919 = vmatprep.subr.bf16.mxu0 %v8027_v15  ;;  %4846 = vmatprep.mubr.bf16.mxu0 %v10218_v29  ;;  %v8037_v17 = vcombine.high %v10679_v33, %v10684_v5  ;;  %v10713_v15 = vld [vmem:[%s13002_s3 + $0x8e0] sm:$0xff]  ;;  %v1312_v44 = vpop.f32.mrb[35].mxu1 }
 0x166   :  { %v1406_v27 = vmax.f32 %v1206_v39, 0.0  ;;  %v1210_v18 = vadd.f32 %v1209_v56, %v10577_v19  ;;  %v1309_v14 = vadd.f32 %v1308_v22, %v10671_v23  ;;  %5298 = vmatprep.mubr.bf16.mxu1 %v10218_v29  ;;  %5371 = vmatprep.subr.bf16.mxu1 %v8029_v42  ;;  %v1413_v6 = vmax.f32 %v1208_v26, 0.0  ;;  %v1858_v22 = vld [vmem:[%s13002_s3 + $0x8c8] sm:$0xff] }
 0x167   :  { %v1391_v24 = vmax.f32 %v1307_v57, 0.0  ;;  %v1311_v39 = vadd.f32 %v1310_v31, %v10652_v12  ;;  %v1862_v42 = vld [vmem:[%s13002_s3 + $0x8e8] sm:$0xff]  ;;  %v1313_v4 = vadd.f32 %v1312_v44, %v10671_v23  ;;  %v8034_v57 = vcombine.low %v10659_v38, %v10664_v58  ;;  %v10739_v38 = vld [vmem:[%s13002_s3 + $0x920] sm:$0xff] }
 0x168   :  { %v1414_v46 = vmax.f32 %v1210_v18, 0.0  ;;  %v1392_v56 = vmax.f32 %v1309_v14, 0.0  ;;  %4920 = vmatpush1.bf16.msra.mxu0 %v8026_v10  ;;  %5372 = vmatpush1.bf16.msra.mxu1 %v8028_v48  ;;  %v8036_v26 = vcombine.low %v10679_v33, %v10684_v5  ;;  %v10727_v31 = vpack.c.bf16 %v1413_v6, %v1405_v50  ;;  %v10734_v18 = vld [vmem:[%s13002_s3 + $0x900] sm:$0xff]  ;;  %v1213_v10 = vpop.f32.mrb[40].mxu0  ;;  %v10753_v50 = vld [vmem:[%s13002_s3 + $0x928] sm:$0xff] }
 0x169   :  { %v1399_v29 = vmax.f32 %v1311_v39, 0.0  ;;  %4921 = vmatprep.subr.bf16.mxu0 %v8035_v7  ;;  %5373 = vmatprep.subr.bf16.mxu1 %v8037_v17  ;;  %v8043_v32 = vcombine.high %v10708_v49, %v10713_v15  ;;  %v1400_v33 = vmax.f32 %v1313_v4, 0.0  ;;  %v8042_v5 = vcombine.low %v10708_v49, %v10713_v15  ;;  %v10748_v7 = vld [vmem:[%s13002_s3 + $0x908] sm:$0xff]  ;;  %v1316_v39 = vpop.f32.mrb[36].mxu1 }
 0x16a   :  { %v10741_v58 = vpack.c.bf16 %v1414_v46, %v1406_v27  ;;  %v8045_v48 = vcombine.high %v1858_v22, %v1862_v42  ;;  %v1214_v17 = vadd.f32 %v1213_v10, %v10548_v41  ;;  %v1215_v27 = vpop.f32.mrb[41].mxu0  ;;  %v8044_v4 = vcombine.low %v1858_v22, %v1862_v42  ;;  %v1318_v37 = vpop.f32.mrb[37].mxu1 }
 0x16b   :  { %v10756_v14 = vpack.c.bf16 %v1399_v29, %v1391_v24  ;;  %4847 = vmatmul.mubr.bf16.gmra.mrb[68].mxu0 %v10211_v25  ;;  %5299 = vmatmul.mubr.bf16.gmra.mrb[68].mxu1 %v10211_v25  ;;  %v1216_v49 = vadd.f32 %v1215_v27, %v10577_v19  ;;  %v1217_v15 = vpop.f32.mrb[42].mxu0  ;;  %v10761_v6 = vpack.c.bf16 %v1400_v33, %v1392_v56  ;;  %v10776_v33 = vld [vmem:[%s13002_s3 + $0x940] sm:$0xff] }
 0x16c   :  { %4922 = vmatpush1.bf16.msra.mxu0 %v8034_v57  ;;  %5374 = vmatpush1.bf16.msra.mxu1 %v8036_v26  ;;  %v8051_v44 = vcombine.high %v10734_v18, %v10739_v38  ;;  %v1421_v46 = vmax.f32 %v1214_v17, 0.0  ;;  %v1218_v29 = vadd.f32 %v1217_v15, %v10548_v41  ;;  %v1219_v24 = vpop.f32.mrb[43].mxu0  ;;  %v1317_v10 = vadd.f32 %v1316_v39, %v10652_v12  ;;  %v1320_v26 = vpop.f32.mrb[38].mxu1 }
 0x16d   :  { %4923 = vmatprep.subr.bf16.mxu0 %v8043_v32  ;;  %4856 = vmatprep.mubr.bf16.mxu0 %v10294_v9  ;;  %v8053_v22 = vcombine.high %v10748_v7, %v10753_v50  ;;  %v1422_v42 = vmax.f32 %v1216_v49, 0.0  ;;  %v1220_v56 = vadd.f32 %v1219_v24, %v10577_v19  ;;  %v1319_v57 = vadd.f32 %v1318_v37, %v10671_v23  ;;  %v10781_v32 = vld [vmem:[%s13002_s3 + $0x960] sm:$0xff]  ;;  %v1322_v15 = vpop.f32.mrb[39].mxu1  ;;  %v1874_v37 = vld [vmem:[%s13002_s3 + $0x948] sm:$0xff] }
 0x16e   :  { %5308 = vmatprep.mubr.bf16.mxu1 %v10294_v9  ;;  %5375 = vmatprep.subr.bf16.mxu1 %v8045_v48  ;;  %v1429_v17 = vmax.f32 %v1218_v29, 0.0  ;;  %v1407_v27 = vmax.f32 %v1317_v10, 0.0  ;;  %v1321_v49 = vadd.f32 %v1320_v26, %v10652_v12  ;;  %v1878_v48 = vld [vmem:[%s13002_s3 + $0x968] sm:$0xff]  ;;  %v1323_v9 = vadd.f32 %v1322_v15, %v10671_v23 }
 0x16f   :  { %v1430_v39 = vmax.f32 %v1220_v56, 0.0  ;;  %v1408_v24 = vmax.f32 %v1319_v57, 0.0  ;;  %v8050_v29 = vcombine.low %v10734_v18, %v10739_v38  ;;  %v8052_v10 = vcombine.low %v10748_v7, %v10753_v50  ;;  %v10802_v56 = vld [vmem:[%s13002_s3 + $0x980] sm:$0xff] }
 0x170   :  { %4924 = vmatpush1.bf16.msra.mxu0 %v8042_v5  ;;  %5376 = vmatpush1.bf16.msra.mxu1 %v8044_v4  ;;  %v10795_v26 = vpack.c.bf16 %v1429_v17, %v1421_v46  ;;  %v1415_v25 = vmax.f32 %v1321_v49, 0.0  ;;  %v8059_v11 = vcombine.high %v10776_v33, %v10781_v32  ;;  %v10807_v18 = vld [vmem:[%s13002_s3 + $0x9a0] sm:$0xff]  ;;  %v1223_v5 = vpop.f32.mrb[44].mxu0  ;;  %v1416_v7 = vmax.f32 %v1323_v9, 0.0  ;;  %v10821_v46 = vld [vmem:[%s13002_s3 + $0x9a8] sm:$0xff]  ;;  %v1326_v49 = vpop.f32.mrb[40].mxu1 }
 0x171   :  { %4925 = vmatprep.subr.bf16.mxu0 %v8051_v44  ;;  %5377 = vmatprep.subr.bf16.mxu1 %v8053_v22  ;;  %v10809_v38 = vpack.c.bf16 %v1430_v39, %v1422_v42  ;;  %v8058_v50 = vcombine.low %v10776_v33, %v10781_v32  ;;  %v8061_v4 = vcombine.high %v1874_v37, %v1878_v48  ;;  %v10816_v44 = vld [vmem:[%s13002_s3 + $0x988] sm:$0xff]  ;;  %v1225_v42 = vpop.f32.mrb[45].mxu0  ;;  %v1328_v36 = vpop.f32.mrb[41].mxu1 }
 0x172   :  { %v1224_v22 = vadd.f32 %v1223_v5, %v10548_v41  ;;  %v10824_v57 = vpack.c.bf16 %v1415_v25, %v1407_v27  ;;  %v8060_v9 = vcombine.low %v1874_v37, %v1878_v48  ;;  %v1226_v33 = vadd.f32 %v1225_v42, %v10577_v19  ;;  %v1227_v32 = vpop.f32.mrb[46].mxu0 }
 0x173   :  { %4857 = vmatmul.mubr.bf16.gmra.mrb[72].mxu0 %v10287_v21  ;;  %5309 = vmatmul.mubr.bf16.gmra.mrb[72].mxu1 %v10287_v21  ;;  %v10829_v17 = vpack.c.bf16 %v1416_v7, %v1408_v24  ;;  %v8067_v15 = vcombine.high %v10802_v56, %v10807_v18  ;;  %v1228_v25 = vadd.f32 %v1227_v32, %v10548_v41  ;;  %v1229_v27 = vpop.f32.mrb[47].mxu0  ;;  %v10844_v7 = vld [vmem:[%s13002_s3 + $0x9c0] sm:$0xff] }
 0x174   :  { %4926 = vmatpush1.bf16.msra.mxu0 %v8050_v29  ;;  %5378 = vmatpush1.bf16.msra.mxu1 %v8052_v10  ;;  %v1437_v39 = vmax.f32 %v1224_v22, 0.0  ;;  %v1327_v5 = vadd.f32 %v1326_v49, %v10652_v12  ;;  %v8069_v37 = vcombine.high %v10816_v44, %v10821_v46  ;;  %v1438_v48 = vmax.f32 %v1226_v33, 0.0  ;;  %v1330_v10 = vpop.f32.mrb[42].mxu1 }
 0x175   :  { %4927 = vmatprep.subr.bf16.mxu0 %v8059_v11  ;;  %4866 = vmatprep.mubr.bf16.mxu0 %v10372_v40  ;;  %v1230_v24 = vadd.f32 %v1229_v27, %v10577_v19  ;;  %v1329_v29 = vadd.f32 %v1328_v36, %v10671_v23  ;;  %v10849_v11 = vld [vmem:[%s13002_s3 + $0x9e0] sm:$0xff]  ;;  %v1445_v22 = vmax.f32 %v1228_v25, 0.0  ;;  %v1331_v33 = vadd.f32 %v1330_v10, %v10652_v12  ;;  %v1332_v32 = vpop.f32.mrb[43].mxu1  ;;  %v1890_v36 = vld [vmem:[%s13002_s3 + $0x9c8] sm:$0xff] }
 0x176   :  { %5318 = vmatprep.mubr.bf16.mxu1 %v10372_v40  ;;  %5379 = vmatprep.subr.bf16.mxu1 %v8061_v4  ;;  %v1423_v42 = vmax.f32 %v1327_v5, 0.0  ;;  %v1894_v4 = vld [vmem:[%s13002_s3 + $0x9e8] sm:$0xff]  ;;  %v1333_v40 = vadd.f32 %v1332_v32, %v10671_v23  ;;  %v8066_v25 = vcombine.low %v10802_v56, %v10807_v18  ;;  %v8068_v5 = vcombine.low %v10816_v44, %v10821_v46  ;;  %v10875_v56 = vld [vmem:[%s13002_s3 + $0xa20] sm:$0xff] }
 0x177   :  { %v1446_v49 = vmax.f32 %v1230_v24, 0.0  ;;  %v1424_v27 = vmax.f32 %v1329_v29, 0.0  ;;  %v10863_v10 = vpack.c.bf16 %v1445_v22, %v1437_v39  ;;  %v1431_v21 = vmax.f32 %v1331_v33, 0.0  ;;  %v10870_v24 = vld [vmem:[%s13002_s3 + $0xa00] sm:$0xff]  ;;  %v10889_v39 = vld [vmem:[%s13002_s3 + $0xa28] sm:$0xff]  ;;  %v1336_v33 = vpop.f32.mrb[44].mxu1 }
 0x178   :  { %4928 = vmatpush1.bf16.msra.mxu0 %v8058_v50  ;;  %5380 = vmatpush1.bf16.msra.mxu1 %v8060_v9  ;;  %v8075_v20 = vcombine.high %v10844_v7, %v10849_v11  ;;  %v1233_v50 = vpop.f32.mrb[48].mxu0  ;;  %v1432_v44 = vmax.f32 %v1333_v40, 0.0  ;;  %v8074_v46 = vcombine.low %v10844_v7, %v10849_v11  ;;  %v8077_v9 = vcombine.high %v1890_v36, %v1894_v4  ;;  %v1338_v30 = vpop.f32.mrb[45].mxu1 }
 0x179   :  { %4929 = vmatprep.subr.bf16.mxu0 %v8067_v15  ;;  %5381 = vmatprep.subr.bf16.mxu1 %v8069_v37  ;;  %v10877_v18 = vpack.c.bf16 %v1446_v49, %v1438_v48  ;;  %v10884_v15 = vld [vmem:[%s13002_s3 + $0xa08] sm:$0xff]  ;;  %v1234_v37 = vadd.f32 %v1233_v50, %v10548_v41  ;;  %v1235_v48 = vpop.f32.mrb[49].mxu0  ;;  %v10892_v29 = vpack.c.bf16 %v1431_v21, %v1423_v42 }
 0x17a   :  { %v8076_v40 = vcombine.low %v1890_v36, %v1894_v4  ;;  %v1236_v7 = vadd.f32 %v1235_v48, %v10577_v19  ;;  %v1237_v11 = vpop.f32.mrb[50].mxu0  ;;  %v10897_v22 = vpack.c.bf16 %v1432_v44, %v1424_v27  ;;  %v8083_v32 = vcombine.high %v10870_v24, %v10875_v56  ;;  %v10912_v44 = vld [vmem:[%s13002_s3 + $0xa40] sm:$0xff] }
 0x17b   :  { %4867 = vmatmul.mubr.bf16.gmra.mrb[76].mxu0 %v10365_v16  ;;  %5319 = vmatmul.mubr.bf16.gmra.mrb[76].mxu1 %v10365_v16  ;;  %v1453_v49 = vmax.f32 %v1234_v37, 0.0  ;;  %v1238_v21 = vadd.f32 %v1237_v11, %v10548_v41  ;;  %v1239_v42 = vpop.f32.mrb[51].mxu0  ;;  %v1337_v50 = vadd.f32 %v1336_v33, %v10652_v12  ;;  %v8085_v36 = vcombine.high %v10884_v15, %v10889_v39 }
 0x17c   :  { %4930 = vmatpush1.bf16.msra.mxu0 %v8066_v25  ;;  %5382 = vmatpush1.bf16.msra.mxu1 %v8068_v5  ;;  %v1454_v4 = vmax.f32 %v1236_v7, 0.0  ;;  %v1240_v27 = vadd.f32 %v1239_v42, %v10577_v19  ;;  %v1339_v25 = vadd.f32 %v1338_v30, %v10671_v23  ;;  %v1340_v5 = vpop.f32.mrb[46].mxu1  ;;  %v1906_v30 = vld [vmem:[%s13002_s3 + $0xa48] sm:$0xff] }
 0x17d   :  { %4931 = vmatprep.subr.bf16.mxu0 %v8075_v20  ;;  %4876 = vmatprep.mubr.bf16.mxu0 %v10450_v52  ;;  %v10917_v20 = vld [vmem:[%s13002_s3 + $0xa60] sm:$0xff]  ;;  %v1461_v37 = vmax.f32 %v1238_v21, 0.0  ;;  %v1439_v48 = vmax.f32 %v1337_v50, 0.0  ;;  %v1341_v7 = vadd.f32 %v1340_v5, %v10652_v12  ;;  %v1342_v11 = vpop.f32.mrb[47].mxu1  ;;  %v8082_v21 = vcombine.low %v10870_v24, %v10875_v56 }
 0x17e   :  { %5328 = vmatprep.mubr.bf16.mxu1 %v10450_v52  ;;  %5383 = vmatprep.subr.bf16.mxu1 %v8077_v9  ;;  %v1910_v9 = vld [vmem:[%s13002_s3 + $0xa68] sm:$0xff]  ;;  %v1462_v33 = vmax.f32 %v1240_v27, 0.0  ;;  %v1440_v42 = vmax.f32 %v1339_v25, 0.0  ;;  %v1343_v52 = vadd.f32 %v1342_v11, %v10671_v23  ;;  %v8084_v50 = vcombine.low %v10884_v15, %v10889_v39  ;;  %v10938_v27 = vld [vmem:[%s13002_s3 + $0xa80] sm:$0xff] }
 0x17f   :  { %v10931_v5 = vpack.c.bf16 %v1461_v37, %v1453_v49  ;;  %v1447_v16 = vmax.f32 %v1341_v7, 0.0  ;;  %v8091_v55 = vcombine.high %v10912_v44, %v10917_v20  ;;  %v10943_v24 = vld [vmem:[%s13002_s3 + $0xaa0] sm:$0xff]  ;;  %v8090_v39 = vcombine.low %v10912_v44, %v10917_v20  ;;  %v10957_v49 = vld [vmem:[%s13002_s3 + $0xaa8] sm:$0xff]  ;;  %v1346_v7 = vpop.f32.mrb[48].mxu1 }
 0x180   :  { %4932 = vmatpush1.bf16.msra.mxu0 %v8074_v46  ;;  %5384 = vmatpush1.bf16.msra.mxu1 %v8076_v40  ;;  %v10945_v56 = vpack.c.bf16 %v1462_v33, %v1454_v4  ;;  %v1243_v46 = vpop.f32.mrb[52].mxu0  ;;  %v1448_v15 = vmax.f32 %v1343_v52, 0.0  ;;  %v8093_v40 = vcombine.high %v1906_v30, %v1910_v9  ;;  %v8092_v52 = vcombine.low %v1906_v30, %v1910_v9  ;;  %v1348_v2 = vpop.f32.mrb[49].mxu1 }
 0x181   :  { %4933 = vmatprep.subr.bf16.mxu0 %v8083_v32  ;;  %5385 = vmatprep.subr.bf16.mxu1 %v8085_v36  ;;  %v10952_v32 = vld [vmem:[%s13002_s3 + $0xa88] sm:$0xff]  ;;  %v1244_v36 = vadd.f32 %v1243_v46, %v10548_v41  ;;  %v1245_v4 = vpop.f32.mrb[53].mxu0  ;;  %v10960_v25 = vpack.c.bf16 %v1447_v16, %v1439_v48  ;;  %v8099_v11 = vcombine.high %v10938_v27, %v10943_v24 }
 0x182   :  { %v1246_v44 = vadd.f32 %v1245_v4, %v10577_v19  ;;  %v1247_v20 = vpop.f32.mrb[54].mxu0  ;;  %v10965_v37 = vpack.c.bf16 %v1448_v15, %v1440_v42  ;;  %v1347_v46 = vadd.f32 %v1346_v7, %v10652_v12  ;;  %v8101_v30 = vcombine.high %v10952_v32, %v10957_v49  ;;  %v10980_v15 = vld [vmem:[%s13002_s3 + $0xac0] sm:$0xff] }
 0x183   :  { %4877 = vmatmul.mubr.bf16.gmra.mrb[80].mxu0 %v10443_v34  ;;  %5329 = vmatmul.mubr.bf16.gmra.mrb[80].mxu1 %v10443_v34  ;;  %v1469_v33 = vmax.f32 %v1244_v36, 0.0  ;;  %v1248_v16 = vadd.f32 %v1247_v20, %v10548_v41  ;;  %v1249_v48 = vpop.f32.mrb[55].mxu0 }
 0x184   :  { %4934 = vmatpush1.bf16.msra.mxu0 %v8082_v21  ;;  %5386 = vmatpush1.bf16.msra.mxu1 %v8084_v50  ;;  %v1470_v9 = vmax.f32 %v1246_v44, 0.0  ;;  %v1250_v42 = vadd.f32 %v1249_v48, %v10577_v19  ;;  %v1349_v21 = vadd.f32 %v1348_v2, %v10671_v23  ;;  %v1350_v50 = vpop.f32.mrb[50].mxu1  ;;  %v1455_v4 = vmax.f32 %v1347_v46, 0.0  ;;  %v1922_v2 = vld [vmem:[%s13002_s3 + $0xac8] sm:$0xff] }
 0x185   :  { %4935 = vmatprep.subr.bf16.mxu0 %v8091_v55  ;;  %4886 = vmatprep.mubr.bf16.mxu0 %v10527_v62  ;;  %v10985_v55 = vld [vmem:[%s13002_s3 + $0xae0] sm:$0xff]  ;;  %v1477_v36 = vmax.f32 %v1248_v16, 0.0  ;;  %v1351_v44 = vadd.f32 %v1350_v50, %v10652_v12  ;;  %v1352_v20 = vpop.f32.mrb[51].mxu1  ;;  %v8098_v16 = vcombine.low %v10938_v27, %v10943_v24  ;;  %v8100_v46 = vcombine.low %v10952_v32, %v10957_v49 }
 0x186   :  { %5338 = vmatprep.mubr.bf16.mxu1 %v10527_v62  ;;  %5387 = vmatprep.subr.bf16.mxu1 %v8093_v40  ;;  %v1926_v40 = vld [vmem:[%s13002_s3 + $0xae8] sm:$0xff]  ;;  %v1478_v7 = vmax.f32 %v1250_v42, 0.0  ;;  %v1456_v48 = vmax.f32 %v1349_v21, 0.0  ;;  %v1353_v62 = vadd.f32 %v1352_v20, %v10671_v23  ;;  %v8107_v45 = vcombine.high %v10980_v15, %v10985_v55  ;;  %v11006_v42 = vld [vmem:[%s13002_s3 + $0xb00] sm:$0xff] }
 0x187   :  { %v10999_v50 = vpack.c.bf16 %v1477_v36, %v1469_v33  ;;  %v1463_v34 = vmax.f32 %v1351_v44, 0.0  ;;  %v11011_v27 = vld [vmem:[%s13002_s3 + $0xb20] sm:$0xff]  ;;  %v8106_v49 = vcombine.low %v10980_v15, %v10985_v55  ;;  %v11025_v33 = vld [vmem:[%s13002_s3 + $0xb28] sm:$0xff]  ;;  %v1356_v44 = vpop.f32.mrb[52].mxu1 }
 0x188   :  { %4936 = vmatpush1.bf16.msra.mxu0 %v8090_v39  ;;  %5388 = vmatpush1.bf16.msra.mxu1 %v8092_v52  ;;  %v11013_v24 = vpack.c.bf16 %v1478_v7, %v1470_v9  ;;  %v1253_v39 = vpop.f32.mrb[56].mxu0  ;;  %v1464_v32 = vmax.f32 %v1353_v62, 0.0  ;;  %v8109_v52 = vcombine.high %v1922_v2, %v1926_v40  ;;  %v8108_v62 = vcombine.low %v1922_v2, %v1926_v40  ;;  %v1358_v63 = vpop.f32.mrb[53].mxu1 }
 0x189   :  { %4937 = vmatprep.subr.bf16.mxu0 %v8099_v11  ;;  %5389 = vmatprep.subr.bf16.mxu1 %v8101_v30  ;;  %v11020_v11 = vld [vmem:[%s13002_s3 + $0xb08] sm:$0xff]  ;;  %v1254_v30 = vadd.f32 %v1253_v39, %v10548_v41  ;;  %v1255_v9 = vpop.f32.mrb[57].mxu0  ;;  %v11028_v21 = vpack.c.bf16 %v1463_v34, %v1455_v4  ;;  %v8115_v20 = vcombine.high %v11006_v42, %v11011_v27 }
 0x18a   :  { %v1256_v15 = vadd.f32 %v1255_v9, %v10577_v19  ;;  %v1257_v55 = vpop.f32.mrb[58].mxu0  ;;  %v11033_v36 = vpack.c.bf16 %v1464_v32, %v1456_v48  ;;  %v1357_v39 = vadd.f32 %v1356_v44, %v10652_v12  ;;  %v8117_v2 = vcombine.high %v11020_v11, %v11025_v33  ;;  %v11048_v32 = vld [vmem:[%s13002_s3 + $0xb40] sm:$0xff] }
 0x18b   :  { %4887 = vmatmul.mubr.bf16.gmra.mrb[84].mxu0 %v10520_v3  ;;  %5339 = vmatmul.mubr.bf16.gmra.mrb[84].mxu1 %v10520_v3  ;;  %v1485_v7 = vmax.f32 %v1254_v30, 0.0  ;;  %v1258_v34 = vadd.f32 %v1257_v55, %v10548_v41  ;;  %v1259_v4 = vpop.f32.mrb[59].mxu0 }
 0x18c   :  { %4938 = vmatpush1.bf16.msra.mxu0 %v8098_v16  ;;  %5390 = vmatpush1.bf16.msra.mxu1 %v8100_v46  ;;  %v1486_v40 = vmax.f32 %v1256_v15, 0.0  ;;  %v1260_v48 = vadd.f32 %v1259_v4, %v10577_v19  ;;  %v1359_v16 = vadd.f32 %v1358_v63, %v10671_v23  ;;  %v1360_v46 = vpop.f32.mrb[54].mxu1  ;;  %v1471_v9 = vmax.f32 %v1357_v39, 0.0  ;;  %v1938_v63 = vld [vmem:[%s13002_s3 + $0xb48] sm:$0xff] }
 0x18d   :  { %4939 = vmatprep.subr.bf16.mxu0 %v8107_v45  ;;  %4896 = vmatprep.mubr.bf16.mxu0 %v10612_v54  ;;  %v11053_v45 = vld [vmem:[%s13002_s3 + $0xb60] sm:$0xff]  ;;  %v1493_v30 = vmax.f32 %v1258_v34, 0.0  ;;  %v1361_v15 = vadd.f32 %v1360_v46, %v10652_v12  ;;  %v1362_v55 = vpop.f32.mrb[55].mxu1  ;;  %v8114_v34 = vcombine.low %v11006_v42, %v11011_v27  ;;  %v8116_v39 = vcombine.low %v11020_v11, %v11025_v33 }
 0x18e   :  { %5348 = vmatprep.mubr.bf16.mxu1 %v10612_v54  ;;  %5391 = vmatprep.subr.bf16.mxu1 %v8109_v52  ;;  %v1942_v52 = vld [vmem:[%s13002_s3 + $0xb68] sm:$0xff]  ;;  %v1494_v44 = vmax.f32 %v1260_v48, 0.0  ;;  %v1472_v4 = vmax.f32 %v1359_v16, 0.0  ;;  %v1363_v54 = vadd.f32 %v1362_v55, %v10671_v23  ;;  %v8123_v60 = vcombine.high %v11048_v32, %v11053_v45  ;;  %v11074_v48 = vld [vmem:[%s13002_s3 + $0xb80] sm:$0xff] }
 0x18f   :  { %v11067_v46 = vpack.c.bf16 %v1493_v30, %v1485_v7  ;;  %v1479_v3 = vmax.f32 %v1361_v15, 0.0  ;;  %v11079_v42 = vld [vmem:[%s13002_s3 + $0xba0] sm:$0xff]  ;;  %v8122_v33 = vcombine.low %v11048_v32, %v11053_v45  ;;  %v1950_v7 = vld [vmem:[%s13002_s3 + $0xba8] sm:$0xff]  ;;  %v1366_v15 = vpop.f32.mrb[56].mxu1 }
 0x190   :  { %4940 = vmatpush1.bf16.msra.mxu0 %v8106_v49  ;;  %5392 = vmatpush1.bf16.msra.mxu1 %v8108_v62  ;;  %v11081_v27 = vpack.c.bf16 %v1494_v44, %v1486_v40  ;;  %v1263_v49 = vpop.f32.mrb[60].mxu0  ;;  %v1480_v11 = vmax.f32 %v1363_v54, 0.0  ;;  %v8125_v62 = vcombine.high %v1938_v63, %v1942_v52  ;;  %v8124_v54 = vcombine.low %v1938_v63, %v1942_v52  ;;  %v1368_v47 = vpop.f32.mrb[57].mxu1 }
 0x191   :  { %4941 = vmatprep.subr.bf16.mxu0 %v8115_v20  ;;  %5393 = vmatprep.subr.bf16.mxu1 %v8117_v2  ;;  %v1946_v20 = vld [vmem:[%s13002_s3 + $0xb88] sm:$0xff]  ;;  %v1264_v2 = vadd.f32 %v1263_v49, %v10548_v41  ;;  %v1265_v16 = vpop.f32.mrb[61].mxu0  ;;  %v11092_v30 = vpack.c.bf16 %v1479_v3, %v1471_v9  ;;  %v8131_v55 = vcombine.high %v11074_v48, %v11079_v42 }
 0x192   :  { %v1266_v40 = vadd.f32 %v1265_v16, %v10577_v19  ;;  %v1267_v32 = vpop.f32.mrb[62].mxu0  ;;  %v11097_v45 = vpack.c.bf16 %v1480_v11, %v1472_v4  ;;  %v1367_v49 = vadd.f32 %v1366_v15, %v10652_v12  ;;  %v8133_v63 = vcombine.high %v1946_v20, %v1950_v7 }
 0x193   :  { %4897 = vmatmul.mubr.bf16.gmra.mrb[88].mxu0 %v10605_v43  ;;  %5349 = vmatmul.mubr.bf16.gmra.mrb[88].mxu1 %v10605_v43  ;;  %v1501_v44 = vmax.f32 %v1264_v2, 0.0  ;;  %v1268_v3 = vadd.f32 %v1267_v32, %v10548_v41  ;;  %v1269_v9 = vpop.f32.mrb[63].mxu0  ;;  %v1953_v41 = vld [vmem:[%s13002_s3 + $0xbc0] sm:$0xff] }
 0x194   :  { %4942 = vmatpush1.bf16.msra.mxu0 %v8114_v34  ;;  %5394 = vmatpush1.bf16.msra.mxu1 %v8116_v39  ;;  %v1502_v52 = vmax.f32 %v1266_v40, 0.0  ;;  %v1270_v4 = vadd.f32 %v1269_v9, %v10577_v19  ;;  %v1369_v34 = vadd.f32 %v1368_v47, %v10671_v23  ;;  %v1370_v39 = vpop.f32.mrb[58].mxu1  ;;  %v1487_v2 = vmax.f32 %v1367_v49, 0.0  ;;  %v1954_v47 = vld [vmem:[%s13002_s3 + $0xbc8] sm:$0xff]  ;;  %v1961_v43 = vld [vmem:[%s13002_s3 + $0xc00] sm:$0xff] }
 0x195   :  { %4943 = vmatprep.subr.bf16.mxu0 %v8123_v60  ;;  %4906 = vmatprep.mubr.bf16.mxu0 %v10692_v35  ;;  %v1957_v60 = vld [vmem:[%s13002_s3 + $0xbe0] sm:$0xff]  ;;  %v1509_v11 = vmax.f32 %v1268_v3, 0.0  ;;  %v1371_v16 = vadd.f32 %v1370_v39, %v10652_v12  ;;  %v1372_v40 = vpop.f32.mrb[59].mxu1  ;;  %v1958_v19 = vld [vmem:[%s13002_s3 + $0xbe8] sm:$0xff]  ;;  %v8130_v3 = vcombine.low %v11074_v48, %v11079_v42  ;;  %v8132_v9 = vcombine.low %v1946_v20, %v1950_v7 }
 0x196   :  { %5358 = vmatprep.mubr.bf16.mxu1 %v10692_v35  ;;  %5395 = vmatprep.subr.bf16.mxu1 %v8125_v62  ;;  %v1510_v62 = vmax.f32 %v1270_v4, 0.0  ;;  %v1488_v32 = vmax.f32 %v1369_v34, 0.0  ;;  %v1373_v15 = vadd.f32 %v1372_v40, %v10671_v23  ;;  %v8139_v35 = vcombine.high %v1953_v41, %v1957_v60  ;;  %v1962_v48 = vld [vmem:[%s13002_s3 + $0xc08] sm:$0xff] }
 0x197   :  { %v11123_v49 = vpack.c.bf16 %v1509_v11, %v1501_v44  ;;  %v1495_v39 = vmax.f32 %v1371_v16, 0.0  ;;  %v8141_v40 = vcombine.high %v1954_v47, %v1958_v19  ;;  %v1966_v42 = vld [vmem:[%s13002_s3 + $0xc28] sm:$0xff]  ;;  %v8140_v44 = vcombine.low %v1954_v47, %v1958_v19 }
 0x198   :  { %4944 = vmatpush1.bf16.msra.mxu0 %v8122_v33  ;;  %5396 = vmatpush1.bf16.msra.mxu1 %v8124_v54  ;;  %v11128_v4 = vpack.c.bf16 %v1510_v62, %v1502_v52  ;;  %v1496_v34 = vmax.f32 %v1373_v15, 0.0  ;;  %v1965_v33 = vld [vmem:[%s13002_s3 + $0xc20] sm:$0xff]  ;;  %v1376_v54 = vpop.f32.mrb[60].mxu1  ;;  %v1970_v19 = vld [vmem:[%s13002_s3 + $0xc48] sm:$0xff] }
 0x199   :  { %4945 = vmatprep.subr.bf16.mxu0 %v8131_v55  ;;  %5397 = vmatprep.subr.bf16.mxu1 %v8133_v63  ;;  %v11139_v20 = vpack.c.bf16 %v1495_v39, %v1487_v2  ;;  %v8138_v55 = vcombine.low %v1953_v41, %v1957_v60  ;;  %v1377_v63 = vadd.f32 %v1376_v54, %v10652_v12  ;;  %v1378_v52 = vpop.f32.mrb[61].mxu1  ;;  %v1973_v41 = vld [vmem:[%s13002_s3 + $0xc60] sm:$0xff]  ;;  %v1974_v15 = vld [vmem:[%s13002_s3 + $0xc68] sm:$0xff] }
 0x19a   :  { %v11143_v7 = vpack.c.bf16 %v1496_v34, %v1488_v32  ;;  %v8147_v11 = vcombine.high %v1961_v43, %v1965_v33  ;;  %v8149_v2 = vcombine.high %v1962_v48, %v1966_v42  ;;  %v1379_v16 = vadd.f32 %v1378_v52, %v10671_v23  ;;  %v1380_v62 = vpop.f32.mrb[62].mxu1  ;;  %v1969_v32 = vld [vmem:[%s13002_s3 + $0xc40] sm:$0xff] }
 0x19b   :  { %4907 = vmatmul.mubr.bf16.gmra.mrb[92].mxu0 %v10686_v8  ;;  %5359 = vmatmul.mubr.bf16.gmra.mrb[92].mxu1 %v10686_v8  ;;  %v1503_v60 = vmax.f32 %v1377_v63, 0.0  ;;  %v1382_v47 = vpop.f32.mrb[63].mxu1  ;;  %v8146_v39 = vcombine.low %v1961_v43, %v1965_v33  ;;  %v8148_v34 = vcombine.low %v1962_v48, %v1966_v42  ;;  %v1977_v54 = vld [vmem:[%s13002_s3 + $0xc80] sm:$0xff]  ;;  %v8157_v52 = vcombine.high %v1970_v19, %v1974_v15  ;;  %v1982_v43 = vld [vmem:[%s13002_s3 + $0xca8] sm:$0xff] }
 0x19c   :  { %4946 = vmatpush1.bf16.msra.mxu0 %v8130_v3  ;;  %5398 = vmatpush1.bf16.msra.mxu1 %v8132_v9  ;;  %v1504_v3 = vmax.f32 %v1379_v16, 0.0  ;;  %v1383_v9 = vadd.f32 %v1382_v47, %v10671_v23  ;;  %v1981_v16 = vld [vmem:[%s13002_s3 + $0xca0] sm:$0xff]  ;;  %v1978_v23 = vld [vmem:[%s13002_s3 + $0xc88] sm:$0xff]  ;;  %v8154_v42 = vcombine.low %v1969_v32, %v1973_v41 }
 0x19d   :  { %4947 = vmatprep.subr.bf16.mxu0 %v8139_v35  ;;  %4949 = vmatprep.mubr.bf16.mxu0 %v10666_v59  ;;  %v1381_v35 = vadd.f32 %v1380_v62, %v10652_v12  ;;  %v8155_v12 = vcombine.high %v1969_v32, %v1973_v41  ;;  %v1989_v62 = vld [vmem:[%s13002_s3 + $0xce0] sm:$0xff]  ;;  %v1986_v32 = vld [vmem:[%s13002_s3 + $0xcc8] sm:$0xff] }
 0x19e   :  { %5399 = vmatprep.subr.bf16.mxu1 %v8141_v40  ;;  %5401 = vmatprep.mubr.bf16.mxu1 %v10666_v59  ;;  %v1512_v63 = vmax.f32 %v1383_v9, 0.0  ;;  %v1990_v41 = vld [vmem:[%s13002_s3 + $0xce8] sm:$0xff] }
 0x19f   :  { %v1511_v40 = vmax.f32 %v1381_v35, 0.0  ;;  %v8164_v35 = vcombine.low %v1978_v23, %v1982_v43  ;;  %v1994_v9 = vld [vmem:[%s13002_s3 + $0xd08] sm:$0xff] }
 0x1a0   :  { %4948 = vmatpush1.bf16.msra.mxu0 %v8138_v55  ;;  %5400 = vmatpush1.bf16.msra.mxu1 %v8140_v44  ;;  %v11179_v48 = vpack.c.bf16 %v1512_v63, %v1504_v3  ;;  %v8156_v55 = vcombine.low %v1970_v19, %v1974_v15  ;;  %v8163_v44 = vcombine.high %v1977_v54, %v1981_v16  ;;  %v1993_v19 = vld [vmem:[%s13002_s3 + $0xd00] sm:$0xff] }
 0x1a1   :  { %5030 = vmatprep.subr.bf16.mxu0 %v8147_v11  ;;  %5482 = vmatprep.subr.bf16.mxu1 %v8149_v2  ;;  %v11175_v33 = vpack.c.bf16 %v1511_v40, %v1503_v60  ;;  %v8165_v11 = vcombine.high %v1978_v23, %v1982_v43  ;;  %v1985_v2 = vld [vmem:[%s13002_s3 + $0xcc0] sm:$0xff]  ;;  %v8162_v60 = vcombine.low %v1977_v54, %v1981_v16  ;;  %v2002_v16 = vld [vmem:[%s13002_s3 + $0xd48] sm:$0xff] }
 0x1a2   :  { %v8171_v47 = vcombine.high %v1985_v2, %v1989_v62  ;;  %v8173_v15 = vcombine.high %v1986_v32, %v1990_v41  ;;  %v1997_v3 = vld [vmem:[%s13002_s3 + $0xd20] sm:$0xff]  ;;  %v8172_v40 = vcombine.low %v1986_v32, %v1990_v41  ;;  %v2006_v23 = vld [vmem:[%s13002_s3 + $0xd68] sm:$0xff] }
 0x1a3   :  { %4950 = vmatmul.mubr.bf16.vlgmr.msra.gmra.mrb[64].mxu0 %v10647_v0  ;;  %5402 = vmatmul.mubr.bf16.vlgmr.msra.gmra.mrb[64].mxu1 %v10647_v0  ;;  %v2001_v63 = vld [vmem:[%s13002_s3 + $0xd40] sm:$0xff]  ;;  %v8178_v43 = vcombine.low %v1993_v19, %v1997_v3  ;;  %v2014_v32 = vld [vmem:[%s13002_s3 + $0xda8] sm:$0xff] }
 0x1a4   :  { %5031 = vmatpush1.bf16.msra.mxu0 %v8146_v39  ;;  %5483 = vmatpush1.bf16.msra.mxu1 %v8148_v34  ;;  %v1998_v39 = vld [vmem:[%s13002_s3 + $0xd28] sm:$0xff]  ;;  %v8170_v34 = vcombine.low %v1985_v2, %v1989_v62  ;;  %v2013_v2 = vld [vmem:[%s13002_s3 + $0xda0] sm:$0xff] }
 0x1a5   :  { %5032 = vmatprep.subr.bf16.mxu0 %v8155_v12  ;;  %4959 = vmatprep.mubr.bf16.mxu0 %v10741_v58  ;;  %v8179_v12 = vcombine.high %v1993_v19, %v1997_v3  ;;  %v8181_v54 = vcombine.high %v1994_v9, %v1998_v39  ;;  %v2010_v62 = vld [vmem:[%s13002_s3 + $0xd88] sm:$0xff]  ;;  %v2017_v19 = vld [vmem:[%s13002_s3 + $0xdc0] sm:$0xff] }
 0x1a6   :  { %5411 = vmatprep.mubr.bf16.mxu1 %v10741_v58  ;;  %5484 = vmatprep.subr.bf16.mxu1 %v8157_v52  ;;  %v2005_v52 = vld [vmem:[%s13002_s3 + $0xd60] sm:$0xff]  ;;  %v2018_v3 = vld [vmem:[%s13002_s3 + $0xdc8] sm:$0xff] }
 0x1a7   :  { %v8186_v41 = vcombine.low %v2001_v63, %v2005_v52 }
 0x1a8   :  { %5033 = vmatpush1.bf16.msra.mxu0 %v8154_v42  ;;  %5485 = vmatpush1.bf16.msra.mxu1 %v8156_v55  ;;  %v8180_v42 = vcombine.low %v1994_v9, %v1998_v39  ;;  %v8187_v55 = vcombine.high %v2001_v63, %v2005_v52  ;;  %v2022_v9 = vld [vmem:[%s13002_s3 + $0xde8] sm:$0xff]  ;;  %v2029_v63 = vld [vmem:[%s13002_s3 + $0xe20] sm:$0xff] }
 0x1a9   :  { %5034 = vmatprep.subr.bf16.mxu0 %v8163_v44  ;;  %5486 = vmatprep.subr.bf16.mxu1 %v8165_v11  ;;  %v2009_v44 = vld [vmem:[%s13002_s3 + $0xd80] sm:$0xff]  ;;  %v8189_v11 = vcombine.high %v2002_v16, %v2006_v23  ;;  %v2026_v52 = vld [vmem:[%s13002_s3 + $0xe08] sm:$0xff] }
 0x1aa   :  { %v8194_v39 = vcombine.low %v2009_v44, %v2013_v2 }
 0x1ab   :  { %4960 = vmatmul.mubr.bf16.gmra.mrb[68].mxu0 %v10727_v31  ;;  %5412 = vmatmul.mubr.bf16.gmra.mrb[68].mxu1 %v10727_v31 }
 0x1ac   :  { %5035 = vmatpush1.bf16.msra.mxu0 %v8162_v60  ;;  %5487 = vmatpush1.bf16.msra.mxu1 %v8164_v35  ;;  %v8188_v60 = vcombine.low %v2002_v16, %v2006_v23  ;;  %v8195_v35 = vcombine.high %v2009_v44, %v2013_v2  ;;  %v2030_v16 = vld [vmem:[%s13002_s3 + $0xe28] sm:$0xff]  ;;  %v2033_v44 = vld [vmem:[%s13002_s3 + $0xe40] sm:$0xff] }
 0x1ad   :  { %5036 = vmatprep.subr.bf16.mxu0 %v8171_v47  ;;  %4969 = vmatprep.mubr.bf16.mxu0 %v10809_v38  ;;  %v8197_v47 = vcombine.high %v2010_v62, %v2014_v32  ;;  %v2034_v2 = vld [vmem:[%s13002_s3 + $0xe48] sm:$0xff] }
 0x1ae   :  { %5421 = vmatprep.mubr.bf16.mxu1 %v10809_v38  ;;  %5488 = vmatprep.subr.bf16.mxu1 %v8173_v15  ;;  %v2021_v15 = vld [vmem:[%s13002_s3 + $0xde0] sm:$0xff] }
 0x1af   :  { %v8202_v23 = vcombine.low %v2017_v19, %v2021_v15 }
 0x1b0   :  { %5037 = vmatpush1.bf16.msra.mxu0 %v8170_v34  ;;  %5489 = vmatpush1.bf16.msra.mxu1 %v8172_v40  ;;  %v8196_v34 = vcombine.low %v2010_v62, %v2014_v32  ;;  %v8203_v40 = vcombine.high %v2017_v19, %v2021_v15  ;;  %v2038_v62 = vld [vmem:[%s13002_s3 + $0xe68] sm:$0xff]  ;;  %v2045_v19 = vld [vmem:[%s13002_s3 + $0xea0] sm:$0xff] }
 0x1b1   :  { %5038 = vmatprep.subr.bf16.mxu0 %v8179_v12  ;;  %5490 = vmatprep.subr.bf16.mxu1 %v8181_v54  ;;  %v2025_v12 = vld [vmem:[%s13002_s3 + $0xe00] sm:$0xff]  ;;  %v8205_v54 = vcombine.high %v2018_v3, %v2022_v9  ;;  %v2042_v15 = vld [vmem:[%s13002_s3 + $0xe88] sm:$0xff] }
 0x1b2   :  { %v8210_v32 = vcombine.low %v2025_v12, %v2029_v63 }
 0x1b3   :  { %4970 = vmatmul.mubr.bf16.gmra.mrb[72].mxu0 %v10795_v26  ;;  %5422 = vmatmul.mubr.bf16.gmra.mrb[72].mxu1 %v10795_v26 }
 0x1b4   :  { %5039 = vmatpush1.bf16.msra.mxu0 %v8178_v43  ;;  %5491 = vmatpush1.bf16.msra.mxu1 %v8180_v42  ;;  %v8204_v43 = vcombine.low %v2018_v3, %v2022_v9  ;;  %v8211_v42 = vcombine.high %v2025_v12, %v2029_v63  ;;  %v2046_v3 = vld [vmem:[%s13002_s3 + $0xea8] sm:$0xff]  ;;  %v2049_v12 = vld [vmem:[%s13002_s3 + $0xec0] sm:$0xff] }
 0x1b5   :  { %5040 = vmatprep.subr.bf16.mxu0 %v8187_v55  ;;  %4979 = vmatprep.mubr.bf16.mxu0 %v10877_v18  ;;  %v8213_v55 = vcombine.high %v2026_v52, %v2030_v16  ;;  %v2050_v63 = vld [vmem:[%s13002_s3 + $0xec8] sm:$0xff] }
 0x1b6   :  { %5431 = vmatprep.mubr.bf16.mxu1 %v10877_v18  ;;  %5492 = vmatprep.subr.bf16.mxu1 %v8189_v11  ;;  %v2037_v11 = vld [vmem:[%s13002_s3 + $0xe60] sm:$0xff] }
 0x1b7   :  { %v8218_v9 = vcombine.low %v2033_v44, %v2037_v11 }
 0x1b8   :  { %5041 = vmatpush1.bf16.msra.mxu0 %v8186_v41  ;;  %5493 = vmatpush1.bf16.msra.mxu1 %v8188_v60  ;;  %v8212_v41 = vcombine.low %v2026_v52, %v2030_v16  ;;  %v8219_v60 = vcombine.high %v2033_v44, %v2037_v11  ;;  %v2054_v52 = vld [vmem:[%s13002_s3 + $0xee8] sm:$0xff]  ;;  %v2061_v44 = vld [vmem:[%s13002_s3 + $0xf20] sm:$0xff] }
 0x1b9   :  { %5042 = vmatprep.subr.bf16.mxu0 %v8195_v35  ;;  %5494 = vmatprep.subr.bf16.mxu1 %v8197_v47  ;;  %v2041_v35 = vld [vmem:[%s13002_s3 + $0xe80] sm:$0xff]  ;;  %v8221_v47 = vcombine.high %v2034_v2, %v2038_v62  ;;  %v2058_v11 = vld [vmem:[%s13002_s3 + $0xf08] sm:$0xff] }
 0x1ba   :  { %v8226_v16 = vcombine.low %v2041_v35, %v2045_v19 }
 0x1bb   :  { %4980 = vmatmul.mubr.bf16.gmra.mrb[76].mxu0 %v10863_v10  ;;  %5432 = vmatmul.mubr.bf16.gmra.mrb[76].mxu1 %v10863_v10 }
 0x1bc   :  { %5043 = vmatpush1.bf16.msra.mxu0 %v8194_v39  ;;  %5495 = vmatpush1.bf16.msra.mxu1 %v8196_v34  ;;  %v8220_v39 = vcombine.low %v2034_v2, %v2038_v62  ;;  %v8227_v34 = vcombine.high %v2041_v35, %v2045_v19  ;;  %v2062_v2 = vld [vmem:[%s13002_s3 + $0xf28] sm:$0xff]  ;;  %v2065_v35 = vld [vmem:[%s13002_s3 + $0xf40] sm:$0xff] }
 0x1bd   :  { %5044 = vmatprep.subr.bf16.mxu0 %v8203_v40  ;;  %4989 = vmatprep.mubr.bf16.mxu0 %v10945_v56  ;;  %v8229_v40 = vcombine.high %v2042_v15, %v2046_v3  ;;  %v2066_v19 = vld [vmem:[%s13002_s3 + $0xf48] sm:$0xff] }
 0x1be   :  { %5441 = vmatprep.mubr.bf16.mxu1 %v10945_v56  ;;  %5496 = vmatprep.subr.bf16.mxu1 %v8205_v54  ;;  %v2053_v54 = vld [vmem:[%s13002_s3 + $0xee0] sm:$0xff] }
 0x1bf   :  { %v8234_v62 = vcombine.low %v2049_v12, %v2053_v54 }
 0x1c0   :  { %5045 = vmatpush1.bf16.msra.mxu0 %v8202_v23  ;;  %5497 = vmatpush1.bf16.msra.mxu1 %v8204_v43  ;;  %v8228_v23 = vcombine.low %v2042_v15, %v2046_v3  ;;  %v8235_v43 = vcombine.high %v2049_v12, %v2053_v54  ;;  %v2070_v15 = vld [vmem:[%s13002_s3 + $0xf68] sm:$0xff]  ;;  %v2077_v12 = vld [vmem:[%s13002_s3 + $0xfa0] sm:$0xff] }
 0x1c1   :  { %5046 = vmatprep.subr.bf16.mxu0 %v8211_v42  ;;  %5498 = vmatprep.subr.bf16.mxu1 %v8213_v55  ;;  %v2057_v42 = vld [vmem:[%s13002_s3 + $0xf00] sm:$0xff]  ;;  %v8237_v55 = vcombine.high %v2050_v63, %v2054_v52  ;;  %v2074_v54 = vld [vmem:[%s13002_s3 + $0xf88] sm:$0xff] }
 0x1c2   :  { %v8242_v3 = vcombine.low %v2057_v42, %v2061_v44 }
 0x1c3   :  { %4990 = vmatmul.mubr.bf16.gmra.mrb[80].mxu0 %v10931_v5  ;;  %5442 = vmatmul.mubr.bf16.gmra.mrb[80].mxu1 %v10931_v5 }
 0x1c4   :  { %5047 = vmatpush1.bf16.msra.mxu0 %v8210_v32  ;;  %5499 = vmatpush1.bf16.msra.mxu1 %v8212_v41  ;;  %v8236_v32 = vcombine.low %v2050_v63, %v2054_v52  ;;  %v8243_v41 = vcombine.high %v2057_v42, %v2061_v44  ;;  %v2078_v63 = vld [vmem:[%s13002_s3 + $0xfa8] sm:$0xff]  ;;  %v2081_v42 = vld [vmem:[%s13002_s3 + $0xfc0] sm:$0xff] }
 0x1c5   :  { %5048 = vmatprep.subr.bf16.mxu0 %v8219_v60  ;;  %4999 = vmatprep.mubr.bf16.mxu0 %v11013_v24  ;;  %v8245_v60 = vcombine.high %v2058_v11, %v2062_v2  ;;  %v2082_v44 = vld [vmem:[%s13002_s3 + $0xfc8] sm:$0xff] }
 0x1c6   :  { %5451 = vmatprep.mubr.bf16.mxu1 %v11013_v24  ;;  %5500 = vmatprep.subr.bf16.mxu1 %v8221_v47  ;;  %v2069_v47 = vld [vmem:[%s13002_s3 + $0xf60] sm:$0xff] }
 0x1c7   :  { %v8250_v52 = vcombine.low %v2065_v35, %v2069_v47 }
 0x1c8   :  { %5049 = vmatpush1.bf16.msra.mxu0 %v8218_v9  ;;  %5501 = vmatpush1.bf16.msra.mxu1 %v8220_v39  ;;  %v8244_v9 = vcombine.low %v2058_v11, %v2062_v2  ;;  %v8251_v39 = vcombine.high %v2065_v35, %v2069_v47  ;;  %v2086_v11 = vld [vmem:[%s13002_s3 + $0xfe8] sm:$0xff]  ;;  %v1583_v35 = vld [vmem:[%s13002_s3 + $0x30] sm:$0xff]  ;;  %v1580_v47 = vld [vmem:[%s13002_s3 + $0x18] sm:$0xff] }
 0x1c9   :  { %5050 = vmatprep.subr.bf16.mxu0 %v8227_v34  ;;  %5502 = vmatprep.subr.bf16.mxu1 %v8229_v40  ;;  %v2073_v34 = vld [vmem:[%s13002_s3 + $0xf80] sm:$0xff]  ;;  %v8253_v40 = vcombine.high %v2066_v19, %v2070_v15 }
 0x1ca   :  { %v8258_v2 = vcombine.low %v2073_v34, %v2077_v12 }
 0x1cb   :  { %5000 = vmatmul.mubr.bf16.gmra.mrb[84].mxu0 %v10999_v50  ;;  %5452 = vmatmul.mubr.bf16.gmra.mrb[84].mxu1 %v10999_v50 }
 0x1cc   :  { %5051 = vmatpush1.bf16.msra.mxu0 %v8226_v16  ;;  %5503 = vmatpush1.bf16.msra.mxu1 %v8228_v23  ;;  %v8252_v16 = vcombine.low %v2066_v19, %v2070_v15  ;;  %v8259_v23 = vcombine.high %v2073_v34, %v2077_v12  ;;  %v1584_v19 = vld [vmem:[%s13002_s3 + $0x38] sm:$0xff]  ;;  %v1587_v34 = vld [vmem:[%s13002_s3 + $0x50] sm:$0xff] }
 0x1cd   :  { %5052 = vmatprep.subr.bf16.mxu0 %v8235_v43  ;;  %5009 = vmatprep.mubr.bf16.mxu0 %v11081_v27  ;;  %v8261_v43 = vcombine.high %v2074_v54, %v2078_v63 }
 0x1ce   :  { %5461 = vmatprep.mubr.bf16.mxu1 %v11081_v27  ;;  %5504 = vmatprep.subr.bf16.mxu1 %v8237_v55  ;;  %v2085_v55 = vld [vmem:[%s13002_s3 + $0xfe0] sm:$0xff] }
 0x1cf   :  { %v8266_v15 = vcombine.low %v2081_v42, %v2085_v55 }
 0x1d0   :  { %5053 = vmatpush1.bf16.msra.mxu0 %v8234_v62  ;;  %5505 = vmatpush1.bf16.msra.mxu1 %v8236_v32  ;;  %v8260_v62 = vcombine.low %v2074_v54, %v2078_v63  ;;  %v8267_v32 = vcombine.high %v2081_v42, %v2085_v55  ;;  %v1588_v54 = vld [vmem:[%s13002_s3 + $0x58] sm:$0xff] }
 0x1d1   :  { %5054 = vmatprep.subr.bf16.mxu0 %v8243_v41  ;;  %5506 = vmatprep.subr.bf16.mxu1 %v8245_v60  ;;  %v8269_v41 = vcombine.high %v2082_v44, %v2086_v11  ;;  %v1579_v60 = vld [vmem:[%s13002_s3 + $0x10] sm:$0xff]  ;;  %v1592_v63 = vld [vmem:[%s13002_s3 + $0x78] sm:$0xff] }
 0x1d2   :  { %v7766_v12 = vcombine.low %v1579_v60, %v1583_v35  ;;  %v7777_v42 = vcombine.high %v1588_v54, %v1592_v63 }
 0x1d3   :  { %5010 = vmatmul.mubr.bf16.gmra.mrb[88].mxu0 %v11067_v46  ;;  %5462 = vmatmul.mubr.bf16.gmra.mrb[88].mxu1 %v11067_v46 }
 0x1d4   :  { %5055 = vmatpush1.bf16.msra.mxu0 %v8242_v3  ;;  %5507 = vmatpush1.bf16.msra.mxu1 %v8244_v9  ;;  %v8268_v3 = vcombine.low %v2082_v44, %v2086_v11  ;;  %v7767_v9 = vcombine.high %v1579_v60, %v1583_v35  ;;  %v1596_v44 = vld [vmem:[%s13002_s3 + $0x98] sm:$0xff]  ;;  %v1607_v60 = vld [vmem:[%s13002_s3 + $0xf0] sm:$0xff] }
 0x1d5   :  { %5056 = vmatprep.subr.bf16.mxu0 %v8251_v39  ;;  %5019 = vmatprep.mubr.bf16.mxu0 %v11128_v4  ;;  %v7769_v39 = vcombine.high %v1580_v47, %v1584_v19  ;;  %v1600_v11 = vld [vmem:[%s13002_s3 + $0xb8] sm:$0xff] }
 0x1d6   :  { %5471 = vmatprep.mubr.bf16.mxu1 %v11128_v4  ;;  %5508 = vmatprep.subr.bf16.mxu1 %v8253_v40  ;;  %v1591_v40 = vld [vmem:[%s13002_s3 + $0x70] sm:$0xff] }
 0x1d7   :  { %v7774_v55 = vcombine.low %v1587_v34, %v1591_v40 }
 0x1d8   :  { %5057 = vmatpush1.bf16.msra.mxu0 %v8250_v52  ;;  %5509 = vmatpush1.bf16.msra.mxu1 %v8252_v16  ;;  %v7768_v52 = vcombine.low %v1580_v47, %v1584_v19  ;;  %v7775_v16 = vcombine.high %v1587_v34, %v1591_v40  ;;  %v1604_v47 = vld [vmem:[%s13002_s3 + $0xd8] sm:$0xff] }
 0x1d9   :  { %5058 = vmatprep.subr.bf16.mxu0 %v8259_v23  ;;  %5510 = vmatprep.subr.bf16.mxu1 %v8261_v43  ;;  %v1595_v23 = vld [vmem:[%s13002_s3 + $0x90] sm:$0xff]  ;;  %v1608_v19 = vld [vmem:[%s13002_s3 + $0xf8] sm:$0xff] }
 0x1da   :  { %v1599_v43 = vld [vmem:[%s13002_s3 + $0xb0] sm:$0xff]  ;;  %v7793_v34 = vcombine.high %v1604_v47, %v1608_v19 }
 0x1db   :  { %5020 = vmatmul.mubr.bf16.gmra.mrb[92].mxu0 %v11123_v49  ;;  %5472 = vmatmul.mubr.bf16.gmra.mrb[92].mxu1 %v11123_v49  ;;  %v7782_v35 = vcombine.low %v1595_v23, %v1599_v43 }
 0x1dc   :  { %5059 = vmatpush1.bf16.msra.mxu0 %v8258_v2  ;;  %5062 = vmatprep.mubr.bf16.mxu0 %v10761_v6  ;;  %v7783_v2 = vcombine.high %v1595_v23, %v1599_v43  ;;  %v1619_v23 = vld [vmem:[%s13002_s3 + $0x150] sm:$0xff] }
 0x1dd   :  { %5511 = vmatpush1.bf16.msra.mxu1 %v8260_v62  ;;  %5514 = vmatprep.mubr.bf16.mxu1 %v10761_v6  ;;  %v7776_v62 = vcombine.low %v1588_v54, %v1592_v63  ;;  %v1616_v54 = vld [vmem:[%s13002_s3 + $0x138] sm:$0xff]  ;;  %v1623_v43 = vld [vmem:[%s13002_s3 + $0x170] sm:$0xff] }
 0x1de   :  { %5060 = vmatprep.subr.bf16.mxu0 %v8267_v32  ;;  %5512 = vmatprep.subr.bf16.mxu1 %v8269_v41  ;;  %v7785_v32 = vcombine.high %v1596_v44, %v1600_v11  ;;  %v1603_v41 = vld [vmem:[%s13002_s3 + $0xd0] sm:$0xff] }
 0x1df   :  { %v7790_v40 = vcombine.low %v1603_v41, %v1607_v60 }
 0x1e0   :  { %5061 = vmatpush1.bf16.msra.mxu0 %v8266_v15  ;;  %v7784_v15 = vcombine.low %v1596_v44, %v1600_v11  ;;  %v1624_v44 = vld [vmem:[%s13002_s3 + $0x178] sm:$0xff] }
 0x1e1   :  { %5513 = vmatpush1.bf16.msra.mxu1 %v8268_v3  ;;  %5595 = vmatprep.subr.bf16.mxu0 %v7767_v9  ;;  %v7791_v3 = vcombine.high %v1603_v41, %v1607_v60  ;;  %v1611_v9 = vld [vmem:[%s13002_s3 + $0x110] sm:$0xff]  ;;  %v7806_v60 = vcombine.low %v1619_v23, %v1623_v43 }
 0x1e2   :  { %6047 = vmatprep.subr.bf16.mxu1 %v7769_v39  ;;  %v1615_v39 = vld [vmem:[%s13002_s3 + $0x130] sm:$0xff] }
 0x1e3   :  { %5063 = vmatmul.mubr.bf16.vlgmr.msra.gmra.mrb[64].mxu0 %v10756_v14  ;;  %v7799_v63 = vcombine.high %v1611_v9, %v1615_v39 }
 0x1e4   :  { %5515 = vmatmul.mubr.bf16.vlgmr.msra.gmra.mrb[64].mxu1 %v10756_v14  ;;  %5596 = vmatpush1.bf16.msra.mxu0 %v7766_v12  ;;  %v1612_v12 = vld [vmem:[%s13002_s3 + $0x118] sm:$0xff] }
 0x1e5   :  { %5072 = vmatprep.mubr.bf16.mxu0 %v10829_v17  ;;  %5524 = vmatprep.mubr.bf16.mxu1 %v10829_v17  ;;  %v7800_v11 = vcombine.low %v1612_v12, %v1616_v54 }
 0x1e6   :  { %6048 = vmatpush1.bf16.msra.mxu1 %v7768_v52  ;;  %5597 = vmatprep.subr.bf16.mxu0 %v7775_v16  ;;  %v7792_v52 = vcombine.low %v1604_v47, %v1608_v19  ;;  %v7801_v16 = vcombine.high %v1612_v12, %v1616_v54  ;;  %v1632_v47 = vld [vmem:[%s13002_s3 + $0x1b8] sm:$0xff] }
 0x1e7   :  { %6049 = vmatprep.subr.bf16.mxu1 %v7777_v42  ;;  %v7798_v42 = vcombine.low %v1611_v9, %v1615_v39  ;;  %v1635_v9 = vld [vmem:[%s13002_s3 + $0x1d0] sm:$0xff]  ;;  %v1640_v12 = vld [vmem:[%s13002_s3 + $0x1f8] sm:$0xff] }
 0x1e8   :  { %5598 = vmatpush1.bf16.msra.mxu0 %v7774_v55  ;;  %v1620_v55 = vld [vmem:[%s13002_s3 + $0x158] sm:$0xff]  ;;  %v1639_v39 = vld [vmem:[%s13002_s3 + $0x1f0] sm:$0xff] }
 0x1e9   :  { %5599 = vmatprep.subr.bf16.mxu0 %v7783_v2  ;;  %v7807_v2 = vcombine.high %v1619_v23, %v1623_v43  ;;  %v7809_v41 = vcombine.high %v1620_v55, %v1624_v44  ;;  %v7822_v43 = vcombine.low %v1635_v9, %v1639_v39 }
 0x1ea   :  { %6050 = vmatpush1.bf16.msra.mxu1 %v7776_v62  ;;  %v1627_v62 = vld [vmem:[%s13002_s3 + $0x190] sm:$0xff] }
 0x1eb   :  { %5073 = vmatmul.mubr.bf16.gmra.mrb[68].mxu0 %v10824_v57  ;;  %6051 = vmatprep.subr.bf16.mxu1 %v7785_v32  ;;  %v1631_v32 = vld [vmem:[%s13002_s3 + $0x1b0] sm:$0xff] }
 0x1ec   :  { %5525 = vmatmul.mubr.bf16.gmra.mrb[68].mxu1 %v10824_v57  ;;  %5600 = vmatpush1.bf16.msra.mxu0 %v7782_v35  ;;  %v1628_v35 = vld [vmem:[%s13002_s3 + $0x198] sm:$0xff]  ;;  %v7815_v19 = vcombine.high %v1627_v62, %v1631_v32 }
 0x1ed   :  { %5082 = vmatprep.mubr.bf16.mxu0 %v10897_v22  ;;  %5534 = vmatprep.mubr.bf16.mxu1 %v10897_v22  ;;  %v7816_v54 = vcombine.low %v1628_v35, %v1632_v47 }
 0x1ee   :  { %6052 = vmatpush1.bf16.msra.mxu1 %v7784_v15  ;;  %5601 = vmatprep.subr.bf16.mxu0 %v7791_v3  ;;  %v7808_v15 = vcombine.low %v1620_v55, %v1624_v44  ;;  %v7817_v3 = vcombine.high %v1628_v35, %v1632_v47  ;;  %v1648_v55 = vld [vmem:[%s13002_s3 + $0x238] sm:$0xff] }
 0x1ef   :  { %6053 = vmatprep.subr.bf16.mxu1 %v7793_v34  ;;  %v7814_v34 = vcombine.low %v1627_v62, %v1631_v32  ;;  %v1651_v62 = vld [vmem:[%s13002_s3 + $0x250] sm:$0xff]  ;;  %v1656_v35 = vld [vmem:[%s13002_s3 + $0x278] sm:$0xff] }
 0x1f0   :  { %5602 = vmatpush1.bf16.msra.mxu0 %v7790_v40  ;;  %v1636_v40 = vld [vmem:[%s13002_s3 + $0x1d8] sm:$0xff]  ;;  %v1655_v32 = vld [vmem:[%s13002_s3 + $0x270] sm:$0xff] }
 0x1f1   :  { %5603 = vmatprep.subr.bf16.mxu0 %v7799_v63  ;;  %v7823_v63 = vcombine.high %v1635_v9, %v1639_v39  ;;  %v7825_v23 = vcombine.high %v1636_v40, %v1640_v12  ;;  %v7838_v39 = vcombine.low %v1651_v62, %v1655_v32 }
 0x1f2   :  { %6054 = vmatpush1.bf16.msra.mxu1 %v7792_v52  ;;  %v1643_v52 = vld [vmem:[%s13002_s3 + $0x210] sm:$0xff] }
 0x1f3   :  { %5083 = vmatmul.mubr.bf16.gmra.mrb[72].mxu0 %v10892_v29  ;;  %6055 = vmatprep.subr.bf16.mxu1 %v7801_v16  ;;  %v1647_v16 = vld [vmem:[%s13002_s3 + $0x230] sm:$0xff] }
 0x1f4   :  { %5535 = vmatmul.mubr.bf16.gmra.mrb[72].mxu1 %v10892_v29  ;;  %5604 = vmatpush1.bf16.msra.mxu0 %v7798_v42  ;;  %v1644_v42 = vld [vmem:[%s13002_s3 + $0x218] sm:$0xff]  ;;  %v7831_v44 = vcombine.high %v1643_v52, %v1647_v16 }
 0x1f5   :  { %5092 = vmatprep.mubr.bf16.mxu0 %v10965_v37  ;;  %5544 = vmatprep.mubr.bf16.mxu1 %v10965_v37  ;;  %v7832_v47 = vcombine.low %v1644_v42, %v1648_v55 }
 0x1f6   :  { %6056 = vmatpush1.bf16.msra.mxu1 %v7800_v11  ;;  %5605 = vmatprep.subr.bf16.mxu0 %v7807_v2  ;;  %v7824_v11 = vcombine.low %v1636_v40, %v1640_v12  ;;  %v7833_v2 = vcombine.high %v1644_v42, %v1648_v55  ;;  %v1664_v40 = vld [vmem:[%s13002_s3 + $0x2b8] sm:$0xff] }
 0x1f7   :  { %6057 = vmatprep.subr.bf16.mxu1 %v7809_v41  ;;  %v7830_v41 = vcombine.low %v1643_v52, %v1647_v16  ;;  %v1667_v52 = vld [vmem:[%s13002_s3 + $0x2d0] sm:$0xff]  ;;  %v1672_v42 = vld [vmem:[%s13002_s3 + $0x2f8] sm:$0xff] }
 0x1f8   :  { %5606 = vmatpush1.bf16.msra.mxu0 %v7806_v60  ;;  %v1652_v60 = vld [vmem:[%s13002_s3 + $0x258] sm:$0xff]  ;;  %v1671_v16 = vld [vmem:[%s13002_s3 + $0x2f0] sm:$0xff] }
 0x1f9   :  { %5607 = vmatprep.subr.bf16.mxu0 %v7815_v19  ;;  %v7839_v19 = vcombine.high %v1651_v62, %v1655_v32  ;;  %v7841_v9 = vcombine.high %v1652_v60, %v1656_v35  ;;  %v7854_v32 = vcombine.low %v1667_v52, %v1671_v16 }
 0x1fa   :  { %6058 = vmatpush1.bf16.msra.mxu1 %v7808_v15  ;;  %v1659_v15 = vld [vmem:[%s13002_s3 + $0x290] sm:$0xff] }
 0x1fb   :  { %5093 = vmatmul.mubr.bf16.gmra.mrb[76].mxu0 %v10960_v25  ;;  %6059 = vmatprep.subr.bf16.mxu1 %v7817_v3  ;;  %v1663_v3 = vld [vmem:[%s13002_s3 + $0x2b0] sm:$0xff] }
 0x1fc   :  { %5545 = vmatmul.mubr.bf16.gmra.mrb[76].mxu1 %v10960_v25  ;;  %5608 = vmatpush1.bf16.msra.mxu0 %v7814_v34  ;;  %v1660_v34 = vld [vmem:[%s13002_s3 + $0x298] sm:$0xff]  ;;  %v7847_v12 = vcombine.high %v1659_v15, %v1663_v3 }
 0x1fd   :  { %5102 = vmatprep.mubr.bf16.mxu0 %v11033_v36  ;;  %5554 = vmatprep.mubr.bf16.mxu1 %v11033_v36  ;;  %v7848_v55 = vcombine.low %v1660_v34, %v1664_v40 }
 0x1fe   :  { %6060 = vmatpush1.bf16.msra.mxu1 %v7816_v54  ;;  %5609 = vmatprep.subr.bf16.mxu0 %v7823_v63  ;;  %v7840_v54 = vcombine.low %v1652_v60, %v1656_v35  ;;  %v7849_v63 = vcombine.high %v1660_v34, %v1664_v40  ;;  %v1680_v60 = vld [vmem:[%s13002_s3 + $0x338] sm:$0xff] }
 0x1ff   :  { %6061 = vmatprep.subr.bf16.mxu1 %v7825_v23  ;;  %v7846_v23 = vcombine.low %v1659_v15, %v1663_v3  ;;  %v1683_v15 = vld [vmem:[%s13002_s3 + $0x350] sm:$0xff]  ;;  %v1688_v34 = vld [vmem:[%s13002_s3 + $0x378] sm:$0xff] }
 0x200   :  { %5610 = vmatpush1.bf16.msra.mxu0 %v7822_v43  ;;  %v1668_v43 = vld [vmem:[%s13002_s3 + $0x2d8] sm:$0xff]  ;;  %v1687_v3 = vld [vmem:[%s13002_s3 + $0x370] sm:$0xff] }
 0x201   :  { %5611 = vmatprep.subr.bf16.mxu0 %v7831_v44  ;;  %v7855_v44 = vcombine.high %v1667_v52, %v1671_v16  ;;  %v7857_v62 = vcombine.high %v1668_v43, %v1672_v42  ;;  %v7870_v16 = vcombine.low %v1683_v15, %v1687_v3 }
 0x202   :  { %6062 = vmatpush1.bf16.msra.mxu1 %v7824_v11  ;;  %v1675_v11 = vld [vmem:[%s13002_s3 + $0x310] sm:$0xff] }
 0x203   :  { %5103 = vmatmul.mubr.bf16.gmra.mrb[80].mxu0 %v11028_v21  ;;  %6063 = vmatprep.subr.bf16.mxu1 %v7833_v2  ;;  %v1679_v2 = vld [vmem:[%s13002_s3 + $0x330] sm:$0xff] }
 0x204   :  { %5555 = vmatmul.mubr.bf16.gmra.mrb[80].mxu1 %v11028_v21  ;;  %5612 = vmatpush1.bf16.msra.mxu0 %v7830_v41  ;;  %v1676_v41 = vld [vmem:[%s13002_s3 + $0x318] sm:$0xff]  ;;  %v7863_v35 = vcombine.high %v1675_v11, %v1679_v2 }
 0x205   :  { %5112 = vmatprep.mubr.bf16.mxu0 %v11097_v45  ;;  %5564 = vmatprep.mubr.bf16.mxu1 %v11097_v45  ;;  %v7864_v40 = vcombine.low %v1676_v41, %v1680_v60 }
 0x206   :  { %6064 = vmatpush1.bf16.msra.mxu1 %v7832_v47  ;;  %5613 = vmatprep.subr.bf16.mxu0 %v7839_v19  ;;  %v7856_v47 = vcombine.low %v1668_v43, %v1672_v42  ;;  %v7865_v19 = vcombine.high %v1676_v41, %v1680_v60  ;;  %v1696_v43 = vld [vmem:[%s13002_s3 + $0x3b8] sm:$0xff] }
 0x207   :  { %6065 = vmatprep.subr.bf16.mxu1 %v7841_v9  ;;  %v7862_v9 = vcombine.low %v1675_v11, %v1679_v2  ;;  %v1699_v11 = vld [vmem:[%s13002_s3 + $0x3d0] sm:$0xff]  ;;  %v1704_v41 = vld [vmem:[%s13002_s3 + $0x3f8] sm:$0xff] }
 0x208   :  { %5614 = vmatpush1.bf16.msra.mxu0 %v7838_v39  ;;  %v1684_v39 = vld [vmem:[%s13002_s3 + $0x358] sm:$0xff]  ;;  %v1703_v2 = vld [vmem:[%s13002_s3 + $0x3f0] sm:$0xff] }
 0x209   :  { %5615 = vmatprep.subr.bf16.mxu0 %v7847_v12  ;;  %v7871_v12 = vcombine.high %v1683_v15, %v1687_v3  ;;  %v7873_v52 = vcombine.high %v1684_v39, %v1688_v34  ;;  %v7886_v3 = vcombine.low %v1699_v11, %v1703_v2 }
 0x20a   :  { %6066 = vmatpush1.bf16.msra.mxu1 %v7840_v54  ;;  %v1691_v54 = vld [vmem:[%s13002_s3 + $0x390] sm:$0xff] }
 0x20b   :  { %5113 = vmatmul.mubr.bf16.gmra.mrb[84].mxu0 %v11092_v30  ;;  %6067 = vmatprep.subr.bf16.mxu1 %v7849_v63  ;;  %v1695_v63 = vld [vmem:[%s13002_s3 + $0x3b0] sm:$0xff] }
 0x20c   :  { %5565 = vmatmul.mubr.bf16.gmra.mrb[84].mxu1 %v11092_v30  ;;  %5616 = vmatpush1.bf16.msra.mxu0 %v7846_v23  ;;  %v1692_v23 = vld [vmem:[%s13002_s3 + $0x398] sm:$0xff]  ;;  %v7879_v42 = vcombine.high %v1691_v54, %v1695_v63 }
 0x20d   :  { %5122 = vmatprep.mubr.bf16.mxu0 %v11143_v7  ;;  %5574 = vmatprep.mubr.bf16.mxu1 %v11143_v7  ;;  %v7880_v60 = vcombine.low %v1692_v23, %v1696_v43 }
 0x20e   :  { %6068 = vmatpush1.bf16.msra.mxu1 %v7848_v55  ;;  %5617 = vmatprep.subr.bf16.mxu0 %v7855_v44  ;;  %v7872_v55 = vcombine.low %v1684_v39, %v1688_v34  ;;  %v7881_v44 = vcombine.high %v1692_v23, %v1696_v43  ;;  %v1712_v39 = vld [vmem:[%s13002_s3 + $0x438] sm:$0xff] }
 0x20f   :  { %6069 = vmatprep.subr.bf16.mxu1 %v7857_v62  ;;  %v7878_v62 = vcombine.low %v1691_v54, %v1695_v63  ;;  %v1719_v54 = vld [vmem:[%s13002_s3 + $0x470] sm:$0xff] }
 0x210   :  { %5618 = vmatpush1.bf16.msra.mxu0 %v7854_v32  ;;  %v1700_v32 = vld [vmem:[%s13002_s3 + $0x3d8] sm:$0xff] }
 0x211   :  { %5619 = vmatprep.subr.bf16.mxu0 %v7863_v35  ;;  %v7887_v35 = vcombine.high %v1699_v11, %v1703_v2  ;;  %v7889_v15 = vcombine.high %v1700_v32, %v1704_v41  ;;  %v1724_v2 = vld [vmem:[%s13002_s3 + $0x498] sm:$0xff] }
 0x212   :  { %6070 = vmatpush1.bf16.msra.mxu1 %v7856_v47  ;;  %v1707_v47 = vld [vmem:[%s13002_s3 + $0x410] sm:$0xff] }
 0x213   :  { %5123 = vmatmul.mubr.bf16.gmra.mrb[88].mxu0 %v11139_v20  ;;  %6071 = vmatprep.subr.bf16.mxu1 %v7865_v19  ;;  %v1711_v19 = vld [vmem:[%s13002_s3 + $0x430] sm:$0xff] }
 0x214   :  { %5575 = vmatmul.mubr.bf16.gmra.mrb[88].mxu1 %v11139_v20  ;;  %5620 = vmatpush1.bf16.msra.mxu0 %v7862_v9  ;;  %v1708_v9 = vld [vmem:[%s13002_s3 + $0x418] sm:$0xff]  ;;  %v7895_v34 = vcombine.high %v1707_v47, %v1711_v19 }
 0x215   :  { %5132 = vmatprep.mubr.bf16.mxu0 %v11179_v48  ;;  %5584 = vmatprep.mubr.bf16.mxu1 %v11179_v48  ;;  %v7897_v63 = vcombine.high %v1708_v9, %v1712_v39  ;;  %v7896_v43 = vcombine.low %v1708_v9, %v1712_v39  ;;  %v1739_v9 = vld [vmem:[%s13002_s3 + $0x510] sm:$0xff] }
 0x216   :  { %6072 = vmatpush1.bf16.msra.mxu1 %v7864_v40  ;;  %5621 = vmatprep.subr.bf16.mxu0 %v7871_v12  ;;  %v7888_v40 = vcombine.low %v1700_v32, %v1704_v41  ;;  %v1715_v12 = vld [vmem:[%s13002_s3 + $0x450] sm:$0xff] }
 0x217   :  { %6073 = vmatprep.subr.bf16.mxu1 %v7873_v52  ;;  %v7894_v52 = vcombine.low %v1707_v47, %v1711_v19  ;;  %v7903_v23 = vcombine.high %v1715_v12, %v1719_v54  ;;  %v7902_v11 = vcombine.low %v1715_v12, %v1719_v54  ;;  %v1743_v39 = vld [vmem:[%s13002_s3 + $0x530] sm:$0xff]  ;;  %v1740_v12 = vld [vmem:[%s13002_s3 + $0x518] sm:$0xff] }
 0x218   :  { %5622 = vmatpush1.bf16.msra.mxu0 %v7870_v16  ;;  %v1720_v16 = vld [vmem:[%s13002_s3 + $0x478] sm:$0xff] }
 0x219   :  { %5623 = vmatprep.subr.bf16.mxu0 %v7879_v42  ;;  %v1723_v42 = vld [vmem:[%s13002_s3 + $0x490] sm:$0xff]  ;;  %v1744_v54 = vld [vmem:[%s13002_s3 + $0x538] sm:$0xff] }
 0x21a   :  { %6074 = vmatpush1.bf16.msra.mxu1 %v7872_v55  ;;  %v1727_v55 = vld [vmem:[%s13002_s3 + $0x4b0] sm:$0xff] }
 0x21b   :  { %5133 = vmatmul.mubr.bf16.gmra.mrb[92].mxu0 %v11175_v33  ;;  %6075 = vmatprep.subr.bf16.mxu1 %v7881_v44  ;;  %v7911_v32 = vcombine.high %v1723_v42, %v1727_v55  ;;  %v7910_v19 = vcombine.low %v1723_v42, %v1727_v55  ;;  %v7928_v55 = vcombine.low %v1740_v12, %v1744_v54 }
 0x21c   :  { %5585 = vmatmul.mubr.bf16.gmra.mrb[92].mxu1 %v11175_v33  ;;  %5624 = vmatpush1.bf16.msra.mxu0 %v7878_v62  ;;  %v1728_v62 = vld [vmem:[%s13002_s3 + $0x4b8] sm:$0xff] }
 0x21d   :  { %5627 = vmatprep.mubr.bf16.mxu0 %v10023_v13  ;;  %6079 = vmatprep.mubr.bf16.mxu1 %v10023_v13  ;;  %v1716_v13 = vld [vmem:[%s13002_s3 + $0x458] sm:$0xff]  ;;  %v7913_v47 = vcombine.high %v1724_v2, %v1728_v62 }
 0x21e   :  { %6076 = vmatpush1.bf16.msra.mxu1 %v7880_v60  ;;  %5625 = vmatprep.subr.bf16.mxu0 %v7887_v35  ;;  %v7905_v44 = vcombine.high %v1716_v13, %v1720_v16  ;;  %v7904_v41 = vcombine.low %v1716_v13, %v1720_v16  ;;  %v1731_v60 = vld [vmem:[%s13002_s3 + $0x4d0] sm:$0xff] }
 0x21f   :  { %6077 = vmatprep.subr.bf16.mxu1 %v7889_v15  ;;  %v1735_v35 = vld [vmem:[%s13002_s3 + $0x4f0] sm:$0xff] }
 0x220   :  { %5626 = vmatpush1.bf16.msra.mxu0 %v7886_v3  ;;  %v7919_v15 = vcombine.high %v1731_v60, %v1735_v35  ;;  %v7912_v3 = vcombine.low %v1724_v2, %v1728_v62  ;;  %v1747_v13 = vld [vmem:[%s13002_s3 + $0x550] sm:$0xff] }
 0x221   :  { %5708 = vmatprep.subr.bf16.mxu0 %v7895_v34  ;;  %v1751_v16 = vld [vmem:[%s13002_s3 + $0x570] sm:$0xff] }
 0x222   :  { %6078 = vmatpush1.bf16.msra.mxu1 %v7888_v40  ;;  %v7918_v40 = vcombine.low %v1731_v60, %v1735_v35  ;;  %v7935_v42 = vcombine.high %v1747_v13, %v1751_v16  ;;  %v13095_v62 = vld [vmem:[#allocation8_spill] sm:$0xff]  ;;  %v1760_v60 = vld [vmem:[%s13002_s3 + $0x5b8] sm:$0xff] }
 0x223   :  { %5628 = vmatmul.mubr.bf16.vlgmr.msra.gmra.mrb[96].mxu0 %v10021_v28  ;;  %6160 = vmatprep.subr.bf16.mxu1 %v7897_v63  ;;  %v7927_v63 = vcombine.high %v1739_v9, %v1743_v39 }
 0x224   :  { %5709 = vmatpush1.bf16.msra.mxu0 %v7894_v52  ;;  %5637 = vmatprep.mubr.bf16.mxu0 %v10099_v53 }
 0x225   :  { %6080 = vmatmul.mubr.bf16.vlgmr.msra.gmra.mrb[96].mxu1 %v10021_v28  ;;  %5710 = vmatprep.subr.bf16.mxu0 %v7903_v23  ;;  %v1732_v28 = vld [vmem:[%s13002_s3 + $0x4d8] sm:$0xff]  ;;  %v7929_v23 = vcombine.high %v1740_v12, %v1744_v54  ;;  %v13096_v12 = vld [vmem:[#allocation7_spill] sm:$0xff] }
 0x226   :  { %6089 = vmatprep.mubr.bf16.mxu1 %v10099_v53  ;;  %6161 = vmatpush1.bf16.msra.mxu1 %v7896_v43  ;;  %v1736_v53 = vld [vmem:[%s13002_s3 + $0x4f8] sm:$0xff]  ;;  %v7926_v43 = vcombine.low %v1739_v9, %v1743_v39 }
 0x227   :  { %6162 = vmatprep.subr.bf16.mxu1 %v7905_v44  ;;  %v7921_v34 = vcombine.high %v1732_v28, %v1736_v53  ;;  %v7920_v52 = vcombine.low %v1732_v28, %v1736_v53  ;;  %v1755_v44 = vld [vmem:[%s13002_s3 + $0x590] sm:$0xff] }
 0x228   :  { %5711 = vmatpush1.bf16.msra.mxu0 %v7902_v11  ;;  %v1759_v11 = vld [vmem:[%s13002_s3 + $0x5b0] sm:$0xff] }
 0x229   :  { %5712 = vmatprep.subr.bf16.mxu0 %v7911_v32  ;;  %v7934_v32 = vcombine.low %v1747_v13, %v1751_v16  ;;  %v7943_v35 = vcombine.high %v1755_v44, %v1759_v11  ;;  %v1767_v28 = vld [vmem:[%s13002_s3 + $0x5f0] sm:$0xff]  ;;  %v1772_v13 = vld [vmem:[%s13002_s3 + $0x618] sm:$0xff] }
 0x22a   :  { %6163 = vmatpush1.bf16.msra.mxu1 %v7904_v41  ;;  %v1756_v41 = vld [vmem:[%s13002_s3 + $0x598] sm:$0xff] }
 0x22b   :  { %5638 = vmatmul.mubr.bf16.gmra.mrb[100].mxu0 %v10096_v1  ;;  %6164 = vmatprep.subr.bf16.mxu1 %v7913_v47  ;;  %v7945_v53 = vcombine.high %v1756_v41, %v1760_v60  ;;  %v7944_v39 = vcombine.low %v1756_v41, %v1760_v60  ;;  %v1776_v16 = vld [vmem:[%s13002_s3 + $0x638] sm:$0xff]  ;;  %v1791_v41 = vld [vmem:[%s13002_s3 + $0x6b0] sm:$0xff]  ;;  %v13098_v60 = vld [vmem:[#allocation11_spill] sm:$0xff] }
 0x22c   :  { %5713 = vmatpush1.bf16.msra.mxu0 %v7910_v19  ;;  %5647 = vmatprep.mubr.bf16.mxu0 %v10175_v61  ;;  %v1763_v19 = vld [vmem:[%s13002_s3 + $0x5d0] sm:$0xff] }
 0x22d   :  { %6090 = vmatmul.mubr.bf16.gmra.mrb[100].mxu1 %v10096_v1  ;;  %5714 = vmatprep.subr.bf16.mxu0 %v7919_v15  ;;  %v1748_v1 = vld [vmem:[%s13002_s3 + $0x558] sm:$0xff]  ;;  %v7942_v15 = vcombine.low %v1755_v44, %v1759_v11  ;;  %v7951_v9 = vcombine.high %v1763_v19, %v1767_v28 }
 0x22e   :  { %6099 = vmatprep.mubr.bf16.mxu1 %v10175_v61  ;;  %6165 = vmatpush1.bf16.msra.mxu1 %v7912_v3  ;;  %v1752_v61 = vld [vmem:[%s13002_s3 + $0x578] sm:$0xff] }
 0x22f   :  { %6166 = vmatprep.subr.bf16.mxu1 %v7921_v34  ;;  %v7937_v2 = vcombine.high %v1748_v1, %v1752_v61  ;;  %v7936_v47 = vcombine.low %v1748_v1, %v1752_v61  ;;  %v1768_v3 = vld [vmem:[%s13002_s3 + $0x5f8] sm:$0xff]  ;;  %v1771_v34 = vld [vmem:[%s13002_s3 + $0x610] sm:$0xff] }
 0x230   :  { %5715 = vmatpush1.bf16.msra.mxu0 %v7918_v40  ;;  %v1775_v40 = vld [vmem:[%s13002_s3 + $0x630] sm:$0xff]  ;;  %v1780_v44 = vld [vmem:[%s13002_s3 + $0x658] sm:$0xff] }
 0x231   :  { %5716 = vmatprep.subr.bf16.mxu0 %v7927_v63  ;;  %v13097_v63 = vld [vmem:[#allocation12_spill] sm:$0xff]  ;;  %v1784_v11 = vld [vmem:[%s13002_s3 + $0x678] sm:$0xff] }
 0x232   :  { %6167 = vmatpush1.bf16.msra.mxu1 %v7920_v52  ;;  %v7950_v52 = vcombine.low %v1763_v19, %v1767_v28  ;;  %v1779_v1 = vld [vmem:[%s13002_s3 + $0x650] sm:$0xff]  ;;  %v1788_v28 = vld [vmem:[%s13002_s3 + $0x698] sm:$0xff] }
 0x233   :  { %5648 = vmatmul.mubr.bf16.gmra.mrb[104].mxu0 %v10172_v51  ;;  %6168 = vmatprep.subr.bf16.mxu1 %v7929_v23  ;;  %v7959_v23 = vcombine.high %v1771_v34, %v1775_v40  ;;  %v1783_v61 = vld [vmem:[%s13002_s3 + $0x670] sm:$0xff] }
 0x234   :  { %5717 = vmatpush1.bf16.msra.mxu0 %v7926_v43  ;;  %5657 = vmatprep.mubr.bf16.mxu0 %v13095_v62  ;;  %v7966_v19 = vcombine.low %v1779_v1, %v1783_v61 }
 0x235   :  { %6100 = vmatmul.mubr.bf16.gmra.mrb[104].mxu1 %v10172_v51  ;;  %5718 = vmatprep.subr.bf16.mxu0 %v7935_v42  ;;  %v1764_v51 = vld [vmem:[%s13002_s3 + $0x5d8] sm:$0xff]  ;;  %v7961_v42 = vcombine.high %v1772_v13, %v1776_v16 }
 0x236   :  { %6109 = vmatprep.mubr.bf16.mxu1 %v13095_v62  ;;  %6169 = vmatpush1.bf16.msra.mxu1 %v7928_v55  ;;  %v7953_v54 = vcombine.high %v1764_v51, %v1768_v3  ;;  %v7952_v43 = vcombine.low %v1764_v51, %v1768_v3  ;;  %v7958_v55 = vcombine.low %v1771_v34, %v1775_v40  ;;  %v1795_v3 = vld [vmem:[%s13002_s3 + $0x6d0] sm:$0xff]  ;;  %v1796_v40 = vld [vmem:[%s13002_s3 + $0x6d8] sm:$0xff] }
 0x237   :  { %6170 = vmatprep.subr.bf16.mxu1 %v7937_v2  ;;  %v7967_v2 = vcombine.high %v1779_v1, %v1783_v61  ;;  %v7960_v62 = vcombine.low %v1772_v13, %v1776_v16  ;;  %v7968_v51 = vcombine.low %v1780_v44, %v1784_v11  ;;  %v1807_v13 = vld [vmem:[%s13002_s3 + $0x730] sm:$0xff]  ;;  %v13100_v16 = vld [vmem:[#allocation15_spill] sm:$0xff]  ;;  %v1804_v61 = vld [vmem:[%s13002_s3 + $0x718] sm:$0xff] }
 0x238   :  { %5719 = vmatpush1.bf16.msra.mxu0 %v7934_v32  ;;  %v1787_v32 = vld [vmem:[%s13002_s3 + $0x690] sm:$0xff] }
 0x239   :  { %5720 = vmatprep.subr.bf16.mxu0 %v7943_v35  ;;  %v7969_v35 = vcombine.high %v1780_v44, %v1784_v11  ;;  %v7974_v34 = vcombine.low %v1787_v32, %v1791_v41  ;;  %v1811_v11 = vld [vmem:[%s13002_s3 + $0x750] sm:$0xff] }
 0x23a   :  { %6171 = vmatpush1.bf16.msra.mxu1 %v7936_v47  ;;  %v13099_v47 = vld [vmem:[#allocation16_spill] sm:$0xff] }
 0x23b   :  { %5658 = vmatmul.mubr.bf16.gmra.mrb[108].mxu0 %v13096_v12  ;;  %6172 = vmatprep.subr.bf16.mxu1 %v7945_v53  ;;  %v1792_v53 = vld [vmem:[%s13002_s3 + $0x6b8] sm:$0xff] }
 0x23c   :  { %5721 = vmatpush1.bf16.msra.mxu0 %v7942_v15  ;;  %5667 = vmatprep.mubr.bf16.mxu0 %v13097_v63  ;;  %v7975_v15 = vcombine.high %v1787_v32, %v1791_v41  ;;  %v1812_v41 = vld [vmem:[%s13002_s3 + $0x758] sm:$0xff] }
 0x23d   :  { %6110 = vmatmul.mubr.bf16.gmra.mrb[108].mxu1 %v13096_v12  ;;  %5722 = vmatprep.subr.bf16.mxu0 %v7951_v9  ;;  %v1799_v9 = vld [vmem:[%s13002_s3 + $0x6f0] sm:$0xff]  ;;  %v1800_v12 = vld [vmem:[%s13002_s3 + $0x6f8] sm:$0xff] }
 0x23e   :  { %6119 = vmatprep.mubr.bf16.mxu1 %v13097_v63  ;;  %6173 = vmatpush1.bf16.msra.mxu1 %v7944_v39  ;;  %v7977_v39 = vcombine.high %v1788_v28, %v1792_v53  ;;  %v7976_v63 = vcombine.low %v1788_v28, %v1792_v53  ;;  %v7982_v1 = vcombine.low %v1795_v3, %v1799_v9  ;;  %v1823_v28 = vld [vmem:[%s13002_s3 + $0x7b0] sm:$0xff]  ;;  %v13102_v53 = vld [vmem:[#allocation19_spill] sm:$0xff] }
 0x23f   :  { %6174 = vmatprep.subr.bf16.mxu1 %v7953_v54  ;;  %v7983_v54 = vcombine.high %v1795_v3, %v1799_v9  ;;  %v7984_v44 = vcombine.low %v1796_v40, %v1800_v12  ;;  %v1820_v9 = vld [vmem:[%s13002_s3 + $0x798] sm:$0xff] }
 0x240   :  { %5723 = vmatpush1.bf16.msra.mxu0 %v7950_v52  ;;  %v1803_v52 = vld [vmem:[%s13002_s3 + $0x710] sm:$0xff] }
 0x241   :  { %5724 = vmatprep.subr.bf16.mxu0 %v7959_v23  ;;  %v7985_v23 = vcombine.high %v1796_v40, %v1800_v12  ;;  %v7990_v32 = vcombine.low %v1803_v52, %v1807_v13  ;;  %v1827_v12 = vld [vmem:[%s13002_s3 + $0x7d0] sm:$0xff] }
 0x242   :  { %6175 = vmatpush1.bf16.msra.mxu1 %v7952_v43  ;;  %v13101_v43 = vld [vmem:[#allocation20_spill] sm:$0xff] }
 0x243   :  { %5668 = vmatmul.mubr.bf16.gmra.mrb[112].mxu0 %v13098_v60  ;;  %6176 = vmatprep.subr.bf16.mxu1 %v7961_v42  ;;  %v1808_v42 = vld [vmem:[%s13002_s3 + $0x738] sm:$0xff] }
 0x244   :  { %5725 = vmatpush1.bf16.msra.mxu0 %v7958_v55  ;;  %5677 = vmatprep.mubr.bf16.mxu0 %v13099_v47  ;;  %v7991_v55 = vcombine.high %v1803_v52, %v1807_v13  ;;  %v1828_v13 = vld [vmem:[%s13002_s3 + $0x7d8] sm:$0xff] }
 0x245   :  { %6120 = vmatmul.mubr.bf16.gmra.mrb[112].mxu1 %v13098_v60  ;;  %5726 = vmatprep.subr.bf16.mxu0 %v7967_v2  ;;  %v1815_v2 = vld [vmem:[%s13002_s3 + $0x770] sm:$0xff]  ;;  %v1816_v60 = vld [vmem:[%s13002_s3 + $0x778] sm:$0xff] }
 0x246   :  { %6129 = vmatprep.mubr.bf16.mxu1 %v13099_v47  ;;  %6177 = vmatpush1.bf16.msra.mxu1 %v7960_v62  ;;  %v7993_v62 = vcombine.high %v1804_v61, %v1808_v42  ;;  %v7992_v47 = vcombine.low %v1804_v61, %v1808_v42  ;;  %v7998_v3 = vcombine.low %v1811_v11, %v1815_v2  ;;  %v1839_v61 = vld [vmem:[%s13002_s3 + $0x830] sm:$0xff]  ;;  %v13104_v42 = vld [vmem:[#allocation23_spill] sm:$0xff] }
 0x247   :  { %6178 = vmatprep.subr.bf16.mxu1 %v7969_v35  ;;  %v7999_v35 = vcombine.high %v1811_v11, %v1815_v2  ;;  %v8000_v40 = vcombine.low %v1812_v41, %v1816_v60  ;;  %v1836_v2 = vld [vmem:[%s13002_s3 + $0x818] sm:$0xff] }
 0x248   :  { %5727 = vmatpush1.bf16.msra.mxu0 %v7966_v19  ;;  %v1819_v19 = vld [vmem:[%s13002_s3 + $0x790] sm:$0xff] }
 0x249   :  { %5728 = vmatprep.subr.bf16.mxu0 %v7975_v15  ;;  %v8001_v15 = vcombine.high %v1812_v41, %v1816_v60  ;;  %v8006_v52 = vcombine.low %v1819_v19, %v1823_v28  ;;  %v1843_v60 = vld [vmem:[%s13002_s3 + $0x850] sm:$0xff] }
 0x24a   :  { %6179 = vmatpush1.bf16.msra.mxu1 %v7968_v51  ;;  %v13103_v51 = vld [vmem:[#allocation24_spill] sm:$0xff] }
 0x24b   :  { %5678 = vmatmul.mubr.bf16.gmra.mrb[116].mxu0 %v13100_v16  ;;  %6180 = vmatprep.subr.bf16.mxu1 %v7977_v39  ;;  %v1824_v39 = vld [vmem:[%s13002_s3 + $0x7b8] sm:$0xff] }
 0x24c   :  { %5729 = vmatpush1.bf16.msra.mxu0 %v7974_v34  ;;  %5687 = vmatprep.mubr.bf16.mxu0 %v13101_v43  ;;  %v8007_v34 = vcombine.high %v1819_v19, %v1823_v28  ;;  %v1844_v28 = vld [vmem:[%s13002_s3 + $0x858] sm:$0xff] }
 0x24d   :  { %6130 = vmatmul.mubr.bf16.gmra.mrb[116].mxu1 %v13100_v16  ;;  %5730 = vmatprep.subr.bf16.mxu0 %v7983_v54  ;;  %v1831_v54 = vld [vmem:[%s13002_s3 + $0x7f0] sm:$0xff]  ;;  %v1832_v16 = vld [vmem:[%s13002_s3 + $0x7f8] sm:$0xff] }
 0x24e   :  { %6139 = vmatprep.mubr.bf16.mxu1 %v13101_v43  ;;  %6181 = vmatpush1.bf16.msra.mxu1 %v7976_v63  ;;  %v8009_v63 = vcombine.high %v1820_v9, %v1824_v39  ;;  %v8008_v43 = vcombine.low %v1820_v9, %v1824_v39  ;;  %v8014_v11 = vcombine.low %v1827_v12, %v1831_v54  ;;  %v1855_v9 = vld [vmem:[%s13002_s3 + $0x8b0] sm:$0xff]  ;;  %v13106_v39 = vld [vmem:[#allocation3_spill] sm:$0xff] }
 0x24f   :  { %6182 = vmatprep.subr.bf16.mxu1 %v7985_v23  ;;  %v8015_v23 = vcombine.high %v1827_v12, %v1831_v54  ;;  %v8016_v41 = vcombine.low %v1828_v13, %v1832_v16  ;;  %v1852_v54 = vld [vmem:[%s13002_s3 + $0x898] sm:$0xff] }
 0x250   :  { %5731 = vmatpush1.bf16.msra.mxu0 %v7982_v1  ;;  %v1835_v1 = vld [vmem:[%s13002_s3 + $0x810] sm:$0xff] }
 0x251   :  { %5732 = vmatprep.subr.bf16.mxu0 %v7991_v55  ;;  %v8017_v55 = vcombine.high %v1828_v13, %v1832_v16  ;;  %v8022_v19 = vcombine.low %v1835_v1, %v1839_v61  ;;  %v1859_v16 = vld [vmem:[%s13002_s3 + $0x8d0] sm:$0xff] }
 0x252   :  { %6183 = vmatpush1.bf16.msra.mxu1 %v7984_v44  ;;  %v13105_v44 = vld [vmem:[#allocation4_spill] sm:$0xff] }
 0x253   :  { %5688 = vmatmul.mubr.bf16.gmra.mrb[120].mxu0 %v13102_v53  ;;  %6184 = vmatprep.subr.bf16.mxu1 %v7993_v62  ;;  %v1840_v62 = vld [vmem:[%s13002_s3 + $0x838] sm:$0xff] }
 0x254   :  { %5733 = vmatpush1.bf16.msra.mxu0 %v7990_v32  ;;  %5697 = vmatprep.mubr.bf16.mxu0 %v13103_v51  ;;  %v8023_v32 = vcombine.high %v1835_v1, %v1839_v61  ;;  %v1860_v61 = vld [vmem:[%s13002_s3 + $0x8d8] sm:$0xff] }
 0x255   :  { %6140 = vmatmul.mubr.bf16.gmra.mrb[120].mxu1 %v13102_v53  ;;  %5734 = vmatprep.subr.bf16.mxu0 %v7999_v35  ;;  %v1847_v35 = vld [vmem:[%s13002_s3 + $0x870] sm:$0xff]  ;;  %v1848_v53 = vld [vmem:[%s13002_s3 + $0x878] sm:$0xff] }
 0x256   :  { %6149 = vmatprep.mubr.bf16.mxu1 %v13103_v51  ;;  %6185 = vmatpush1.bf16.msra.mxu1 %v7992_v47  ;;  %v8025_v47 = vcombine.high %v1836_v2, %v1840_v62  ;;  %v8024_v51 = vcombine.low %v1836_v2, %v1840_v62  ;;  %v8030_v12 = vcombine.low %v1843_v60, %v1847_v35  ;;  %v1871_v2 = vld [vmem:[%s13002_s3 + $0x930] sm:$0xff]  ;;  %v13108_v62 = vld [vmem:[#allocation5_spill] sm:$0xff] }
 0x257   :  { %6186 = vmatprep.subr.bf16.mxu1 %v8001_v15  ;;  %v8031_v15 = vcombine.high %v1843_v60, %v1847_v35  ;;  %v8032_v13 = vcombine.low %v1844_v28, %v1848_v53  ;;  %v1868_v35 = vld [vmem:[%s13002_s3 + $0x918] sm:$0xff] }
 0x258   :  { %5735 = vmatpush1.bf16.msra.mxu0 %v7998_v3  ;;  %v1851_v3 = vld [vmem:[%s13002_s3 + $0x890] sm:$0xff] }
 0x259   :  { %5736 = vmatprep.subr.bf16.mxu0 %v8007_v34  ;;  %v8033_v34 = vcombine.high %v1844_v28, %v1848_v53  ;;  %v8038_v1 = vcombine.low %v1851_v3, %v1855_v9  ;;  %v1875_v53 = vld [vmem:[%s13002_s3 + $0x950] sm:$0xff] }
 0x25a   :  { %6187 = vmatpush1.bf16.msra.mxu1 %v8000_v40  ;;  %v13107_v40 = vld [vmem:[#allocation6_spill] sm:$0xff] }
 0x25b   :  { %5698 = vmatmul.mubr.bf16.gmra.mrb[124].mxu0 %v13104_v42  ;;  %6188 = vmatprep.subr.bf16.mxu1 %v8009_v63  ;;  %v1856_v63 = vld [vmem:[%s13002_s3 + $0x8b8] sm:$0xff] }
 0x25c   :  { %5737 = vmatpush1.bf16.msra.mxu0 %v8006_v52  ;;  %5740 = vmatprep.mubr.bf16.mxu0 %v13105_v44  ;;  %v8039_v52 = vcombine.high %v1851_v3, %v1855_v9  ;;  %v1876_v9 = vld [vmem:[%s13002_s3 + $0x958] sm:$0xff] }
 0x25d   :  { %6150 = vmatmul.mubr.bf16.gmra.mrb[124].mxu1 %v13104_v42  ;;  %5738 = vmatprep.subr.bf16.mxu0 %v8015_v23  ;;  %v1863_v23 = vld [vmem:[%s13002_s3 + $0x8f0] sm:$0xff]  ;;  %v1864_v42 = vld [vmem:[%s13002_s3 + $0x8f8] sm:$0xff] }
 0x25e   :  { %6189 = vmatpush1.bf16.msra.mxu1 %v8008_v43  ;;  %6192 = vmatprep.mubr.bf16.mxu1 %v13105_v44  ;;  %v8041_v43 = vcombine.high %v1852_v54, %v1856_v63  ;;  %v8040_v44 = vcombine.low %v1852_v54, %v1856_v63  ;;  %v8046_v60 = vcombine.low %v1859_v16, %v1863_v23  ;;  %v1887_v54 = vld [vmem:[%s13002_s3 + $0x9b0] sm:$0xff]  ;;  %v13110_v63 = vld [vmem:[#allocation9_spill] sm:$0xff] }
 0x25f   :  { %6190 = vmatprep.subr.bf16.mxu1 %v8017_v55  ;;  %v8047_v55 = vcombine.high %v1859_v16, %v1863_v23  ;;  %v8048_v28 = vcombine.low %v1860_v61, %v1864_v42  ;;  %v1884_v23 = vld [vmem:[%s13002_s3 + $0x998] sm:$0xff] }
 0x260   :  { %5739 = vmatpush1.bf16.msra.mxu0 %v8014_v11  ;;  %v1867_v11 = vld [vmem:[%s13002_s3 + $0x910] sm:$0xff] }
 0x261   :  { %5821 = vmatprep.subr.bf16.mxu0 %v8023_v32  ;;  %v8049_v32 = vcombine.high %v1860_v61, %v1864_v42  ;;  %v8054_v3 = vcombine.low %v1867_v11, %v1871_v2  ;;  %v1891_v42 = vld [vmem:[%s13002_s3 + $0x9d0] sm:$0xff] }
 0x262   :  { %6191 = vmatpush1.bf16.msra.mxu1 %v8016_v41  ;;  %v13109_v41 = vld [vmem:[#allocation10_spill] sm:$0xff] }
 0x263   :  { %5741 = vmatmul.mubr.bf16.vlgmr.msra.gmra.mrb[96].mxu0 %v13106_v39  ;;  %6273 = vmatprep.subr.bf16.mxu1 %v8025_v47  ;;  %v1872_v47 = vld [vmem:[%s13002_s3 + $0x938] sm:$0xff] }
 0x264   :  { %5822 = vmatpush1.bf16.msra.mxu0 %v8022_v19  ;;  %5750 = vmatprep.mubr.bf16.mxu0 %v13107_v40  ;;  %v8055_v19 = vcombine.high %v1867_v11, %v1871_v2  ;;  %v1892_v2 = vld [vmem:[%s13002_s3 + $0x9d8] sm:$0xff] }
 0x265   :  { %6193 = vmatmul.mubr.bf16.vlgmr.msra.gmra.mrb[96].mxu1 %v13106_v39  ;;  %5823 = vmatprep.subr.bf16.mxu0 %v8031_v15  ;;  %v1879_v15 = vld [vmem:[%s13002_s3 + $0x970] sm:$0xff]  ;;  %v1880_v39 = vld [vmem:[%s13002_s3 + $0x978] sm:$0xff] }
 0x266   :  { %6202 = vmatprep.mubr.bf16.mxu1 %v13107_v40  ;;  %6274 = vmatpush1.bf16.msra.mxu1 %v8024_v51  ;;  %v8057_v51 = vcombine.high %v1868_v35, %v1872_v47  ;;  %v8056_v40 = vcombine.low %v1868_v35, %v1872_v47  ;;  %v8062_v16 = vcombine.low %v1875_v53, %v1879_v15  ;;  %v1903_v35 = vld [vmem:[%s13002_s3 + $0xa30] sm:$0xff]  ;;  %v13112_v47 = vld [vmem:[#allocation13_spill] sm:$0xff] }
 0x267   :  { %6275 = vmatprep.subr.bf16.mxu1 %v8033_v34  ;;  %v8063_v34 = vcombine.high %v1875_v53, %v1879_v15  ;;  %v8064_v61 = vcombine.low %v1876_v9, %v1880_v39  ;;  %v1900_v15 = vld [vmem:[%s13002_s3 + $0xa18] sm:$0xff] }
 0x268   :  { %5824 = vmatpush1.bf16.msra.mxu0 %v8030_v12  ;;  %v1883_v12 = vld [vmem:[%s13002_s3 + $0x990] sm:$0xff] }
 0x269   :  { %5825 = vmatprep.subr.bf16.mxu0 %v8039_v52  ;;  %v8065_v52 = vcombine.high %v1876_v9, %v1880_v39  ;;  %v8070_v11 = vcombine.low %v1883_v12, %v1887_v54  ;;  %v1907_v39 = vld [vmem:[%s13002_s3 + $0xa50] sm:$0xff] }
 0x26a   :  { %6276 = vmatpush1.bf16.msra.mxu1 %v8032_v13  ;;  %v13111_v13 = vld [vmem:[#allocation14_spill] sm:$0xff] }
 0x26b   :  { %5751 = vmatmul.mubr.bf16.gmra.mrb[100].mxu0 %v13108_v62  ;;  %6277 = vmatprep.subr.bf16.mxu1 %v8041_v43  ;;  %v1888_v43 = vld [vmem:[%s13002_s3 + $0x9b8] sm:$0xff] }
 0x26c   :  { %5826 = vmatpush1.bf16.msra.mxu0 %v8038_v1  ;;  %5760 = vmatprep.mubr.bf16.mxu0 %v13109_v41  ;;  %v8071_v1 = vcombine.high %v1883_v12, %v1887_v54  ;;  %v1908_v54 = vld [vmem:[%s13002_s3 + $0xa58] sm:$0xff] }
 0x26d   :  { %6203 = vmatmul.mubr.bf16.gmra.mrb[100].mxu1 %v13108_v62  ;;  %5827 = vmatprep.subr.bf16.mxu0 %v8047_v55  ;;  %v1895_v55 = vld [vmem:[%s13002_s3 + $0x9f0] sm:$0xff]  ;;  %v1896_v62 = vld [vmem:[%s13002_s3 + $0x9f8] sm:$0xff] }
 0x26e   :  { %6212 = vmatprep.mubr.bf16.mxu1 %v13109_v41  ;;  %6278 = vmatpush1.bf16.msra.mxu1 %v8040_v44  ;;  %v8073_v44 = vcombine.high %v1884_v23, %v1888_v43  ;;  %v8072_v41 = vcombine.low %v1884_v23, %v1888_v43  ;;  %v8078_v53 = vcombine.low %v1891_v42, %v1895_v55  ;;  %v1919_v23 = vld [vmem:[%s13002_s3 + $0xab0] sm:$0xff]  ;;  %v1916_v43 = vld [vmem:[%s13002_s3 + $0xa98] sm:$0xff] }
 0x26f   :  { %6279 = vmatprep.subr.bf16.mxu1 %v8049_v32  ;;  %v8079_v32 = vcombine.high %v1891_v42, %v1895_v55  ;;  %v8080_v9 = vcombine.low %v1892_v2, %v1896_v62  ;;  %v1920_v42 = vld [vmem:[%s13002_s3 + $0xab8] sm:$0xff]  ;;  %v13115_v55 = vld [vmem:[#allocation22_spill] sm:$0xff] }
 0x270   :  { %5828 = vmatpush1.bf16.msra.mxu0 %v8046_v60  ;;  %v1899_v60 = vld [vmem:[%s13002_s3 + $0xa10] sm:$0xff] }
 0x271   :  { %5829 = vmatprep.subr.bf16.mxu0 %v8055_v19  ;;  %v8081_v19 = vcombine.high %v1892_v2, %v1896_v62  ;;  %v8086_v12 = vcombine.low %v1899_v60, %v1903_v35  ;;  %v1927_v62 = vld [vmem:[%s13002_s3 + $0xaf0] sm:$0xff] }
 0x272   :  { %6280 = vmatpush1.bf16.msra.mxu1 %v8048_v28  ;;  %v13113_v28 = vld [vmem:[#allocation18_spill] sm:$0xff] }
 0x273   :  { %5761 = vmatmul.mubr.bf16.gmra.mrb[104].mxu0 %v13110_v63  ;;  %6281 = vmatprep.subr.bf16.mxu1 %v8057_v51  ;;  %v1904_v51 = vld [vmem:[%s13002_s3 + $0xa38] sm:$0xff] }
 0x274   :  { %5830 = vmatpush1.bf16.msra.mxu0 %v8054_v3  ;;  %5770 = vmatprep.mubr.bf16.mxu0 %v13111_v13  ;;  %v8087_v3 = vcombine.high %v1899_v60, %v1903_v35  ;;  %v8105_v60 = vcombine.high %v1916_v43, %v1920_v42  ;;  %v1928_v35 = vld [vmem:[%s13002_s3 + $0xaf8] sm:$0xff] }
 0x275   :  { %6213 = vmatmul.mubr.bf16.gmra.mrb[104].mxu1 %v13110_v63  ;;  %5831 = vmatprep.subr.bf16.mxu0 %v8063_v34  ;;  %v1911_v34 = vld [vmem:[%s13002_s3 + $0xa70] sm:$0xff]  ;;  %v1912_v63 = vld [vmem:[%s13002_s3 + $0xa78] sm:$0xff] }
 0x276   :  { %6222 = vmatprep.mubr.bf16.mxu1 %v13111_v13  ;;  %6282 = vmatpush1.bf16.msra.mxu1 %v8056_v40  ;;  %v8089_v40 = vcombine.high %v1900_v15, %v1904_v51  ;;  %v8088_v13 = vcombine.low %v1900_v15, %v1904_v51  ;;  %v8104_v15 = vcombine.low %v1916_v43, %v1920_v42  ;;  %v1932_v51 = vld [vmem:[%s13002_s3 + $0xb18] sm:$0xff]  ;;  %v1951_v42 = vld [vmem:[%s13002_s3 + $0xbb0] sm:$0xff] }
 0x277   :  { %6283 = vmatprep.subr.bf16.mxu1 %v8065_v52  ;;  %v8095_v52 = vcombine.high %v1907_v39, %v1911_v34 }
 0x278   :  { %5832 = vmatpush1.bf16.msra.mxu0 %v8062_v16  ;;  %v1915_v16 = vld [vmem:[%s13002_s3 + $0xa90] sm:$0xff] }
 0x279   :  { %5833 = vmatprep.subr.bf16.mxu0 %v8071_v1  ;;  %v13114_v1 = vld [vmem:[#allocation17_spill] sm:$0xff]  ;;  %v8103_v2 = vcombine.high %v1915_v16, %v1919_v23 }
 0x27a   :  { %6284 = vmatpush1.bf16.msra.mxu1 %v8064_v61  ;;  %v8097_v61 = vcombine.high %v1908_v54, %v1912_v63 }
 0x27b   :  { %5771 = vmatmul.mubr.bf16.gmra.mrb[108].mxu0 %v13112_v47  ;;  %6285 = vmatprep.subr.bf16.mxu1 %v8073_v44  ;;  %v8094_v44 = vcombine.low %v1907_v39, %v1911_v34  ;;  %v1936_v39 = vld [vmem:[%s13002_s3 + $0xb38] sm:$0xff]  ;;  %v13117_v34 = vld [vmem:[#allocation26_spill] sm:$0xff] }
 0x27c   :  { %5834 = vmatpush1.bf16.msra.mxu0 %v8070_v11  ;;  %5780 = vmatprep.mubr.bf16.mxu0 %v13113_v28  ;;  %v1923_v11 = vld [vmem:[%s13002_s3 + $0xad0] sm:$0xff] }
 0x27d   :  { %6223 = vmatmul.mubr.bf16.gmra.mrb[108].mxu1 %v13112_v47  ;;  %5835 = vmatprep.subr.bf16.mxu0 %v8079_v32  ;;  %v8096_v32 = vcombine.low %v1908_v54, %v1912_v63  ;;  %v8102_v47 = vcombine.low %v1915_v16, %v1919_v23  ;;  %v1943_v63 = vld [vmem:[%s13002_s3 + $0xb70] sm:$0xff]  ;;  %v8121_v16 = vcombine.high %v1932_v51, %v1936_v39  ;;  %v1944_v23 = vld [vmem:[%s13002_s3 + $0xb78] sm:$0xff] }
 0x27e   :  { %6232 = vmatprep.mubr.bf16.mxu1 %v13113_v28  ;;  %6286 = vmatpush1.bf16.msra.mxu1 %v8072_v41  ;;  %v1924_v41 = vld [vmem:[%s13002_s3 + $0xad8] sm:$0xff]  ;;  %v8111_v28 = vcombine.high %v1923_v11, %v1927_v62 }
 0x27f   :  { %6287 = vmatprep.subr.bf16.mxu1 %v8081_v19  ;;  %v1931_v19 = vld [vmem:[%s13002_s3 + $0xb10] sm:$0xff] }
 0x280   :  { %5836 = vmatpush1.bf16.msra.mxu0 %v8078_v53  ;;  %v1935_v53 = vld [vmem:[%s13002_s3 + $0xb30] sm:$0xff] }
 0x281   :  { %5837 = vmatprep.subr.bf16.mxu0 %v8087_v3  ;;  %v13116_v3 = vld [vmem:[#allocation21_spill] sm:$0xff]  ;;  %v8119_v54 = vcombine.high %v1931_v19, %v1935_v53  ;;  %v8118_v43 = vcombine.low %v1931_v19, %v1935_v53 }
 0x282   :  { %6288 = vmatpush1.bf16.msra.mxu1 %v8080_v9  ;;  %v8113_v9 = vcombine.high %v1924_v41, %v1928_v35 }
 0x283   :  { %5781 = vmatmul.mubr.bf16.gmra.mrb[112].mxu0 %v13114_v1  ;;  %6289 = vmatprep.subr.bf16.mxu1 %v8089_v40  ;;  %v8110_v40 = vcombine.low %v1923_v11, %v1927_v62  ;;  %v13118_v11 = vld [vmem:[#allocation25_spill] sm:$0xff] }
 0x284   :  { %5838 = vmatpush1.bf16.msra.mxu0 %v8086_v12  ;;  %5790 = vmatprep.mubr.bf16.mxu0 %v13115_v55  ;;  %v1939_v12 = vld [vmem:[%s13002_s3 + $0xb50] sm:$0xff]  ;;  %v1952_v62 = vld [vmem:[%s13002_s3 + $0xbb8] sm:$0xff] }
 0x285   :  { %6233 = vmatmul.mubr.bf16.gmra.mrb[112].mxu1 %v13114_v1  ;;  %5839 = vmatprep.subr.bf16.mxu0 %v8095_v52  ;;  %v8112_v52 = vcombine.low %v1924_v41, %v1928_v35  ;;  %v1947_v1 = vld [vmem:[%s13002_s3 + $0xb90] sm:$0xff]  ;;  %v8126_v41 = vcombine.low %v1939_v12, %v1943_v63 }
 0x286   :  { %6242 = vmatprep.mubr.bf16.mxu1 %v13115_v55  ;;  %6290 = vmatpush1.bf16.msra.mxu1 %v8088_v13  ;;  %v1940_v13 = vld [vmem:[%s13002_s3 + $0xb58] sm:$0xff]  ;;  %v8120_v55 = vcombine.low %v1932_v51, %v1936_v39  ;;  %v8135_v35 = vcombine.high %v1947_v1, %v1951_v42  ;;  %v8134_v51 = vcombine.low %v1947_v1, %v1951_v42  ;;  %v1967_v39 = vld [vmem:[%s13002_s3 + $0xc30] sm:$0xff] }
 0x287   :  { %6291 = vmatprep.subr.bf16.mxu1 %v8097_v61  ;;  %v8127_v61 = vcombine.high %v1939_v12, %v1943_v63  ;;  %v8128_v19 = vcombine.low %v1940_v13, %v1944_v23  ;;  %v1979_v42 = vld [vmem:[%s13002_s3 + $0xc90] sm:$0xff] }
 0x288   :  { %5840 = vmatpush1.bf16.msra.mxu0 %v8094_v44  ;;  %v1948_v44 = vld [vmem:[%s13002_s3 + $0xb98] sm:$0xff] }
 0x289   :  { %5841 = vmatprep.subr.bf16.mxu0 %v8103_v2  ;;  %v8129_v2 = vcombine.high %v1940_v13, %v1944_v23  ;;  %v8137_v53 = vcombine.high %v1948_v44, %v1952_v62 }
 0x28a   :  { %6292 = vmatpush1.bf16.msra.mxu1 %v8096_v32  ;;  %v13119_v32 = vld [vmem:[#allocation27_spill] sm:$0xff] }
 0x28b   :  { %5791 = vmatmul.mubr.bf16.gmra.mrb[116].mxu0 %v13116_v3  ;;  %6293 = vmatprep.subr.bf16.mxu1 %v8105_v60  ;;  %v1955_v60 = vld [vmem:[%s13002_s3 + $0xbd0] sm:$0xff] }
 0x28c   :  { %5842 = vmatpush1.bf16.msra.mxu0 %v8102_v47  ;;  %5800 = vmatprep.mubr.bf16.mxu0 %v13117_v34  ;;  %v1959_v47 = vld [vmem:[%s13002_s3 + $0xbf0] sm:$0xff] }
 0x28d   :  { %6243 = vmatmul.mubr.bf16.gmra.mrb[116].mxu1 %v13116_v3  ;;  %5843 = vmatprep.subr.bf16.mxu0 %v8111_v28  ;;  %v1956_v28 = vld [vmem:[%s13002_s3 + $0xbd8] sm:$0xff]  ;;  %v1963_v3 = vld [vmem:[%s13002_s3 + $0xc10] sm:$0xff]  ;;  %v8142_v63 = vcombine.low %v1955_v60, %v1959_v47 }
 0x28e   :  { %6252 = vmatprep.mubr.bf16.mxu1 %v13117_v34  ;;  %6294 = vmatpush1.bf16.msra.mxu1 %v8104_v15  ;;  %v1960_v15 = vld [vmem:[%s13002_s3 + $0xbf8] sm:$0xff]  ;;  %v8136_v34 = vcombine.low %v1948_v44, %v1952_v62  ;;  %v8151_v13 = vcombine.high %v1963_v3, %v1967_v39 }
 0x28f   :  { %6295 = vmatprep.subr.bf16.mxu1 %v8113_v9  ;;  %v8143_v9 = vcombine.high %v1955_v60, %v1959_v47  ;;  %v8145_v12 = vcombine.high %v1956_v28, %v1960_v15  ;;  %v8144_v23 = vcombine.low %v1956_v28, %v1960_v15  ;;  %v1991_v60 = vld [vmem:[%s13002_s3 + $0xcf0] sm:$0xff]  ;;  %v1992_v28 = vld [vmem:[%s13002_s3 + $0xcf8] sm:$0xff] }
 0x290   :  { %5844 = vmatpush1.bf16.msra.mxu0 %v8110_v40  ;;  %v1964_v40 = vld [vmem:[%s13002_s3 + $0xc18] sm:$0xff] }
 0x291   :  { %5845 = vmatprep.subr.bf16.mxu0 %v8119_v54  ;;  %v1968_v54 = vld [vmem:[%s13002_s3 + $0xc38] sm:$0xff] }
 0x292   :  { %6296 = vmatpush1.bf16.msra.mxu1 %v8112_v52  ;;  %v1971_v52 = vld [vmem:[%s13002_s3 + $0xc50] sm:$0xff]  ;;  %v8153_v1 = vcombine.high %v1964_v40, %v1968_v54  ;;  %v8152_v44 = vcombine.low %v1964_v40, %v1968_v54 }
 0x293   :  { %5801 = vmatmul.mubr.bf16.gmra.mrb[120].mxu0 %v13118_v11  ;;  %6297 = vmatprep.subr.bf16.mxu1 %v8121_v16  ;;  %v1975_v16 = vld [vmem:[%s13002_s3 + $0xc70] sm:$0xff] }
 0x294   :  { %5846 = vmatpush1.bf16.msra.mxu0 %v8118_v43  ;;  %5810 = vmatprep.mubr.bf16.mxu0 %v13119_v32  ;;  %v1972_v43 = vld [vmem:[%s13002_s3 + $0xc58] sm:$0xff]  ;;  %v2007_v54 = vld [vmem:[%s13002_s3 + $0xd70] sm:$0xff] }
 0x295   :  { %6253 = vmatmul.mubr.bf16.gmra.mrb[120].mxu1 %v13118_v11  ;;  %5847 = vmatprep.subr.bf16.mxu0 %v8127_v61  ;;  %v8150_v61 = vcombine.low %v1963_v3, %v1967_v39  ;;  %v1980_v11 = vld [vmem:[%s13002_s3 + $0xc98] sm:$0xff] }
 0x296   :  { %6262 = vmatprep.mubr.bf16.mxu1 %v13119_v32  ;;  %6298 = vmatpush1.bf16.msra.mxu1 %v8120_v55  ;;  %v8159_v55 = vcombine.high %v1971_v52, %v1975_v16  ;;  %v8158_v32 = vcombine.low %v1971_v52, %v1975_v16  ;;  %v2000_v39 = vld [vmem:[%s13002_s3 + $0xd38] sm:$0xff] }
 0x297   :  { %6299 = vmatprep.subr.bf16.mxu1 %v8129_v2  ;;  %v1984_v2 = vld [vmem:[%s13002_s3 + $0xcb8] sm:$0xff] }
 0x298   :  { %5848 = vmatpush1.bf16.msra.mxu0 %v8126_v41  ;;  %v1987_v41 = vld [vmem:[%s13002_s3 + $0xcd0] sm:$0xff]  ;;  %v8168_v3 = vcombine.low %v1980_v11, %v1984_v2  ;;  %v2004_v16 = vld [vmem:[%s13002_s3 + $0xd58] sm:$0xff] }
 0x299   :  { %5849 = vmatprep.subr.bf16.mxu0 %v8135_v35  ;;  %v8174_v40 = vcombine.low %v1987_v41, %v1991_v60 }
 0x29a   :  { %6300 = vmatpush1.bf16.msra.mxu1 %v8128_v19  ;;  %v1988_v19 = vld [vmem:[%s13002_s3 + $0xcd8] sm:$0xff] }
 0x29b   :  { %5811 = vmatmul.mubr.bf16.gmra.mrb[124].mxu0 %v10686_v8  ;;  %6301 = vmatprep.subr.bf16.mxu1 %v8137_v53  ;;  %v8169_v53 = vcombine.high %v1980_v11, %v1984_v2  ;;  %v8176_v52 = vcombine.low %v1988_v19, %v1992_v28 }
 0x29c   :  { %5850 = vmatpush1.bf16.msra.mxu0 %v8134_v51  ;;  %5853 = vmatprep.mubr.bf16.mxu0 %v10666_v59  ;;  %v8175_v51 = vcombine.high %v1987_v41, %v1991_v60 }
 0x29d   :  { %6263 = vmatmul.mubr.bf16.gmra.mrb[124].mxu1 %v10686_v8  ;;  %5851 = vmatprep.subr.bf16.mxu0 %v8143_v9  ;;  %v1976_v8 = vld [vmem:[%s13002_s3 + $0xc78] sm:$0xff] }
 0x29e   :  { %6302 = vmatpush1.bf16.msra.mxu1 %v8136_v34  ;;  %6305 = vmatprep.mubr.bf16.mxu1 %v10666_v59  ;;  %v1983_v59 = vld [vmem:[%s13002_s3 + $0xcb0] sm:$0xff]  ;;  %v8161_v62 = vcombine.high %v1972_v43, %v1976_v8  ;;  %v8160_v47 = vcombine.low %v1972_v43, %v1976_v8  ;;  %v1996_v9 = vld [vmem:[%s13002_s3 + $0xd18] sm:$0xff]  ;;  %v8177_v34 = vcombine.high %v1988_v19, %v1992_v28 }
 0x29f   :  { %6303 = vmatprep.subr.bf16.mxu1 %v8145_v12  ;;  %v8167_v35 = vcombine.high %v1979_v42, %v1983_v59  ;;  %v8166_v15 = vcombine.low %v1979_v42, %v1983_v59  ;;  %v2003_v12 = vld [vmem:[%s13002_s3 + $0xd50] sm:$0xff]  ;;  %v12135_v42 = vld [vmem:[%s13002_s3 + $0xd98] sm:$0xff]  ;;  %v13120_v59 = vld [vmem:[#allocation2_spill] sm:$0xff] }
 0x2a0   :  { %5852 = vmatpush1.bf16.msra.mxu0 %v8142_v63  ;;  %v8191_v8 = vcombine.high %v2003_v12, %v2007_v54  ;;  %v8190_v41 = vcombine.low %v2003_v12, %v2007_v54  ;;  %v13123_v60 = vsub.s32 1, %v13120_v59  ;;  %v12164_v19 = vld [vmem:[%s13002_s3 + $0xdf0] sm:$0xff]  ;;  %v13124_v28 = vsub.s32 3, %v13120_v59 }
 0x2a1   :  { %5934 = vmatprep.subr.bf16.mxu0 %v8151_v13  ;;  %v2089_v13 = vld [vmem:[%s13005_s4] sm:$0xff] }
 0x2a2   :  { %6304 = vmatpush1.bf16.msra.mxu1 %v8144_v23  ;;  %v2008_v23 = vld [vmem:[%s13002_s3 + $0xd78] sm:$0xff] }
 0x2a3   :  { %5854 = vmatmul.mubr.bf16.vlgmr.msra.gmra.mrb[96].mxu0 %v10647_v0  ;;  %6386 = vmatprep.subr.bf16.mxu1 %v8153_v1  ;;  %v12130_v1 = vld [vmem:[%s13002_s3 + $0xdb0] sm:$0xff]  ;;  %v8193_v2 = vcombine.high %v2004_v16, %v2008_v23 }
 0x2a4   :  { %5935 = vmatpush1.bf16.msra.mxu0 %v8150_v61  ;;  %5863 = vmatprep.mubr.bf16.mxu0 %v10741_v58  ;;  %v8184_v61 = vcombine.low %v1996_v9, %v2000_v39 }
 0x2a5   :  { %6306 = vmatmul.mubr.bf16.vlgmr.msra.gmra.mrb[96].mxu1 %v10647_v0  ;;  %5936 = vmatprep.subr.bf16.mxu0 %v8159_v55  ;;  %v1995_v0 = vld [vmem:[%s13002_s3 + $0xd10] sm:$0xff]  ;;  %v12140_v55 = vld [vmem:[%s13002_s3 + $0xdb8] sm:$0xff] }
 0x2a6   :  { %6315 = vmatprep.mubr.bf16.mxu1 %v10741_v58  ;;  %6387 = vmatpush1.bf16.msra.mxu1 %v8152_v44  ;;  %v1999_v58 = vld [vmem:[%s13002_s3 + $0xd30] sm:$0xff]  ;;  %v13121_v44 = vsub.s32 0, %v13120_v59 }
 0x2a7   :  { %6388 = vmatprep.subr.bf16.mxu1 %v8161_v62  ;;  %v8183_v63 = vcombine.high %v1995_v0, %v1999_v58  ;;  %v8182_v43 = vcombine.low %v1995_v0, %v1999_v58  ;;  %v13122_v62 = vsub.s32 2, %v13120_v59  ;;  %v8192_v58 = vcombine.low %v2004_v16, %v2008_v23 }
 0x2a8   :  { %5937 = vmatpush1.bf16.msra.mxu0 %v8158_v32  ;;  %v12145_v11 = vrot.slane %v2089_v13, %v13121_v44  ;;  %v8200_v44 = vcombine.low %v12135_v42, %v12140_v55 }
 0x2a9   :  { %5938 = vmatprep.subr.bf16.mxu0 %v8167_v35  ;;  %v12150_v32 = vrot.slane %v2089_v13, %v13122_v62  ;;  %v12154_v35 = vrot.slane %v2089_v13, %v13123_v60 }
 0x2aa   :  { %6389 = vmatpush1.bf16.msra.mxu1 %v8160_v47  ;;  %v12159_v47 = vld [vmem:[%s13002_s3 + $0xdd0] sm:$0xff] }
 0x2ab   :  { %5864 = vmatmul.mubr.bf16.gmra.mrb[100].mxu0 %v10727_v31  ;;  %6390 = vmatprep.subr.bf16.mxu1 %v8169_v53  ;;  %v12169_v53 = vrot.slane %v2089_v13, %v13124_v28 }
 0x2ac   :  { %5939 = vmatpush1.bf16.msra.mxu0 %v8166_v15  ;;  %5873 = vmatprep.mubr.bf16.mxu0 %v10809_v38 }
 0x2ad   :  { %6316 = vmatmul.mubr.bf16.gmra.mrb[100].mxu1 %v10727_v31  ;;  %5940 = vmatprep.subr.bf16.mxu0 %v8175_v51  ;;  %v8185_v31 = vcombine.high %v1996_v9, %v2000_v39  ;;  %v12177_v51 = vld [vmem:[%s13002_s3 + $0xdd8] sm:$0xff] }
 0x2ae   :  { %6325 = vmatprep.mubr.bf16.mxu1 %v10809_v38  ;;  %6391 = vmatpush1.bf16.msra.mxu1 %v8168_v3  ;;  %v12125_v38 = vld [vmem:[%s13002_s3 + $0xd90] sm:$0xff] }
 0x2af   :  { %6392 = vmatprep.subr.bf16.mxu1 %v8177_v34  ;;  %v8199_v15 = vcombine.high %v12125_v38, %v12130_v1 }
 0x2b0   :  { %5941 = vmatpush1.bf16.msra.mxu0 %v8174_v40 }
 0x2b1   :  { %5942 = vmatprep.subr.bf16.mxu0 %v8183_v63  ;;  %v8198_v63 = vcombine.low %v12125_v38, %v12130_v1  ;;  %v8206_v38 = vcombine.low %v12159_v47, %v12164_v19  ;;  %v12204_v1 = vld [vmem:[%s13002_s3 + $0xe10] sm:$0xff] }
 0x2b2   :  { %6393 = vmatpush1.bf16.msra.mxu1 %v8176_v52 }
 0x2b3   :  { %5874 = vmatmul.mubr.bf16.gmra.mrb[104].mxu0 %v10795_v26  ;;  %6394 = vmatprep.subr.bf16.mxu1 %v8185_v31  ;;  %v8207_v31 = vcombine.high %v12159_v47, %v12164_v19 }
 0x2b4   :  { %5943 = vmatpush1.bf16.msra.mxu0 %v8182_v43  ;;  %5883 = vmatprep.mubr.bf16.mxu0 %v10877_v18 }
 0x2b5   :  { %6326 = vmatmul.mubr.bf16.gmra.mrb[104].mxu1 %v10795_v26  ;;  %5944 = vmatprep.subr.bf16.mxu0 %v8191_v8  ;;  %v12182_v26 = vld [vmem:[%s13002_s3 + $0xdf8] sm:$0xff] }
 0x2b6   :  { %6335 = vmatprep.mubr.bf16.mxu1 %v10877_v18  ;;  %6395 = vmatpush1.bf16.msra.mxu1 %v8184_v61  ;;  %v5064_v0 = vpop.f32.mrb[64].mxu0  ;;  %v8201_v18 = vcombine.high %v12135_v42, %v12140_v55  ;;  %v8209_v42 = vcombine.high %v12177_v51, %v12182_v26 }
 0x2b7   :  { %v8595_v3 = vadd.f32 %v5064_v0, %v12145_v11  ;;  %v5516_v9 = vpop.f32.mrb[64].mxu1  ;;  %v5066_v39 = vpop.f32.mrb[65].mxu0  ;;  %6396 = vmatprep.subr.bf16.mxu1 %v8193_v2  ;;  %v12209_v2 = vld [vmem:[%s13002_s3 + $0xe30] sm:$0xff]  ;;  %v12224_v0 = vld [vmem:[%s13002_s3 + $0xe38] sm:$0xff] }
 0x2b8   :  { %v8627_v34 = vadd.f32 %v5516_v9, %v12150_v32  ;;  %v8596_v40 = vadd.f32 %v5066_v39, %v12154_v35  ;;  %v5518_v12 = vpop.f32.mrb[65].mxu1  ;;  %5945 = vmatpush1.bf16.msra.mxu0 %v8190_v41  ;;  %v5068_v54 = vpop.f32.mrb[66].mxu0  ;;  %v8215_v39 = vcombine.high %v12204_v1, %v12209_v2 }
 0x2b9   :  { %v8628_v52 = vadd.f32 %v5518_v12, %v12169_v53  ;;  %v8597_v13 = vadd.f32 %v5068_v54, %v12145_v11  ;;  %v5520_v16 = vpop.f32.mrb[66].mxu1  ;;  %v5070_v23 = vpop.f32.mrb[67].mxu0  ;;  %5946 = vmatprep.subr.bf16.mxu0 %v8199_v15  ;;  %v6499_v62 = vmax.f32 %v8595_v3, 0.0  ;;  %v12219_v15 = vld [vmem:[%s13002_s3 + $0xe18] sm:$0xff]  ;;  %v8208_v12 = vcombine.low %v12177_v51, %v12182_v26  ;;  %v12241_v54 = vld [vmem:[%s13002_s3 + $0xe50] sm:$0xff] }
 0x2ba   :  { %v8629_v43 = vadd.f32 %v5520_v16, %v12150_v32  ;;  %6397 = vmatpush1.bf16.msra.mxu1 %v8192_v58  ;;  %v8598_v8 = vadd.f32 %v5070_v23, %v12154_v35  ;;  %v5522_v61 = vpop.f32.mrb[67].mxu1  ;;  %v6501_v55 = vmax.f32 %v8627_v34, 0.0  ;;  %v6500_v47 = vmax.f32 %v8596_v40, 0.0 }
 0x2bb   :  { %v6507_v41 = vmax.f32 %v8597_v13, 0.0  ;;  %v8630_v60 = vadd.f32 %v5522_v61, %v12169_v53  ;;  %5884 = vmatmul.mubr.bf16.gmra.mrb[108].mxu0 %v10863_v10  ;;  %6398 = vmatprep.subr.bf16.mxu1 %v8201_v18  ;;  %v6502_v58 = vmax.f32 %v8628_v52, 0.0  ;;  %v8217_v51 = vcombine.high %v12219_v15, %v12224_v0  ;;  %v12265_v61 = vld [vmem:[%s13002_s3 + $0xe78] sm:$0xff] }
 0x2bc   :  { %v6509_v19 = vmax.f32 %v8629_v43, 0.0  ;;  %v6508_v28 = vmax.f32 %v8598_v8, 0.0  ;;  %5947 = vmatpush1.bf16.msra.mxu0 %v8198_v63  ;;  %5893 = vmatprep.mubr.bf16.mxu0 %v10945_v56  ;;  %v8214_v43 = vcombine.low %v12204_v1, %v12209_v2  ;;  %v12260_v8 = vld [vmem:[%s13002_s3 + $0xe58] sm:$0xff] }
 0x2bd   :  { %v12226_v3 = vpack.c.bf16 %v6507_v41, %v6499_v62  ;;  %v6510_v9 = vmax.f32 %v8630_v60, 0.0  ;;  %6336 = vmatmul.mubr.bf16.gmra.mrb[108].mxu1 %v10863_v10  ;;  %5948 = vmatprep.subr.bf16.mxu0 %v8207_v31  ;;  %v12246_v10 = vld [vmem:[%s13002_s3 + $0xe70] sm:$0xff] }
 0x2be   :  { %v12231_v18 = vpack.c.bf16 %v6509_v19, %v6501_v55  ;;  %v12233_v34 = vpack.c.bf16 %v6508_v28, %v6500_v47  ;;  %6345 = vmatprep.mubr.bf16.mxu1 %v10945_v56  ;;  %6399 = vmatpush1.bf16.msra.mxu1 %v8200_v44  ;;  %v5074_v40 = vpop.f32.mrb[68].mxu0  ;;  %v8223_v1 = vcombine.high %v12241_v54, %v12246_v10  ;;  %v12280_v19 = vld [vmem:[%s13002_s3 + $0xe90] sm:$0xff] }
 0x2bf   :  { %v12248_v63 = vpack.c.bf16 %v6510_v9, %v6502_v58  ;;  %v8599_v52 = vadd.f32 %v5074_v40, %v12145_v11  ;;  %v5526_v56 = vpop.f32.mrb[68].mxu1  ;;  %v5076_v13 = vpop.f32.mrb[69].mxu0  ;;  %6400 = vmatprep.subr.bf16.mxu1 %v8209_v42  ;;  %v8216_v55 = vcombine.low %v12219_v15, %v12224_v0  ;;  %v8222_v47 = vcombine.low %v12241_v54, %v12246_v10  ;;  %v12285_v28 = vld [vmem:[%s13002_s3 + $0xeb0] sm:$0xff]  ;;  %v12295_v10 = vld [vmem:[%s13002_s3 + $0xe98] sm:$0xff] }
 0x2c0   :  { %v8631_v26 = vadd.f32 %v5526_v56, %v12150_v32  ;;  %v8600_v16 = vadd.f32 %v5076_v13, %v12154_v35  ;;  %v5528_v23 = vpop.f32.mrb[69].mxu1  ;;  %5949 = vmatpush1.bf16.msra.mxu0 %v8206_v38  ;;  %v5078_v31 = vpop.f32.mrb[70].mxu0  ;;  %v8225_v15 = vcombine.high %v12260_v8, %v12265_v61 }
 0x2c1   :  { %v8632_v44 = vadd.f32 %v5528_v23, %v12169_v53  ;;  %v8601_v62 = vadd.f32 %v5078_v31, %v12145_v11  ;;  %v5530_v41 = vpop.f32.mrb[70].mxu1  ;;  %v5080_v38 = vpop.f32.mrb[71].mxu0  ;;  %5950 = vmatprep.subr.bf16.mxu0 %v8215_v39  ;;  %v6515_v58 = vmax.f32 %v8599_v52, 0.0  ;;  %v12300_v52 = vld [vmem:[%s13002_s3 + $0xeb8] sm:$0xff] }
 0x2c2   :  { %v8633_v2 = vadd.f32 %v5530_v41, %v12150_v32  ;;  %6401 = vmatpush1.bf16.msra.mxu1 %v8208_v12  ;;  %v8602_v60 = vadd.f32 %v5080_v38, %v12154_v35  ;;  %v5532_v42 = vpop.f32.mrb[71].mxu1  ;;  %v6517_v0 = vmax.f32 %v8631_v26, 0.0  ;;  %v6516_v40 = vmax.f32 %v8600_v16, 0.0 }
 0x2c3   :  { %v6523_v9 = vmax.f32 %v8601_v62, 0.0  ;;  %v8634_v39 = vadd.f32 %v5532_v42, %v12169_v53  ;;  %5894 = vmatmul.mubr.bf16.gmra.mrb[112].mxu0 %v10931_v5  ;;  %6402 = vmatprep.subr.bf16.mxu1 %v8217_v51  ;;  %v6518_v56 = vmax.f32 %v8632_v44, 0.0  ;;  %v8231_v26 = vcombine.high %v12280_v19, %v12285_v28  ;;  %v12317_v44 = vld [vmem:[%s13002_s3 + $0xed0] sm:$0xff] }
 0x2c4   :  { %v6525_v12 = vmax.f32 %v8633_v2, 0.0  ;;  %v6524_v54 = vmax.f32 %v8602_v60, 0.0  ;;  %5951 = vmatpush1.bf16.msra.mxu0 %v8214_v43  ;;  %5903 = vmatprep.mubr.bf16.mxu0 %v11013_v24  ;;  %v8224_v43 = vcombine.low %v12260_v8, %v12265_v61  ;;  %v8233_v8 = vcombine.high %v12295_v10, %v12300_v52 }
 0x2c5   :  { %v12302_v13 = vpack.c.bf16 %v6523_v9, %v6515_v58  ;;  %v6526_v51 = vmax.f32 %v8634_v39, 0.0  ;;  %6346 = vmatmul.mubr.bf16.gmra.mrb[112].mxu1 %v10931_v5  ;;  %5952 = vmatprep.subr.bf16.mxu0 %v8223_v1  ;;  %v12322_v5 = vld [vmem:[%s13002_s3 + $0xef0] sm:$0xff]  ;;  %v8230_v42 = vcombine.low %v12280_v19, %v12285_v28  ;;  %v12341_v58 = vld [vmem:[%s13002_s3 + $0xef8] sm:$0xff] }
 0x2c6   :  { %v12307_v16 = vpack.c.bf16 %v6525_v12, %v6517_v0  ;;  %v12309_v23 = vpack.c.bf16 %v6524_v54, %v6516_v40  ;;  %6355 = vmatprep.mubr.bf16.mxu1 %v11013_v24  ;;  %6403 = vmatpush1.bf16.msra.mxu1 %v8216_v55  ;;  %v5084_v31 = vpop.f32.mrb[72].mxu0  ;;  %v12336_v55 = vld [vmem:[%s13002_s3 + $0xed8] sm:$0xff]  ;;  %v8239_v19 = vcombine.high %v12317_v44, %v12322_v5 }
 0x2c7   :  { %v12324_v62 = vpack.c.bf16 %v6526_v51, %v6518_v56  ;;  %v8603_v41 = vadd.f32 %v5084_v31, %v12145_v11  ;;  %v5536_v24 = vpop.f32.mrb[72].mxu1  ;;  %v5086_v38 = vpop.f32.mrb[73].mxu0  ;;  %6404 = vmatprep.subr.bf16.mxu1 %v8225_v15  ;;  %v8232_v12 = vcombine.low %v12295_v10, %v12300_v52  ;;  %v8238_v54 = vcombine.low %v12317_v44, %v12322_v5  ;;  %v12356_v56 = vld [vmem:[%s13002_s3 + $0xf10] sm:$0xff] }
 0x2c8   :  { %v8635_v61 = vadd.f32 %v5536_v24, %v12150_v32  ;;  %v8604_v1 = vadd.f32 %v5086_v38, %v12154_v35  ;;  %v5538_v2 = vpop.f32.mrb[73].mxu1  ;;  %5953 = vmatpush1.bf16.msra.mxu0 %v8222_v47  ;;  %v5088_v60 = vpop.f32.mrb[74].mxu0  ;;  %v12361_v51 = vld [vmem:[%s13002_s3 + $0xf30] sm:$0xff]  ;;  %v8241_v10 = vcombine.high %v12336_v55, %v12341_v58  ;;  %v12376_v38 = vld [vmem:[%s13002_s3 + $0xf38] sm:$0xff] }
 0x2c9   :  { %v8636_v9 = vadd.f32 %v5538_v2, %v12169_v53  ;;  %v8605_v39 = vadd.f32 %v5088_v60, %v12145_v11  ;;  %v5540_v15 = vpop.f32.mrb[74].mxu1  ;;  %v5090_v47 = vpop.f32.mrb[75].mxu0  ;;  %5954 = vmatprep.subr.bf16.mxu0 %v8231_v26  ;;  %v6531_v26 = vmax.f32 %v8603_v41, 0.0  ;;  %v12371_v41 = vld [vmem:[%s13002_s3 + $0xf18] sm:$0xff] }
 0x2ca   :  { %v8637_v28 = vadd.f32 %v5540_v15, %v12150_v32  ;;  %6405 = vmatpush1.bf16.msra.mxu1 %v8224_v43  ;;  %v8606_v0 = vadd.f32 %v5090_v47, %v12154_v35  ;;  %v5542_v40 = vpop.f32.mrb[75].mxu1  ;;  %v6533_v52 = vmax.f32 %v8635_v61, 0.0  ;;  %v6532_v44 = vmax.f32 %v8604_v1, 0.0  ;;  %v12393_v15 = vld [vmem:[%s13002_s3 + $0xf50] sm:$0xff] }
 0x2cb   :  { %v6539_v31 = vmax.f32 %v8605_v39, 0.0  ;;  %v8638_v43 = vadd.f32 %v5542_v40, %v12169_v53  ;;  %5904 = vmatmul.mubr.bf16.gmra.mrb[116].mxu0 %v10999_v50  ;;  %6406 = vmatprep.subr.bf16.mxu1 %v8233_v8  ;;  %v6534_v8 = vmax.f32 %v8636_v9, 0.0  ;;  %v8247_v1 = vcombine.high %v12356_v56, %v12361_v51 }
 0x2cc   :  { %v6541_v5 = vmax.f32 %v8637_v28, 0.0  ;;  %v6540_v24 = vmax.f32 %v8606_v0, 0.0  ;;  %5955 = vmatpush1.bf16.msra.mxu0 %v8230_v42  ;;  %5913 = vmatprep.mubr.bf16.mxu0 %v11081_v27  ;;  %v8240_v9 = vcombine.low %v12336_v55, %v12341_v58  ;;  %v8249_v55 = vcombine.high %v12371_v41, %v12376_v38 }
 0x2cd   :  { %v12378_v2 = vpack.c.bf16 %v6539_v31, %v6531_v26  ;;  %v6542_v61 = vmax.f32 %v8638_v43, 0.0  ;;  %6356 = vmatmul.mubr.bf16.gmra.mrb[116].mxu1 %v10999_v50  ;;  %5956 = vmatprep.subr.bf16.mxu0 %v8239_v19  ;;  %v12398_v50 = vld [vmem:[%s13002_s3 + $0xf70] sm:$0xff]  ;;  %v8246_v26 = vcombine.low %v12356_v56, %v12361_v51  ;;  %v12412_v31 = vld [vmem:[%s13002_s3 + $0xf58] sm:$0xff] }
 0x2ce   :  { %v12383_v60 = vpack.c.bf16 %v6541_v5, %v6533_v52  ;;  %v12385_v42 = vpack.c.bf16 %v6540_v24, %v6532_v44  ;;  %6365 = vmatprep.mubr.bf16.mxu1 %v11081_v27  ;;  %6407 = vmatpush1.bf16.msra.mxu1 %v8232_v12  ;;  %v5094_v39 = vpop.f32.mrb[76].mxu0  ;;  %v12417_v43 = vld [vmem:[%s13002_s3 + $0xf78] sm:$0xff]  ;;  %v8255_v56 = vcombine.high %v12393_v15, %v12398_v50 }
 0x2cf   :  { %v12400_v47 = vpack.c.bf16 %v6542_v61, %v6534_v8  ;;  %v8607_v19 = vadd.f32 %v5094_v39, %v12145_v11  ;;  %v5546_v27 = vpop.f32.mrb[76].mxu1  ;;  %v5096_v28 = vpop.f32.mrb[77].mxu0  ;;  %6408 = vmatprep.subr.bf16.mxu1 %v8241_v10  ;;  %v8248_v8 = vcombine.low %v12371_v41, %v12376_v38  ;;  %v8254_v61 = vcombine.low %v12393_v15, %v12398_v50  ;;  %v12432_v39 = vld [vmem:[%s13002_s3 + $0xf90] sm:$0xff] }
 0x2d0   :  { %v8639_v58 = vadd.f32 %v5546_v27, %v12150_v32  ;;  %v8608_v0 = vadd.f32 %v5096_v28, %v12154_v35  ;;  %v5548_v40 = vpop.f32.mrb[77].mxu1  ;;  %5957 = vmatpush1.bf16.msra.mxu0 %v8238_v54  ;;  %v5098_v12 = vpop.f32.mrb[78].mxu0  ;;  %v8257_v41 = vcombine.high %v12412_v31, %v12417_v43 }
 0x2d1   :  { %v8640_v10 = vadd.f32 %v5548_v40, %v12169_v53  ;;  %v8609_v52 = vadd.f32 %v5098_v12, %v12145_v11  ;;  %v5550_v44 = vpop.f32.mrb[78].mxu1  ;;  %v5100_v54 = vpop.f32.mrb[79].mxu0  ;;  %5958 = vmatprep.subr.bf16.mxu0 %v8247_v1  ;;  %v12437_v1 = vld [vmem:[%s13002_s3 + $0xfb0] sm:$0xff]  ;;  %v2080_v12 = vld [vmem:[%s13002_s3 + $0xfb8] sm:$0xff] }
 0x2d2   :  { %v8641_v51 = vadd.f32 %v5550_v44, %v12150_v32  ;;  %6409 = vmatpush1.bf16.msra.mxu1 %v8240_v9  ;;  %v8610_v5 = vadd.f32 %v5100_v54, %v12154_v35  ;;  %v5552_v24 = vpop.f32.mrb[79].mxu1  ;;  %v6547_v9 = vmax.f32 %v8607_v19, 0.0  ;;  %v6549_v38 = vmax.f32 %v8639_v58, 0.0  ;;  %v2076_v19 = vld [vmem:[%s13002_s3 + $0xf98] sm:$0xff] }
 0x2d3   :  { %v6555_v27 = vmax.f32 %v8609_v52, 0.0  ;;  %v8642_v28 = vadd.f32 %v5552_v24, %v12169_v53  ;;  %5914 = vmatmul.mubr.bf16.gmra.mrb[120].mxu0 %v11067_v46  ;;  %6410 = vmatprep.subr.bf16.mxu1 %v8249_v55  ;;  %v6548_v15 = vmax.f32 %v8608_v0, 0.0  ;;  %v6550_v52 = vmax.f32 %v8640_v10, 0.0 }
 0x2d4   :  { %v6557_v50 = vmax.f32 %v8641_v51, 0.0  ;;  %v6556_v40 = vmax.f32 %v8610_v5, 0.0  ;;  %5959 = vmatpush1.bf16.msra.mxu0 %v8246_v26  ;;  %5923 = vmatprep.mubr.bf16.mxu0 %v11128_v4  ;;  %v8263_v58 = vcombine.high %v12432_v39, %v12437_v1  ;;  %v8256_v10 = vcombine.low %v12412_v31, %v12417_v43  ;;  %v2083_v51 = vld [vmem:[%s13002_s3 + $0xfd0] sm:$0xff] }
 0x2d5   :  { %v12450_v55 = vpack.c.bf16 %v6555_v27, %v6547_v9  ;;  %v6558_v44 = vmax.f32 %v8642_v28, 0.0  ;;  %6366 = vmatmul.mubr.bf16.gmra.mrb[120].mxu1 %v11067_v46  ;;  %5960 = vmatprep.subr.bf16.mxu0 %v8255_v56  ;;  %v2087_v46 = vld [vmem:[%s13002_s3 + $0xff0] sm:$0xff]  ;;  %v8262_v28 = vcombine.low %v12432_v39, %v12437_v1 }
 0x2d6   :  { %v12455_v0 = vpack.c.bf16 %v6557_v50, %v6549_v38  ;;  %v12457_v26 = vpack.c.bf16 %v6556_v40, %v6548_v15  ;;  %6375 = vmatprep.mubr.bf16.mxu1 %v11128_v4  ;;  %6411 = vmatpush1.bf16.msra.mxu1 %v8248_v8  ;;  %v5104_v54 = vpop.f32.mrb[80].mxu0  ;;  %v8265_v4 = vcombine.high %v2076_v19, %v2080_v12  ;;  %v2084_v38 = vld [vmem:[%s13002_s3 + $0xfd8] sm:$0xff] }
 0x2d7   :  { %13125 = vst [vmem:[#allocation8_spill] sm:$0xff] %v12450_v55  ;;  %v12468_v56 = vpack.c.bf16 %v6558_v44, %v6550_v52  ;;  %v8611_v5 = vadd.f32 %v5104_v54, %v12145_v11  ;;  %v5556_v24 = vpop.f32.mrb[80].mxu1  ;;  %v5106_v9 = vpop.f32.mrb[81].mxu0  ;;  %6412 = vmatprep.subr.bf16.mxu1 %v8257_v41  ;;  %v2088_v15 = vld [vmem:[%s13002_s3 + $0xff8] sm:$0xff]  ;;  %v8264_v54 = vcombine.low %v2076_v19, %v2080_v12  ;;  %v9131_v12 = vld [vmem:[%s13004_s5 + $0x40] sm:$0xff]  }
 0x2d8   :  { %13126 = vst [vmem:[#allocation7_spill] sm:$0xff] %v12455_v0  ;;  %v8643_v8 = vadd.f32 %v5556_v24, %v12150_v32  ;;  %v8612_v31 = vadd.f32 %v5106_v9, %v12154_v35  ;;  %v5558_v43 = vpop.f32.mrb[81].mxu1  ;;  %5961 = vmatpush1.bf16.msra.mxu0 %v8254_v61  ;;  %v5108_v27 = vpop.f32.mrb[82].mxu0  ;;  %v8271_v61 = vcombine.high %v2083_v51, %v2087_v46 }
 0x2d9   :  { %13127 = vst [vmem:[#allocation12_spill] sm:$0xff] %v12468_v56  ;;  %v8644_v41 = vadd.f32 %v5558_v43, %v12169_v53  ;;  %v8613_v50 = vadd.f32 %v5108_v27, %v12145_v11  ;;  %v5560_v40 = vpop.f32.mrb[82].mxu1  ;;  %v5110_v52 = vpop.f32.mrb[83].mxu0  ;;  %5962 = vmatprep.subr.bf16.mxu0 %v8263_v58  ;;  %v8270_v24 = vcombine.low %v2083_v51, %v2087_v46  ;;  %v6563_v9 = vmax.f32 %v8611_v5, 0.0 }
 0x2da   :  { %v8645_v44 = vadd.f32 %v5560_v40, %v12150_v32  ;;  %6413 = vmatpush1.bf16.msra.mxu1 %v8256_v10  ;;  %v8614_v39 = vadd.f32 %v5110_v52, %v12154_v35  ;;  %v5562_v1 = vpop.f32.mrb[83].mxu1  ;;  %v8273_v43 = vcombine.high %v2084_v38, %v2088_v15  ;;  %v6565_v27 = vmax.f32 %v8643_v8, 0.0 }
 0x2db   :  { %v6571_v59 = vmax.f32 %v8613_v50, 0.0  ;;  %v8646_v0 = vadd.f32 %v5562_v1, %v12169_v53  ;;  %5924 = vmatmul.mubr.bf16.gmra.mrb[124].mxu0 %v11123_v49  ;;  %6414 = vmatprep.subr.bf16.mxu1 %v8265_v4  ;;  %v6564_v55 = vmax.f32 %v8612_v31, 0.0  ;;  %v6566_v10 = vmax.f32 %v8644_v41, 0.0  ;;  %v9132_v31 = vld [vmem:[%s13004_s5 + $0xc0] sm:$0xff]  }
 0x2dc   :  { %v6573_v58 = vmax.f32 %v8645_v44, 0.0  ;;  %v6572_v56 = vmax.f32 %v8614_v39, 0.0  ;;  %5963 = vmatpush1.bf16.msra.mxu0 %v8262_v28  ;;  %5966 = vmatprep.mubr.bf16.mxu0 %v10761_v6  ;;  %v8272_v4 = vcombine.low %v2084_v38, %v2088_v15  ;;  %v9133_v38 = vld [vmem:[%s13004_s5] sm:$0xff]  }
 0x2dd   :  { %v12488_v40 = vpack.c.bf16 %v6571_v59, %v6563_v9  ;;  %v6574_v19 = vmax.f32 %v8646_v0, 0.0  ;;  %6376 = vmatmul.mubr.bf16.gmra.mrb[124].mxu1 %v11123_v49  ;;  %5964 = vmatprep.subr.bf16.mxu0 %v8271_v61  ;;  %v9135_v61 = vld [vmem:[%s13004_s5 + $0x48] sm:$0xff]  }
 0x2de   :  { %v12494_v51 = vpack.c.bf16 %v6573_v58, %v6565_v27  ;;  %v12496_v46 = vpack.c.bf16 %v6572_v56, %v6564_v55  ;;  %6415 = vmatpush1.bf16.msra.mxu1 %v8264_v54  ;;  %6418 = vmatprep.mubr.bf16.mxu1 %v10761_v6  ;;  %v5114_v5 = vpop.f32.mrb[84].mxu0  ;;  %v9134_v54 = vld [vmem:[%s13004_s5 + $0x80] sm:$0xff]   ;;  %v9136_v27 = vld [vmem:[%s13004_s5 + $0xc8] sm:$0xff]  }
 0x2df   :  { %v12499_v8 = vpack.c.bf16 %v6574_v19, %v6566_v10  ;;  %v8615_v59 = vadd.f32 %v5114_v5, %v12145_v11  ;;  %v5566_v0 = vpop.f32.mrb[84].mxu1  ;;  %v5116_v49 = vpop.f32.mrb[85].mxu0  ;;  %6416 = vmatprep.subr.bf16.mxu1 %v8273_v43  ;;  %v9137_v5 = vld [vmem:[%s13004_s5 + $0x8] sm:$0xff]  }
 0x2e0   :  { %v8647_v28 = vadd.f32 %v5566_v0, %v12150_v32  ;;  %v8616_v55 = vadd.f32 %v5116_v49, %v12154_v35  ;;  %v5568_v56 = vpop.f32.mrb[85].mxu1  ;;  %5965 = vmatpush1.bf16.msra.mxu0 %v8270_v24  ;;  %v5118_v6 = vpop.f32.mrb[86].mxu0  ;;  %v9139_v49 = vld [vmem:[%s13004_s5 + $0x50] sm:$0xff]  }
 0x2e1   :  { %v8648_v15 = vadd.f32 %v5568_v56, %v12169_v53  ;;  %v8617_v41 = vadd.f32 %v5118_v6, %v12145_v11  ;;  %v5570_v50 = vpop.f32.mrb[86].mxu1  ;;  %v5120_v52 = vpop.f32.mrb[87].mxu0  ;;  %8339 = vmatprep.subr.bf16.mxu0 %v9131_v12  ;;  %v6579_v24 = vmax.f32 %v8615_v59, 0.0  ;;  %v9138_v56 = vld [vmem:[%s13004_s5 + $0x88] sm:$0xff]  }
 0x2e2   :  { %v8649_v44 = vadd.f32 %v5570_v50, %v12150_v32  ;;  %6417 = vmatpush1.bf16.msra.mxu1 %v8272_v4  ;;  %v8618_v39 = vadd.f32 %v5120_v52, %v12154_v35  ;;  %v5572_v1 = vpop.f32.mrb[87].mxu1  ;;  %v6581_v58 = vmax.f32 %v8647_v28, 0.0  ;;  %v6580_v10 = vmax.f32 %v8616_v55, 0.0 }
 0x2e3   :  { %v6587_v9 = vmax.f32 %v8617_v41, 0.0  ;;  %v8650_v43 = vadd.f32 %v5572_v1, %v12169_v53  ;;  %5967 = vmatmul.mubr.bf16.vlgmr.msra.gmra.mrb[96].mxu0 %v10756_v14  ;;  %8403 = vmatprep.subr.bf16.mxu1 %v9132_v31  ;;  %v6582_v4 = vmax.f32 %v8648_v15, 0.0  ;;  %v9140_v41 = vld [vmem:[%s13004_s5 + $0xd0] sm:$0xff]  }
 0x2e4   :  { %v6589_v19 = vmax.f32 %v8649_v44, 0.0  ;;  %v6588_v12 = vmax.f32 %v8618_v39, 0.0  ;;  %5976 = vmatprep.mubr.bf16.mxu0 %v10829_v17  ;;  %8340 = vmatpush3.bf16.msra.mxu0 %v9133_v38  ;;  %v9141_v44 = vld [vmem:[%s13004_s5 + $0x10] sm:$0xff]  }
 0x2e5   :  { %v12529_v59 = vpack.c.bf16 %v6587_v9, %v6579_v24  ;;  %v6590_v0 = vmax.f32 %v8650_v43, 0.0  ;;  %6419 = vmatmul.mubr.bf16.vlgmr.msra.gmra.mrb[96].mxu1 %v10756_v14  ;;  %8341 = vmatprep.subr.bf16.mxu0 %v9135_v61  ;;  %v9143_v9 = vld [vmem:[%s13004_s5 + $0x58] sm:$0xff]  }
 0x2e6   :  { %v12535_v31 = vpack.c.bf16 %v6589_v19, %v6581_v58  ;;  %v12537_v28 = vpack.c.bf16 %v6588_v12, %v6580_v10  ;;  %6428 = vmatprep.mubr.bf16.mxu1 %v10829_v17  ;;  %v5124_v55 = vpop.f32.mrb[88].mxu0  ;;  %8404 = vmatpush3.bf16.msra.mxu1 %v9134_v54  ;;  %v9142_v10 = vld [vmem:[%s13004_s5 + $0x90] sm:$0xff]  }
 0x2e7   :  { %v12543_v6 = vpack.c.bf16 %v6590_v0, %v6582_v4  ;;  %v8619_v14 = vadd.f32 %v5124_v55, %v12145_v11  ;;  %v5576_v38 = vpop.f32.mrb[88].mxu1  ;;  %v5126_v15 = vpop.f32.mrb[89].mxu0  ;;  %8405 = vmatprep.subr.bf16.mxu1 %v9136_v27  ;;  %v9144_v4 = vld [vmem:[%s13004_s5 + $0xd8] sm:$0xff]  }
 0x2e8   :  { %v8651_v50 = vadd.f32 %v5576_v38, %v12150_v32  ;;  %v8620_v17 = vadd.f32 %v5126_v15, %v12154_v35  ;;  %v5578_v52 = vpop.f32.mrb[89].mxu1  ;;  %v5128_v61 = vpop.f32.mrb[90].mxu0  ;;  %8342 = vmatpush3.bf16.msra.mxu0 %v9137_v5 }
 0x2e9   :  { %v8652_v39 = vadd.f32 %v5578_v52, %v12169_v53  ;;  %v8621_v1 = vadd.f32 %v5128_v61, %v12145_v11  ;;  %v5580_v54 = vpop.f32.mrb[90].mxu1  ;;  %v5130_v24 = vpop.f32.mrb[91].mxu0  ;;  %8343 = vmatprep.subr.bf16.mxu0 %v9139_v49  ;;  %v6595_v19 = vmax.f32 %v8619_v14, 0.0 }
 0x2ea   :  { %v8653_v43 = vadd.f32 %v5580_v54, %v12150_v32  ;;  %v8622_v27 = vadd.f32 %v5130_v24, %v12154_v35  ;;  %v5582_v58 = vpop.f32.mrb[91].mxu1  ;;  %8406 = vmatpush3.bf16.msra.mxu1 %v9138_v56  ;;  %v6597_v0 = vmax.f32 %v8651_v50, 0.0  ;;  %v6596_v49 = vmax.f32 %v8620_v17, 0.0  ;;  %v9145_v56 = vld [vmem:[%s13004_s5 + $0x18] sm:$0xff]   ;;  %v9148_v24 = vld [vmem:[%s13004_s5 + $0xe0] sm:$0xff]  }
 0x2eb   :  { %v6603_v12 = vmax.f32 %v8621_v1, 0.0  ;;  %v8654_v5 = vadd.f32 %v5582_v58, %v12169_v53  ;;  %5977 = vmatmul.mubr.bf16.gmra.mrb[100].mxu0 %v10824_v57  ;;  %8407 = vmatprep.subr.bf16.mxu1 %v9140_v41  ;;  %v6598_v14 = vmax.f32 %v8652_v39, 0.0  ;;  %v9147_v41 = vld [vmem:[%s13004_s5 + $0x60] sm:$0xff]  }
 0x2ec   :  { %v6605_v55 = vmax.f32 %v8653_v43, 0.0  ;;  %v6604_v38 = vmax.f32 %v8622_v27, 0.0  ;;  %5986 = vmatprep.mubr.bf16.mxu0 %v10897_v22  ;;  %8344 = vmatpush3.bf16.msra.mxu0 %v9141_v44  ;;  %v9146_v44 = vld [vmem:[%s13004_s5 + $0x98] sm:$0xff]   ;;  %v9149_v58 = vld [vmem:[%s13004_s5 + $0x20] sm:$0xff]  }
 0x2ed   :  { %v12573_v15 = vpack.c.bf16 %v6603_v12, %v6595_v19  ;;  %v6606_v52 = vmax.f32 %v8654_v5, 0.0  ;;  %6429 = vmatmul.mubr.bf16.gmra.mrb[100].mxu1 %v10824_v57  ;;  %8345 = vmatprep.subr.bf16.mxu0 %v9143_v9 }
 0x2ee   :  { %v12579_v50 = vpack.c.bf16 %v6605_v55, %v6597_v0  ;;  %v12581_v17 = vpack.c.bf16 %v6604_v38, %v6596_v49  ;;  %6438 = vmatprep.mubr.bf16.mxu1 %v10897_v22  ;;  %v5134_v61 = vpop.f32.mrb[92].mxu0  ;;  %8408 = vmatpush3.bf16.msra.mxu1 %v9142_v10  ;;  %v9150_v38 = vld [vmem:[%s13004_s5 + $0xa0] sm:$0xff]  }
 0x2ef   :  { %v12587_v39 = vpack.c.bf16 %v6606_v52, %v6598_v14  ;;  %v8623_v57 = vadd.f32 %v5134_v61, %v12145_v11  ;;  %v5586_v1 = vpop.f32.mrb[92].mxu1  ;;  %v5136_v54 = vpop.f32.mrb[93].mxu0  ;;  %8409 = vmatprep.subr.bf16.mxu1 %v9144_v4  ;;  %v9151_v4 = vld [vmem:[%s13004_s5 + $0x68] sm:$0xff]  }
 0x2f0   :  { %v8655_v9 = vadd.f32 %v5586_v1, %v12150_v32  ;;  %v8624_v22 = vadd.f32 %v5136_v54, %v12154_v35  ;;  %v5588_v43 = vpop.f32.mrb[93].mxu1  ;;  %v5138_v27 = vpop.f32.mrb[94].mxu0  ;;  %8346 = vmatpush3.bf16.msra.mxu0 %v9145_v56  ;;  %v9152_v52 = vld [vmem:[%s13004_s5 + $0xe8] sm:$0xff]   ;;  %v9155_v54 = vld [vmem:[%s13004_s5 + $0x70] sm:$0xff]  }
 0x2f1   :  { %v8656_v10 = vadd.f32 %v5588_v43, %v12169_v53  ;;  %v8625_v19 = vadd.f32 %v5138_v27, %v12145_v11  ;;  %v5590_v12 = vpop.f32.mrb[94].mxu1  ;;  %v5140_v5 = vpop.f32.mrb[95].mxu0  ;;  %8347 = vmatprep.subr.bf16.mxu0 %v9147_v41  ;;  %v6611_v56 = vmax.f32 %v8623_v57, 0.0  ;;  %v9157_v27 = vld [vmem:[%s13004_s5 + $0x30] sm:$0xff]  }
 0x2f2   :  { %v8657_v0 = vadd.f32 %v5590_v12, %v12150_v32  ;;  %v8626_v49 = vadd.f32 %v5140_v5, %v12154_v35  ;;  %v5592_v55 = vpop.f32.mrb[95].mxu1  ;;  %8410 = vmatpush3.bf16.msra.mxu1 %v9146_v44  ;;  %v6613_v32 = vmax.f32 %v8655_v9, 0.0  ;;  %v6612_v41 = vmax.f32 %v8624_v22, 0.0  ;;  %v9153_v44 = vld [vmem:[%s13004_s5 + $0x28] sm:$0xff]   ;;  %v9163_v12 = vld [vmem:[%s13004_s5 + $0x140] sm:$0xff]   ;;  %v9162_v5 = vld [vmem:[%s13004_s5 + $0xb8] sm:$0xff]  }
 0x2f3   :  { %v6619_v14 = vmax.f32 %v8625_v19, 0.0  ;;  %v8658_v11 = vadd.f32 %v5592_v55, %v12169_v53  ;;  %5987 = vmatmul.mubr.bf16.gmra.mrb[104].mxu0 %v10892_v29  ;;  %8411 = vmatprep.subr.bf16.mxu1 %v9148_v24  ;;  %v6614_v57 = vmax.f32 %v8656_v10, 0.0  ;;  %v9154_v22 = vld [vmem:[%s13004_s5 + $0xa8] sm:$0xff]   ;;  %v9160_v10 = vld [vmem:[%s13004_s5 + $0xf8] sm:$0xff]   ;;  %v9187_v55 = vld [vmem:[%s13004_s5 + $0x170] sm:$0xff]  }
 0x2f4   :  { %v6621_v35 = vmax.f32 %v8657_v0, 0.0  ;;  %v6620_v61 = vmax.f32 %v8626_v49, 0.0  ;;  %5996 = vmatprep.mubr.bf16.mxu0 %v10965_v37  ;;  %8348 = vmatpush3.bf16.msra.mxu0 %v9149_v58  ;;  %v9158_v58 = vld [vmem:[%s13004_s5 + $0xb0] sm:$0xff]   ;;  %v9161_v19 = vld [vmem:[%s13004_s5 + $0x38] sm:$0xff]   ;;  %v9185_v0 = vld [vmem:[%s13004_s5 + $0x1e8] sm:$0xff]  }
 0x2f5   :  { %v12617_v53 = vpack.c.bf16 %v6619_v14, %v6611_v56  ;;  %v6622_v1 = vmax.f32 %v8658_v11, 0.0  ;;  %6439 = vmatmul.mubr.bf16.gmra.mrb[104].mxu1 %v10892_v29  ;;  %8349 = vmatprep.subr.bf16.mxu0 %v9151_v4  ;;  %v9156_v29 = vld [vmem:[%s13004_s5 + $0xf0] sm:$0xff]   ;;  %v9165_v4 = vld [vmem:[%s13004_s5 + $0x1c0] sm:$0xff]   ;;  %v9184_v49 = vld [vmem:[%s13004_s5 + $0x128] sm:$0xff]  }
 0x2f6   :  { %v12623_v24 = vpack.c.bf16 %v6621_v35, %v6613_v32  ;;  %v12625_v9 = vpack.c.bf16 %v6620_v61, %v6612_v41  ;;  %6448 = vmatprep.mubr.bf16.mxu1 %v10965_v37  ;;  %8412 = vmatpush3.bf16.msra.mxu1 %v9150_v38  ;;  %v9159_v37 = vld [vmem:[%s13004_s5 + $0x78] sm:$0xff]   ;;  %v9186_v38 = vld [vmem:[%s13004_s5 + $0x1a8] sm:$0xff]   ;;  %v9190_v56 = vld [vmem:[%s13004_s5 + $0x1b0] sm:$0xff]  }
 0x2f7   :  { %v12631_v43 = vpack.c.bf16 %v6622_v1, %v6614_v57  ;;  %8413 = vmatprep.subr.bf16.mxu1 %v9152_v52  ;;  %v13129_v14 = vld [vmem:[#allocation8_spill] sm:$0xff]  ;;  %v13130_v11 = vld [vmem:[#allocation7_spill] sm:$0xff]  ;;  %v9191_v52 = vld [vmem:[%s13004_s5 + $0x178] sm:$0xff]  }
 0x2f8   :  { %8350 = vmatpush3.bf16.msra.mxu0 %v9153_v44  ;;  %v9193_v32 = vld [vmem:[%s13004_s5 + $0x1f8] sm:$0xff]  }
 0x2f9   :  { %8351 = vmatprep.subr.bf16.mxu0 %v9155_v54  ;;  %v9192_v41 = vld [vmem:[%s13004_s5 + $0x138] sm:$0xff]  }
 0x2fa   :  { %8414 = vmatpush3.bf16.msra.mxu1 %v9154_v22 }
 0x2fb   :  { %5997 = vmatmul.mubr.bf16.gmra.mrb[108].mxu0 %v10960_v25  ;;  %8415 = vmatprep.subr.bf16.mxu1 %v9156_v29 }
 0x2fc   :  { %6006 = vmatprep.mubr.bf16.mxu0 %v11033_v36  ;;  %8352 = vmatpush3.bf16.msra.mxu0 %v9157_v27 }
 0x2fd   :  { %6449 = vmatmul.mubr.bf16.gmra.mrb[108].mxu1 %v10960_v25  ;;  %8353 = vmatprep.subr.bf16.mxu0 %v9159_v37  ;;  %v9164_v25 = vld [vmem:[%s13004_s5 + $0x100] sm:$0xff]  }
 0x2fe   :  { %6458 = vmatprep.mubr.bf16.mxu1 %v11033_v36  ;;  %8416 = vmatpush3.bf16.msra.mxu1 %v9158_v58  ;;  %v9166_v36 = vld [vmem:[%s13004_s5 + $0x180] sm:$0xff]  }
 0x2ff   :  { %8417 = vmatprep.subr.bf16.mxu1 %v9160_v10 }
 0x300   :  { %8354 = vmatpush3.bf16.msra.mxu0 %v9161_v19 }
 0x301   :  { %8467 = vmatprep.subr.bf16.mxu0 %v9163_v12 }
 0x302   :  { %8418 = vmatpush3.bf16.msra.mxu1 %v9162_v5 }
 0x303   :  { %6007 = vmatmul.mubr.bf16.gmra.mrb[112].mxu0 %v11028_v21  ;;  %8531 = vmatprep.subr.bf16.mxu1 %v9165_v4 }
 0x304   :  { %6016 = vmatprep.mubr.bf16.mxu0 %v11097_v45 }
 0x305   :  { %6459 = vmatmul.mubr.bf16.gmra.mrb[112].mxu1 %v11028_v21  ;;  %v9167_v21 = vld [vmem:[%s13004_s5 + $0x148] sm:$0xff]  }
 0x306   :  { %6468 = vmatprep.mubr.bf16.mxu1 %v11097_v45  ;;  %v9168_v45 = vld [vmem:[%s13004_s5 + $0x108] sm:$0xff]  }
 0x30b   :  { %6017 = vmatmul.mubr.bf16.gmra.mrb[116].mxu0 %v11092_v30 }
 0x30c   :  { %6026 = vmatprep.mubr.bf16.mxu0 %v11143_v7 }
 0x30d   :  { %6469 = vmatmul.mubr.bf16.gmra.mrb[116].mxu1 %v11092_v30  ;;  %v9169_v30 = vld [vmem:[%s13004_s5 + $0x1c8] sm:$0xff]  }
 0x30e   :  { %6478 = vmatprep.mubr.bf16.mxu1 %v11143_v7  ;;  %v9170_v7 = vld [vmem:[%s13004_s5 + $0x188] sm:$0xff]  }
 0x313   :  { %6027 = vmatmul.mubr.bf16.gmra.mrb[120].mxu0 %v11139_v20 }
 0x314   :  { %6036 = vmatprep.mubr.bf16.mxu0 %v11179_v48 }
 0x315   :  { %6479 = vmatmul.mubr.bf16.gmra.mrb[120].mxu1 %v11139_v20  ;;  %v9171_v20 = vld [vmem:[%s13004_s5 + $0x150] sm:$0xff]  }
 0x316   :  { %6488 = vmatprep.mubr.bf16.mxu1 %v11179_v48  ;;  %v9172_v48 = vld [vmem:[%s13004_s5 + $0x110] sm:$0xff]  }
 0x31b   :  { %6037 = vmatmul.mubr.bf16.gmra.mrb[124].mxu0 %v11175_v33 }
 0x31c   :  { %7242 = vmatprep.mubr.bf16.mxu0 %v12233_v34  ;;  %v9177_v34 = vld [vmem:[%s13004_s5 + $0x1d8] sm:$0xff]  }
 0x31d   :  { %6489 = vmatmul.mubr.bf16.gmra.mrb[124].mxu1 %v11175_v33  ;;  %v9173_v33 = vld [vmem:[%s13004_s5 + $0x1d0] sm:$0xff]  }
 0x31e   :  { %7339 = vmatprep.mubr.bf16.mxu1 %v12248_v63  ;;  %v9176_v63 = vld [vmem:[%s13004_s5 + $0x118] sm:$0xff]  }
 0x323   :  { %7243 = vmatmul.mubr.bf16.vlgmr.msra.gmra.mrb[128].mxu0 %v12226_v3  ;;  %v9175_v3 = vld [vmem:[%s13004_s5 + $0x158] sm:$0xff]  }
 0x324   :  { %7250 = vmatprep.mubr.bf16.mxu0 %v12309_v23  ;;  %8468 = vmatpush3.bf16.msra.mxu0 %v9164_v25  ;;  %v9179_v23 = vld [vmem:[%s13004_s5 + $0x160] sm:$0xff]  }
 0x325   :  { %7340 = vmatmul.mubr.bf16.vlgmr.msra.gmra.mrb[128].mxu1 %v12231_v18  ;;  %8469 = vmatprep.subr.bf16.mxu0 %v9167_v21  ;;  %v9174_v18 = vld [vmem:[%s13004_s5 + $0x190] sm:$0xff]  }
 0x326   :  { %7347 = vmatprep.mubr.bf16.mxu1 %v12324_v62  ;;  %8532 = vmatpush3.bf16.msra.mxu1 %v9166_v36  ;;  %v9181_v62 = vld [vmem:[%s13004_s5 + $0x1e0] sm:$0xff]  }
 0x327   :  { %8533 = vmatprep.subr.bf16.mxu1 %v9169_v30 }
 0x328   :  { %8470 = vmatpush3.bf16.msra.mxu0 %v9168_v45 }
 0x329   :  { %8471 = vmatprep.subr.bf16.mxu0 %v9171_v20 }
 0x32a   :  { %8534 = vmatpush3.bf16.msra.mxu1 %v9170_v7 }
 0x32b   :  { %7251 = vmatmul.mubr.bf16.gmra.mrb[132].mxu0 %v12302_v13  ;;  %8535 = vmatprep.subr.bf16.mxu1 %v9173_v33  ;;  %v9178_v13 = vld [vmem:[%s13004_s5 + $0x198] sm:$0xff]  }
 0x32c   :  { %7258 = vmatprep.mubr.bf16.mxu0 %v12385_v42  ;;  %8472 = vmatpush3.bf16.msra.mxu0 %v9172_v48  ;;  %v9183_v42 = vld [vmem:[%s13004_s5 + $0x168] sm:$0xff]  }
 0x32d   :  { %7348 = vmatmul.mubr.bf16.gmra.mrb[132].mxu1 %v12307_v16  ;;  %8473 = vmatprep.subr.bf16.mxu0 %v9175_v3  ;;  %v9180_v16 = vld [vmem:[%s13004_s5 + $0x120] sm:$0xff]  }
 0x32e   :  { %7355 = vmatprep.mubr.bf16.mxu1 %v12400_v47  ;;  %8536 = vmatpush3.bf16.msra.mxu1 %v9174_v18  ;;  %v9182_v47 = vld [vmem:[%s13004_s5 + $0x1a0] sm:$0xff]  }
 0x32f   :  { %8537 = vmatprep.subr.bf16.mxu1 %v9177_v34 }
 0x330   :  { %8474 = vmatpush3.bf16.msra.mxu0 %v9176_v63 }
 0x331   :  { %8475 = vmatprep.subr.bf16.mxu0 %v9179_v23 }
 0x332   :  { %8538 = vmatpush3.bf16.msra.mxu1 %v9178_v13 }
 0x333   :  { %7259 = vmatmul.mubr.bf16.gmra.mrb[136].mxu0 %v12378_v2  ;;  %8539 = vmatprep.subr.bf16.mxu1 %v9181_v62  ;;  %v13128_v2 = vld [vmem:[#allocation12_spill] sm:$0xff] }
 0x334   :  { %7266 = vmatprep.mubr.bf16.mxu0 %v12457_v26  ;;  %8476 = vmatpush3.bf16.msra.mxu0 %v9180_v16  ;;  %v9189_v26 = vld [vmem:[%s13004_s5 + $0x1f0] sm:$0xff]  }
 0x335   :  { %7356 = vmatmul.mubr.bf16.gmra.mrb[136].mxu1 %v12383_v60  ;;  %8477 = vmatprep.subr.bf16.mxu0 %v9183_v42  ;;  %v9188_v60 = vld [vmem:[%s13004_s5 + $0x130] sm:$0xff]  }
 0x336   :  { %7363 = vmatprep.mubr.bf16.mxu1 %v13128_v2  ;;  %8540 = vmatpush3.bf16.msra.mxu1 %v9182_v47 }
 0x337   :  { %8541 = vmatprep.subr.bf16.mxu1 %v9185_v0 }
 0x338   :  { %8478 = vmatpush3.bf16.msra.mxu0 %v9184_v49 }
 0x339   :  { %8479 = vmatprep.subr.bf16.mxu0 %v9187_v55 }
 0x33a   :  { %8542 = vmatpush3.bf16.msra.mxu1 %v9186_v38 }
 0x33b   :  { %7267 = vmatmul.mubr.bf16.gmra.mrb[140].mxu0 %v13129_v14  ;;  %8543 = vmatprep.subr.bf16.mxu1 %v9189_v26 }
 0x33c   :  { %7274 = vmatprep.mubr.bf16.mxu0 %v12496_v46  ;;  %8480 = vmatpush3.bf16.msra.mxu0 %v9188_v60  ;;  %v9194_v46 = vld [vmem:[%s13004_s5 + $0x1b8] sm:$0xff]  }
 0x33d   :  { %7364 = vmatmul.mubr.bf16.gmra.mrb[140].mxu1 %v13130_v11  ;;  %8481 = vmatprep.subr.bf16.mxu0 %v9191_v52 }
 0x33e   :  { %7371 = vmatprep.mubr.bf16.mxu1 %v12499_v8  ;;  %8544 = vmatpush3.bf16.msra.mxu1 %v9190_v56 }
 0x33f   :  { %8545 = vmatprep.subr.bf16.mxu1 %v9193_v32 }
 0x340   :  { %8482 = vmatpush3.bf16.msra.mxu0 %v9192_v41 }
 0x342   :  { %8546 = vmatpush3.bf16.msra.mxu1 %v9194_v46 }
 0x343   :  { %7275 = vmatmul.mubr.bf16.gmra.mrb[144].mxu0 %v12488_v40  ;;  %v9195_v40 = vld [vmem:[%s13005_s4] sm:$0xff] }
 0x344   :  { %7282 = vmatprep.mubr.bf16.mxu0 %v12537_v28 }
 0x345   :  { %7372 = vmatmul.mubr.bf16.gmra.mrb[144].mxu1 %v12494_v51  ;;  %v13131_v51 = vld [vmem:[#allocation2_spill] sm:$0xff] }
 0x346   :  { %7379 = vmatprep.mubr.bf16.mxu1 %v12543_v6  ;;  %v13132_v8 = vsub.s32 4, %v13131_v51  ;;  %v13134_v6 = vsub.s32 6, %v13131_v51 }
 0x34b   :  { %7283 = vmatmul.mubr.bf16.gmra.mrb[148].mxu0 %v12529_v59  ;;  %v12805_v59 = vrot.slane %v9195_v40, %v13132_v8 }
 0x34c   :  { %7290 = vmatprep.mubr.bf16.mxu0 %v12581_v17  ;;  %v13135_v17 = vsub.s32 7, %v13131_v51 }
 0x34d   :  { %7380 = vmatmul.mubr.bf16.gmra.mrb[148].mxu1 %v12535_v31  ;;  %v13133_v31 = vsub.s32 5, %v13131_v51 }
 0x34e   :  { %7387 = vmatprep.mubr.bf16.mxu1 %v12587_v39  ;;  %v12817_v39 = vrot.slane %v9195_v40, %v13135_v17 }
 0x34f   :  { %v12809_v28 = vrot.slane %v9195_v40, %v13133_v31 }
 0x353   :  { %7291 = vmatmul.mubr.bf16.gmra.mrb[152].mxu0 %v12573_v15  ;;  %v12813_v15 = vrot.slane %v9195_v40, %v13134_v6 }
 0x354   :  { %7298 = vmatprep.mubr.bf16.mxu0 %v12625_v9 }
 0x355   :  { %7388 = vmatmul.mubr.bf16.gmra.mrb[152].mxu1 %v12579_v50 }
 0x356   :  { %7395 = vmatprep.mubr.bf16.mxu1 %v12631_v43 }
 0x35b   :  { %7299 = vmatmul.mubr.bf16.gmra.mrb[156].mxu0 %v12617_v53 }
 0x35d   :  { %7396 = vmatmul.mubr.bf16.gmra.mrb[156].mxu1 %v12623_v24 }
 0x3b6   :  { %v5968_v50 = vpop.f32.mrb[96].mxu0 }
 0x3b7   :  { %v8659_v35 = vadd.f32 %v5968_v50, %v12805_v59  ;;  %v5970_v61 = vpop.f32.mrb[97].mxu0 }
 0x3b8   :  { %v6420_v44 = vpop.f32.mrb[96].mxu1  ;;  %v8660_v57 = vadd.f32 %v5970_v61, %v12809_v28  ;;  %v5972_v53 = vpop.f32.mrb[98].mxu0 }
 0x3b9   :  { %v8691_v1 = vadd.f32 %v6420_v44, %v12813_v15  ;;  %v6422_v54 = vpop.f32.mrb[97].mxu1  ;;  %v8661_v24 = vadd.f32 %v5972_v53, %v12805_v59  ;;  %v5974_v9 = vpop.f32.mrb[99].mxu0  ;;  %v6503_v27 = vmax.f32 %v8659_v35, 0.0 }
 0x3ba   :  { %v8692_v22 = vadd.f32 %v6422_v54, %v12817_v39  ;;  %v6424_v43 = vpop.f32.mrb[98].mxu1  ;;  %v8662_v29 = vadd.f32 %v5974_v9, %v12809_v28  ;;  %v6504_v19 = vmax.f32 %v8660_v57, 0.0 }
 0x3bb   :  { %v6511_v37 = vmax.f32 %v8661_v24, 0.0  ;;  %v8693_v58 = vadd.f32 %v6424_v43, %v12813_v15  ;;  %v6426_v10 = vpop.f32.mrb[99].mxu1  ;;  %v6505_v4 = vmax.f32 %v8691_v1, 0.0 }
 0x3bc   :  { %v6512_v12 = vmax.f32 %v8662_v29, 0.0  ;;  %v8694_v5 = vadd.f32 %v6426_v10, %v12817_v39  ;;  %v6506_v36 = vmax.f32 %v8692_v22, 0.0 }
 0x3bd   :  { %v6631_v25 = vpack.c.bf16 %v6511_v37, %v6503_v27  ;;  %v6513_v21 = vmax.f32 %v8693_v58, 0.0 }
 0x3be   :  { %v6632_v30 = vpack.c.bf16 %v6512_v12, %v6504_v19  ;;  %v6514_v45 = vmax.f32 %v8694_v5, 0.0  ;;  %v5978_v20 = vpop.f32.mrb[100].mxu0 }
 0x3bf   :  { %v6633_v7 = vpack.c.bf16 %v6513_v21, %v6505_v4  ;;  %v8663_v33 = vadd.f32 %v5978_v20, %v12805_v59  ;;  %v5980_v48 = vpop.f32.mrb[101].mxu0 }
 0x3c0   :  { %v6634_v3 = vpack.c.bf16 %v6514_v45, %v6506_v36  ;;  %v6430_v18 = vpop.f32.mrb[100].mxu1  ;;  %v8664_v34 = vadd.f32 %v5980_v48, %v12809_v28  ;;  %v5982_v63 = vpop.f32.mrb[102].mxu0  ;;  %7436 = vmatprep.mubr.bf16.mxu0 %v6632_v30 }
 0x3c1   :  { %v8695_v23 = vadd.f32 %v6430_v18, %v12813_v15  ;;  %v6432_v13 = vpop.f32.mrb[101].mxu1  ;;  %v8665_v62 = vadd.f32 %v5982_v63, %v12805_v59  ;;  %v5984_v16 = vpop.f32.mrb[103].mxu0  ;;  %7437 = vmatmul.mubr.bf16.vlgmr.msra.gmra.mrb[160].mxu0 %v6631_v25  ;;  %v6519_v49 = vmax.f32 %v8663_v33, 0.0 }
 0x3c2   :  { %v8696_v42 = vadd.f32 %v6432_v13, %v12817_v39  ;;  %v6434_v47 = vpop.f32.mrb[102].mxu1  ;;  %7533 = vmatprep.mubr.bf16.mxu1 %v6634_v3  ;;  %v8666_v0 = vadd.f32 %v5984_v16, %v12809_v28  ;;  %v6520_v26 = vmax.f32 %v8664_v34, 0.0 }
 0x3c3   :  { %v6527_v55 = vmax.f32 %v8665_v62, 0.0  ;;  %v8697_v2 = vadd.f32 %v6434_v47, %v12813_v15  ;;  %v6436_v38 = vpop.f32.mrb[103].mxu1  ;;  %7534 = vmatmul.mubr.bf16.vlgmr.msra.gmra.mrb[160].mxu1 %v6633_v7  ;;  %v6521_v14 = vmax.f32 %v8695_v23, 0.0 }
 0x3c4   :  { %v6528_v60 = vmax.f32 %v8666_v0, 0.0  ;;  %v8698_v56 = vadd.f32 %v6436_v38, %v12817_v39  ;;  %v6522_v32 = vmax.f32 %v8696_v42, 0.0 }
 0x3c5   :  { %v6639_v11 = vpack.c.bf16 %v6527_v55, %v6519_v49  ;;  %v6529_v52 = vmax.f32 %v8697_v2, 0.0 }
 0x3c6   :  { %v6640_v41 = vpack.c.bf16 %v6528_v60, %v6520_v26  ;;  %v6530_v46 = vmax.f32 %v8698_v56, 0.0  ;;  %v5988_v40 = vpop.f32.mrb[104].mxu0 }
 0x3c7   :  { %v6641_v51 = vpack.c.bf16 %v6529_v52, %v6521_v14  ;;  %v8667_v8 = vadd.f32 %v5988_v40, %v12805_v59  ;;  %v5990_v31 = vpop.f32.mrb[105].mxu0 }
 0x3c8   :  { %v6642_v6 = vpack.c.bf16 %v6530_v46, %v6522_v32  ;;  %v6440_v50 = vpop.f32.mrb[104].mxu1  ;;  %v8668_v17 = vadd.f32 %v5990_v31, %v12809_v28  ;;  %v5992_v35 = vpop.f32.mrb[106].mxu0  ;;  %7444 = vmatprep.mubr.bf16.mxu0 %v6640_v41 }
 0x3c9   :  { %v8699_v61 = vadd.f32 %v6440_v50, %v12813_v15  ;;  %v6442_v44 = vpop.f32.mrb[105].mxu1  ;;  %v8669_v57 = vadd.f32 %v5992_v35, %v12805_v59  ;;  %v5994_v53 = vpop.f32.mrb[107].mxu0  ;;  %7445 = vmatmul.mubr.bf16.gmra.mrb[164].mxu0 %v6639_v11  ;;  %v6535_v9 = vmax.f32 %v8667_v8, 0.0 }
 0x3ca   :  { %v8700_v1 = vadd.f32 %v6442_v44, %v12817_v39  ;;  %v6444_v54 = vpop.f32.mrb[106].mxu1  ;;  %7541 = vmatprep.mubr.bf16.mxu1 %v6642_v6  ;;  %v8670_v24 = vadd.f32 %v5994_v53, %v12809_v28  ;;  %v6536_v27 = vmax.f32 %v8668_v17, 0.0 }
 0x3cb   :  { %v6543_v22 = vmax.f32 %v8669_v57, 0.0  ;;  %v8701_v43 = vadd.f32 %v6444_v54, %v12813_v15  ;;  %v6446_v29 = vpop.f32.mrb[107].mxu1  ;;  %7542 = vmatmul.mubr.bf16.gmra.mrb[164].mxu1 %v6641_v51  ;;  %v6537_v10 = vmax.f32 %v8699_v61, 0.0 }
 0x3cc   :  { %v6544_v37 = vmax.f32 %v8670_v24, 0.0  ;;  %v8702_v58 = vadd.f32 %v6446_v29, %v12817_v39  ;;  %v6538_v5 = vmax.f32 %v8700_v1, 0.0 }
 0x3cd   :  { %v6647_v19 = vpack.c.bf16 %v6543_v22, %v6535_v9  ;;  %v6545_v12 = vmax.f32 %v8701_v43, 0.0 }
 0x3ce   :  { %v6648_v4 = vpack.c.bf16 %v6544_v37, %v6536_v27  ;;  %v6546_v25 = vmax.f32 %v8702_v58, 0.0  ;;  %v5998_v21 = vpop.f32.mrb[108].mxu0 }
 0x3cf   :  { %v6649_v36 = vpack.c.bf16 %v6545_v12, %v6537_v10  ;;  %v8671_v30 = vadd.f32 %v5998_v21, %v12805_v59  ;;  %v6000_v45 = vpop.f32.mrb[109].mxu0 }
 0x3d0   :  { %v6650_v20 = vpack.c.bf16 %v6546_v25, %v6538_v5  ;;  %v6450_v7 = vpop.f32.mrb[108].mxu1  ;;  %v8672_v33 = vadd.f32 %v6000_v45, %v12809_v28  ;;  %v6002_v48 = vpop.f32.mrb[110].mxu0  ;;  %7452 = vmatprep.mubr.bf16.mxu0 %v6648_v4 }
 0x3d1   :  { %v8703_v3 = vadd.f32 %v6450_v7, %v12813_v15  ;;  %v6452_v18 = vpop.f32.mrb[109].mxu1  ;;  %v8673_v34 = vadd.f32 %v6002_v48, %v12805_v59  ;;  %v6004_v63 = vpop.f32.mrb[111].mxu0  ;;  %7453 = vmatmul.mubr.bf16.gmra.mrb[168].mxu0 %v6647_v19  ;;  %v6551_v16 = vmax.f32 %v8671_v30, 0.0 }
 0x3d2   :  { %v8704_v23 = vadd.f32 %v6452_v18, %v12817_v39  ;;  %v6454_v13 = vpop.f32.mrb[110].mxu1  ;;  %7549 = vmatprep.mubr.bf16.mxu1 %v6650_v20  ;;  %v8674_v62 = vadd.f32 %v6004_v63, %v12809_v28  ;;  %v6552_v49 = vmax.f32 %v8672_v33, 0.0 }
 0x3d3   :  { %v6559_v42 = vmax.f32 %v8673_v34, 0.0  ;;  %v8705_v47 = vadd.f32 %v6454_v13, %v12813_v15  ;;  %v6456_v0 = vpop.f32.mrb[111].mxu1  ;;  %7550 = vmatmul.mubr.bf16.gmra.mrb[168].mxu1 %v6649_v36  ;;  %v6553_v38 = vmax.f32 %v8703_v3, 0.0 }
 0x3d4   :  { %v6560_v55 = vmax.f32 %v8674_v62, 0.0  ;;  %v8706_v2 = vadd.f32 %v6456_v0, %v12817_v39  ;;  %v6554_v56 = vmax.f32 %v8704_v23, 0.0 }
 0x3d5   :  { %v6655_v26 = vpack.c.bf16 %v6559_v42, %v6551_v16  ;;  %v6561_v60 = vmax.f32 %v8705_v47, 0.0 }
 0x3d6   :  { %v6656_v14 = vpack.c.bf16 %v6560_v55, %v6552_v49  ;;  %v6562_v11 = vmax.f32 %v8706_v2, 0.0  ;;  %v6008_v52 = vpop.f32.mrb[112].mxu0 }
 0x3d7   :  { %v6657_v32 = vpack.c.bf16 %v6561_v60, %v6553_v38  ;;  %v8675_v41 = vadd.f32 %v6008_v52, %v12805_v59  ;;  %v6010_v46 = vpop.f32.mrb[113].mxu0 }
 0x3d8   :  { %v6658_v40 = vpack.c.bf16 %v6562_v11, %v6554_v56  ;;  %v6460_v51 = vpop.f32.mrb[112].mxu1  ;;  %v8676_v8 = vadd.f32 %v6010_v46, %v12809_v28  ;;  %v6012_v31 = vpop.f32.mrb[114].mxu0  ;;  %7460 = vmatprep.mubr.bf16.mxu0 %v6656_v14 }
 0x3d9   :  { %v8707_v6 = vadd.f32 %v6460_v51, %v12813_v15  ;;  %v6462_v50 = vpop.f32.mrb[113].mxu1  ;;  %v8677_v17 = vadd.f32 %v6012_v31, %v12805_v59  ;;  %v6014_v35 = vpop.f32.mrb[115].mxu0  ;;  %7461 = vmatmul.mubr.bf16.gmra.mrb[172].mxu0 %v6655_v26  ;;  %v6567_v53 = vmax.f32 %v8675_v41, 0.0 }
 0x3da   :  { %v8708_v61 = vadd.f32 %v6462_v50, %v12817_v39  ;;  %v6464_v44 = vpop.f32.mrb[114].mxu1  ;;  %7557 = vmatprep.mubr.bf16.mxu1 %v6658_v40  ;;  %v8678_v57 = vadd.f32 %v6014_v35, %v12809_v28  ;;  %v6568_v9 = vmax.f32 %v8676_v8, 0.0 }
 0x3db   :  { %v6575_v1 = vmax.f32 %v8677_v17, 0.0  ;;  %v8709_v54 = vadd.f32 %v6464_v44, %v12813_v15  ;;  %v6466_v24 = vpop.f32.mrb[115].mxu1  ;;  %7558 = vmatmul.mubr.bf16.gmra.mrb[172].mxu1 %v6657_v32  ;;  %v6569_v29 = vmax.f32 %v8707_v6, 0.0 }
 0x3dc   :  { %v6576_v22 = vmax.f32 %v8678_v57, 0.0  ;;  %v8710_v43 = vadd.f32 %v6466_v24, %v12817_v39  ;;  %v6570_v58 = vmax.f32 %v8708_v61, 0.0 }
 0x3dd   :  { %v6663_v27 = vpack.c.bf16 %v6575_v1, %v6567_v53  ;;  %v6577_v37 = vmax.f32 %v8709_v54, 0.0 }
 0x3de   :  { %v6664_v10 = vpack.c.bf16 %v6576_v22, %v6568_v9  ;;  %v6578_v19 = vmax.f32 %v8710_v43, 0.0  ;;  %v6018_v12 = vpop.f32.mrb[116].mxu0 }
 0x3df   :  { %v6665_v5 = vpack.c.bf16 %v6577_v37, %v6569_v29  ;;  %v8679_v4 = vadd.f32 %v6018_v12, %v12805_v59  ;;  %v6020_v25 = vpop.f32.mrb[117].mxu0 }
 0x3e0   :  { %v6666_v21 = vpack.c.bf16 %v6578_v19, %v6570_v58  ;;  %v6470_v36 = vpop.f32.mrb[116].mxu1  ;;  %v8680_v30 = vadd.f32 %v6020_v25, %v12809_v28  ;;  %v6022_v45 = vpop.f32.mrb[118].mxu0  ;;  %7468 = vmatprep.mubr.bf16.mxu0 %v6664_v10 }
 0x3e1   :  { %v8711_v20 = vadd.f32 %v6470_v36, %v12813_v15  ;;  %v6472_v7 = vpop.f32.mrb[117].mxu1  ;;  %v8681_v33 = vadd.f32 %v6022_v45, %v12805_v59  ;;  %v6024_v48 = vpop.f32.mrb[119].mxu0  ;;  %7469 = vmatmul.mubr.bf16.gmra.mrb[176].mxu0 %v6663_v27  ;;  %v6583_v63 = vmax.f32 %v8679_v4, 0.0 }
 0x3e2   :  { %v8712_v3 = vadd.f32 %v6472_v7, %v12817_v39  ;;  %v6474_v18 = vpop.f32.mrb[118].mxu1  ;;  %7565 = vmatprep.mubr.bf16.mxu1 %v6666_v21  ;;  %v8682_v34 = vadd.f32 %v6024_v48, %v12809_v28  ;;  %v6584_v16 = vmax.f32 %v8680_v30, 0.0 }
 0x3e3   :  { %v6591_v23 = vmax.f32 %v8681_v33, 0.0  ;;  %v8713_v13 = vadd.f32 %v6474_v18, %v12813_v15  ;;  %v6476_v62 = vpop.f32.mrb[119].mxu1  ;;  %7566 = vmatmul.mubr.bf16.gmra.mrb[176].mxu1 %v6665_v5  ;;  %v6585_v0 = vmax.f32 %v8711_v20, 0.0 }
 0x3e4   :  { %v6592_v42 = vmax.f32 %v8682_v34, 0.0  ;;  %v8714_v47 = vadd.f32 %v6476_v62, %v12817_v39  ;;  %v6586_v2 = vmax.f32 %v8712_v3, 0.0 }
 0x3e5   :  { %v6671_v49 = vpack.c.bf16 %v6591_v23, %v6583_v63  ;;  %v6593_v55 = vmax.f32 %v8713_v13, 0.0 }
 0x3e6   :  { %v6672_v38 = vpack.c.bf16 %v6592_v42, %v6584_v16  ;;  %v6594_v26 = vmax.f32 %v8714_v47, 0.0  ;;  %v6028_v60 = vpop.f32.mrb[120].mxu0 }
 0x3e7   :  { %v6673_v56 = vpack.c.bf16 %v6593_v55, %v6585_v0  ;;  %v8683_v14 = vadd.f32 %v6028_v60, %v12805_v59  ;;  %v6030_v11 = vpop.f32.mrb[121].mxu0 }
 0x3e8   :  { %v6674_v52 = vpack.c.bf16 %v6594_v26, %v6586_v2  ;;  %v6480_v32 = vpop.f32.mrb[120].mxu1  ;;  %v8684_v41 = vadd.f32 %v6030_v11, %v12809_v28  ;;  %v6032_v46 = vpop.f32.mrb[122].mxu0  ;;  %7476 = vmatprep.mubr.bf16.mxu0 %v6672_v38 }
 0x3e9   :  { %v8715_v40 = vadd.f32 %v6480_v32, %v12813_v15  ;;  %v6482_v51 = vpop.f32.mrb[121].mxu1  ;;  %v8685_v8 = vadd.f32 %v6032_v46, %v12805_v59  ;;  %v6034_v31 = vpop.f32.mrb[123].mxu0  ;;  %7477 = vmatmul.mubr.bf16.gmra.mrb[180].mxu0 %v6671_v49  ;;  %v6599_v35 = vmax.f32 %v8683_v14, 0.0 }
 0x3ea   :  { %v8716_v6 = vadd.f32 %v6482_v51, %v12817_v39  ;;  %v6484_v50 = vpop.f32.mrb[122].mxu1  ;;  %7573 = vmatprep.mubr.bf16.mxu1 %v6674_v52  ;;  %v8686_v17 = vadd.f32 %v6034_v31, %v12809_v28  ;;  %v6600_v53 = vmax.f32 %v8684_v41, 0.0 }
 0x3eb   :  { %v6607_v61 = vmax.f32 %v8685_v8, 0.0  ;;  %v8717_v44 = vadd.f32 %v6484_v50, %v12813_v15  ;;  %v6486_v57 = vpop.f32.mrb[123].mxu1  ;;  %7574 = vmatmul.mubr.bf16.gmra.mrb[180].mxu1 %v6673_v56  ;;  %v6601_v24 = vmax.f32 %v8715_v40, 0.0 }
 0x3ec   :  { %v6608_v1 = vmax.f32 %v8686_v17, 0.0  ;;  %v8718_v54 = vadd.f32 %v6486_v57, %v12817_v39  ;;  %v6602_v43 = vmax.f32 %v8716_v6, 0.0 }
 0x3ed   :  { %v6679_v9 = vpack.c.bf16 %v6607_v61, %v6599_v35  ;;  %v6609_v22 = vmax.f32 %v8717_v44, 0.0 }
 0x3ee   :  { %v6680_v29 = vpack.c.bf16 %v6608_v1, %v6600_v53  ;;  %v6610_v27 = vmax.f32 %v8718_v54, 0.0  ;;  %v6038_v37 = vpop.f32.mrb[124].mxu0 }
 0x3ef   :  { %v6681_v58 = vpack.c.bf16 %v6609_v22, %v6601_v24  ;;  %v8687_v10 = vadd.f32 %v6038_v37, %v12805_v59  ;;  %v6040_v19 = vpop.f32.mrb[125].mxu0 }
 0x3f0   :  { %v6682_v12 = vpack.c.bf16 %v6610_v27, %v6602_v43  ;;  %v6490_v5 = vpop.f32.mrb[124].mxu1  ;;  %v8688_v4 = vadd.f32 %v6040_v19, %v12809_v28  ;;  %v6042_v25 = vpop.f32.mrb[126].mxu0  ;;  %7484 = vmatprep.mubr.bf16.mxu0 %v6680_v29 }
 0x3f1   :  { %v8719_v21 = vadd.f32 %v6490_v5, %v12813_v15  ;;  %v6492_v36 = vpop.f32.mrb[125].mxu1  ;;  %v8689_v30 = vadd.f32 %v6042_v25, %v12805_v59  ;;  %v6044_v45 = vpop.f32.mrb[127].mxu0  ;;  %7485 = vmatmul.mubr.bf16.gmra.mrb[184].mxu0 %v6679_v9  ;;  %v6615_v48 = vmax.f32 %v8687_v10, 0.0 }
 0x3f2   :  { %v8720_v20 = vadd.f32 %v6492_v36, %v12817_v39  ;;  %v6494_v7 = vpop.f32.mrb[126].mxu1  ;;  %7581 = vmatprep.mubr.bf16.mxu1 %v6682_v12  ;;  %v8690_v33 = vadd.f32 %v6044_v45, %v12809_v28  ;;  %v6616_v63 = vmax.f32 %v8688_v4, 0.0  ;;  %v12886_v28 = vld [vmem:[%s13006_s6] ss:$0 sm:$0xff] }
 0x3f3   :  { %v6623_v3 = vmax.f32 %v8689_v30, 0.0  ;;  %v8721_v18 = vadd.f32 %v6494_v7, %v12813_v15  ;;  %v6496_v34 = vpop.f32.mrb[127].mxu1  ;;  %7582 = vmatmul.mubr.bf16.gmra.mrb[184].mxu1 %v6681_v58  ;;  %v6617_v62 = vmax.f32 %v8719_v21, 0.0 }
 0x3f4   :  { %v6624_v23 = vmax.f32 %v8690_v33, 0.0  ;;  %v8722_v13 = vadd.f32 %v6496_v34, %v12817_v39  ;;  %v6618_v42 = vmax.f32 %v8720_v20, 0.0 }
 0x3f5   :  { %v6687_v59 = vpack.c.bf16 %v6623_v3, %v6615_v48  ;;  %v6625_v16 = vmax.f32 %v8721_v18, 0.0 }
 0x3f6   :  { %v6688_v47 = vpack.c.bf16 %v6624_v23, %v6616_v63  ;;  %v6626_v0 = vmax.f32 %v8722_v13, 0.0  ;;  %v8355_v49 = vpop.f32.mrb[128].mxu0 }
 0x3f7   :  { %v6689_v55 = vpack.c.bf16 %v6625_v16, %v6617_v62  ;;  %v8356_v15 = vpop.f32.mrb[129].mxu0 }
 0x3f8   :  { %v6690_v2 = vpack.c.bf16 %v6626_v0, %v6618_v42  ;;  %v8419_v38 = vpop.f32.mrb[128].mxu1  ;;  %v8357_v26 = vadd.f32 %v8356_v15, %v8355_v49  ;;  %v8358_v60 = vpop.f32.mrb[130].mxu0  ;;  %7492 = vmatprep.mubr.bf16.mxu0 %v6688_v47 }
 0x3f9   :  { %v8420_v39 = vpop.f32.mrb[129].mxu1  ;;  %v8359_v56 = vpop.f32.mrb[131].mxu0  ;;  %7493 = vmatmul.mubr.bf16.gmra.mrb[188].mxu0 %v6687_v59 }
 0x3fa   :  { %v7245_v14 = vadd.f32 %v8357_v26, %v12886_v28  ;;  %v8421_v11 = vadd.f32 %v8420_v39, %v8419_v38  ;;  %v8422_v52 = vpop.f32.mrb[130].mxu1  ;;  %7589 = vmatprep.mubr.bf16.mxu1 %v6690_v2  ;;  %v8360_v32 = vadd.f32 %v8359_v56, %v8358_v60 }
 0x3fb   :  { %v8423_v41 = vpop.f32.mrb[131].mxu1  ;;  %7590 = vmatmul.mubr.bf16.gmra.mrb[188].mxu1 %v6689_v55 }
 0x3fc   :  { %v12889_v46 = vadd.f32 %v8421_v11, %v7245_v14  ;;  %v7248_v40 = vadd.f32 %v8360_v32, %v12886_v28  ;;  %v8424_v51 = vadd.f32 %v8423_v41, %v8422_v52 }
 0x3fe   :  { %v12892_v8 = vadd.f32 %v8424_v51, %v7248_v40  ;;  %v8361_v31 = vpop.f32.mrb[132].mxu0 }
 0x3ff   :  { %v8362_v6 = vpop.f32.mrb[133].mxu0 }
 0x400   :  { %v8425_v50 = vpop.f32.mrb[132].mxu1  ;;  %v8363_v17 = vadd.f32 %v8362_v6, %v8361_v31  ;;  %v8364_v35 = vpop.f32.mrb[134].mxu0 }
 0x401   :  { %v8426_v61 = vpop.f32.mrb[133].mxu1  ;;  %v8365_v44 = vpop.f32.mrb[135].mxu0 }
 0x402   :  { %v7253_v57 = vadd.f32 %v8363_v17, %v12886_v28  ;;  %v8427_v53 = vadd.f32 %v8426_v61, %v8425_v50  ;;  %v8428_v1 = vpop.f32.mrb[134].mxu1  ;;  %v8366_v54 = vadd.f32 %v8365_v44, %v8364_v35 }
 0x403   :  { %v8429_v24 = vpop.f32.mrb[135].mxu1 }
 0x404   :  { %v12895_v9 = vadd.f32 %v8427_v53, %v7253_v57  ;;  %v7256_v22 = vadd.f32 %v8366_v54, %v12886_v28  ;;  %v8430_v43 = vadd.f32 %v8429_v24, %v8428_v1 }
 0x406   :  { %v12898_v29 = vadd.f32 %v8430_v43, %v7256_v22  ;;  %v8367_v27 = vpop.f32.mrb[136].mxu0 }
 0x407   :  { %v8368_v37 = vpop.f32.mrb[137].mxu0 }
 0x408   :  { %v8431_v58 = vpop.f32.mrb[136].mxu1  ;;  %v8369_v10 = vadd.f32 %v8368_v37, %v8367_v27  ;;  %v8370_v19 = vpop.f32.mrb[138].mxu0 }
 0x409   :  { %v8432_v12 = vpop.f32.mrb[137].mxu1  ;;  %v8371_v5 = vpop.f32.mrb[139].mxu0 }
 0x40a   :  { %v7261_v4 = vadd.f32 %v8369_v10, %v12886_v28  ;;  %v8433_v25 = vadd.f32 %v8432_v12, %v8431_v58  ;;  %v8434_v21 = vpop.f32.mrb[138].mxu1  ;;  %v8372_v36 = vadd.f32 %v8371_v5, %v8370_v19 }
 0x40b   :  { %v8435_v30 = vpop.f32.mrb[139].mxu1 }
 0x40c   :  { %v12901_v45 = vadd.f32 %v8433_v25, %v7261_v4  ;;  %v7264_v20 = vadd.f32 %v8372_v36, %v12886_v28  ;;  %v8436_v7 = vadd.f32 %v8435_v30, %v8434_v21 }
 0x40e   :  { %v12904_v33 = vadd.f32 %v8436_v7, %v7264_v20  ;;  %v8373_v48 = vpop.f32.mrb[140].mxu0 }
 0x40f   :  { %v8374_v3 = vpop.f32.mrb[141].mxu0 }
 0x410   :  { %v8437_v18 = vpop.f32.mrb[140].mxu1  ;;  %v8375_v34 = vadd.f32 %v8374_v3, %v8373_v48  ;;  %v8376_v63 = vpop.f32.mrb[142].mxu0 }
 0x411   :  { %v8438_v23 = vpop.f32.mrb[141].mxu1  ;;  %v8377_v13 = vpop.f32.mrb[143].mxu0 }
 0x412   :  { %v7269_v62 = vadd.f32 %v8375_v34, %v12886_v28  ;;  %v8439_v59 = vadd.f32 %v8438_v23, %v8437_v18  ;;  %v8440_v16 = vpop.f32.mrb[142].mxu1  ;;  %v8378_v42 = vadd.f32 %v8377_v13, %v8376_v63 }
 0x413   :  { %v8441_v47 = vpop.f32.mrb[143].mxu1 }
 0x414   :  { %v12907_v0 = vadd.f32 %v8439_v59, %v7269_v62  ;;  %v7272_v49 = vadd.f32 %v8378_v42, %v12886_v28  ;;  %v8442_v55 = vadd.f32 %v8441_v47, %v8440_v16 }
 0x416   :  { %v12910_v15 = vadd.f32 %v8442_v55, %v7272_v49  ;;  %v8379_v2 = vpop.f32.mrb[144].mxu0 }
 0x417   :  { %v8380_v38 = vpop.f32.mrb[145].mxu0 }
 0x418   :  { %v8443_v26 = vpop.f32.mrb[144].mxu1  ;;  %v8381_v60 = vadd.f32 %v8380_v38, %v8379_v2  ;;  %v8382_v39 = vpop.f32.mrb[146].mxu0 }
 0x419   :  { %v8444_v56 = vpop.f32.mrb[145].mxu1  ;;  %v8383_v14 = vpop.f32.mrb[147].mxu0 }
 0x41a   :  { %v7277_v11 = vadd.f32 %v8381_v60, %v12886_v28  ;;  %v8445_v52 = vadd.f32 %v8444_v56, %v8443_v26  ;;  %v8446_v32 = vpop.f32.mrb[146].mxu1  ;;  %v8384_v41 = vadd.f32 %v8383_v14, %v8382_v39 }
 0x41b   :  { %v8447_v40 = vpop.f32.mrb[147].mxu1 }
 0x41c   :  { %v12913_v51 = vadd.f32 %v8445_v52, %v7277_v11  ;;  %v7280_v31 = vadd.f32 %v8384_v41, %v12886_v28  ;;  %v8448_v6 = vadd.f32 %v8447_v40, %v8446_v32 }
 0x41e   :  { %v12916_v50 = vadd.f32 %v8448_v6, %v7280_v31  ;;  %v8385_v17 = vpop.f32.mrb[148].mxu0 }
 0x41f   :  { %v8386_v35 = vpop.f32.mrb[149].mxu0 }
 0x420   :  { %v8449_v61 = vpop.f32.mrb[148].mxu1  ;;  %v8387_v44 = vadd.f32 %v8386_v35, %v8385_v17  ;;  %v8388_v57 = vpop.f32.mrb[150].mxu0 }
 0x421   :  { %v8450_v53 = vpop.f32.mrb[149].mxu1  ;;  %v8389_v1 = vpop.f32.mrb[151].mxu0 }
 0x422   :  { %v7285_v54 = vadd.f32 %v8387_v44, %v12886_v28  ;;  %v8451_v24 = vadd.f32 %v8450_v53, %v8449_v61  ;;  %v8452_v22 = vpop.f32.mrb[150].mxu1  ;;  %v8390_v43 = vadd.f32 %v8389_v1, %v8388_v57 }
 0x423   :  { %v8453_v27 = vpop.f32.mrb[151].mxu1 }
 0x424   :  { %v12919_v37 = vadd.f32 %v8451_v24, %v7285_v54  ;;  %v7288_v58 = vadd.f32 %v8390_v43, %v12886_v28  ;;  %v8454_v10 = vadd.f32 %v8453_v27, %v8452_v22 }
 0x426   :  { %v12922_v19 = vadd.f32 %v8454_v10, %v7288_v58  ;;  %v8391_v12 = vpop.f32.mrb[152].mxu0 }
 0x427   :  { %v8392_v5 = vpop.f32.mrb[153].mxu0 }
 0x428   :  { %v8455_v4 = vpop.f32.mrb[152].mxu1  ;;  %v8393_v25 = vadd.f32 %v8392_v5, %v8391_v12  ;;  %v8394_v21 = vpop.f32.mrb[154].mxu0 }
 0x429   :  { %v8456_v36 = vpop.f32.mrb[153].mxu1  ;;  %v8395_v30 = vpop.f32.mrb[155].mxu0 }
 0x42a   :  { %v7293_v20 = vadd.f32 %v8393_v25, %v12886_v28  ;;  %v8457_v7 = vadd.f32 %v8456_v36, %v8455_v4  ;;  %v8458_v48 = vpop.f32.mrb[154].mxu1  ;;  %v8396_v3 = vadd.f32 %v8395_v30, %v8394_v21 }
 0x42b   :  { %v8459_v18 = vpop.f32.mrb[155].mxu1 }
 0x42c   :  { %v12925_v34 = vadd.f32 %v8457_v7, %v7293_v20  ;;  %v7296_v63 = vadd.f32 %v8396_v3, %v12886_v28  ;;  %v8460_v23 = vadd.f32 %v8459_v18, %v8458_v48 }
 0x42e   :  { %v12928_v13 = vadd.f32 %v8460_v23, %v7296_v63  ;;  %v8397_v62 = vpop.f32.mrb[156].mxu0 }
 0x42f   :  { %v8398_v59 = vpop.f32.mrb[157].mxu0 }
 0x430   :  { %v8461_v16 = vpop.f32.mrb[156].mxu1  ;;  %v8399_v42 = vadd.f32 %v8398_v59, %v8397_v62  ;;  %v8400_v47 = vpop.f32.mrb[158].mxu0 }
 0x431   :  { %v8462_v49 = vpop.f32.mrb[157].mxu1  ;;  %v8401_v55 = vpop.f32.mrb[159].mxu0 }
 0x432   :  { %v7301_v2 = vadd.f32 %v8399_v42, %v12886_v28  ;;  %v8463_v38 = vadd.f32 %v8462_v49, %v8461_v16  ;;  %v8464_v26 = vpop.f32.mrb[158].mxu1  ;;  %v8402_v60 = vadd.f32 %v8401_v55, %v8400_v47 }
 0x433   :  { %v8465_v39 = vpop.f32.mrb[159].mxu1 }
 0x434   :  { %v12931_v56 = vadd.f32 %v8463_v38, %v7301_v2  ;;  %v7304_v14 = vadd.f32 %v8402_v60, %v12886_v28  ;;  %v8466_v11 = vadd.f32 %v8465_v39, %v8464_v26 }
 0x436   :  { %v12934_v52 = vadd.f32 %v8466_v11, %v7304_v14 }
 0x494   :  { %v8483_v32 = vpop.f32.mrb[160].mxu0 }
 0x495   :  { %v8484_v41 = vpop.f32.mrb[161].mxu0 }
 0x496   :  { %v8547_v40 = vpop.f32.mrb[160].mxu1  ;;  %v8485_v31 = vadd.f32 %v8484_v41, %v8483_v32  ;;  %v8486_v6 = vpop.f32.mrb[162].mxu0 }
 0x497   :  { %v8548_v17 = vpop.f32.mrb[161].mxu1  ;;  %v8487_v35 = vpop.f32.mrb[163].mxu0 }
 0x498   :  { %v7439_v61 = vadd.f32 %v8485_v31, %v12889_v46  ;;  %v8549_v44 = vadd.f32 %v8548_v17, %v8547_v40  ;;  %v8550_v57 = vpop.f32.mrb[162].mxu1  ;;  %v8488_v53 = vadd.f32 %v8487_v35, %v8486_v6 }
 0x499   :  { %v8551_v1 = vpop.f32.mrb[163].mxu1 }
 0x49a   :  { %v7536_v54 = vadd.f32 %v8549_v44, %v7439_v61  ;;  %v7442_v24 = vadd.f32 %v8488_v53, %v12892_v8  ;;  %v8552_v28 = vadd.f32 %v8551_v1, %v8550_v57 }
 0x49c   :  { %7598 = vst [vmem:[%s13007_s7] sm:$0xff] %v7536_v54  ;;  %v7539_v22 = vadd.f32 %v8552_v28, %v7442_v24  ;;  %v8489_v43 = vpop.f32.mrb[164].mxu0 }
 0x49d   :  { %v8490_v27 = vpop.f32.mrb[165].mxu0 }
 0x49e   :  { %7599 = vst [vmem:[%s13007_s7 + $0x8] sm:$0xff] %v7539_v22  ;;  %v8553_v46 = vpop.f32.mrb[164].mxu1  ;;  %v8491_v58 = vadd.f32 %v8490_v27, %v8489_v43  ;;  %v8492_v10 = vpop.f32.mrb[166].mxu0 }
 0x49f   :  { %v8554_v12 = vpop.f32.mrb[165].mxu1  ;;  %v8493_v5 = vpop.f32.mrb[167].mxu0 }
 0x4a0   :  { %v7447_v4 = vadd.f32 %v8491_v58, %v12895_v9  ;;  %v8555_v8 = vadd.f32 %v8554_v12, %v8553_v46  ;;  %v8556_v25 = vpop.f32.mrb[166].mxu1  ;;  %v8494_v21 = vadd.f32 %v8493_v5, %v8492_v10 }
 0x4a1   :  { %v8557_v36 = vpop.f32.mrb[167].mxu1 }
 0x4a2   :  { %v7544_v30 = vadd.f32 %v8555_v8, %v7447_v4  ;;  %v7450_v20 = vadd.f32 %v8494_v21, %v12898_v29  ;;  %v8558_v7 = vadd.f32 %v8557_v36, %v8556_v25 }
 0x4a4   :  { %7600 = vst [vmem:[%s13007_s7 + $0x10] sm:$0xff] %v7544_v30  ;;  %v7547_v48 = vadd.f32 %v8558_v7, %v7450_v20  ;;  %v8495_v3 = vpop.f32.mrb[168].mxu0 }
 0x4a5   :  { %v8496_v18 = vpop.f32.mrb[169].mxu0 }
 0x4a6   :  { %7601 = vst [vmem:[%s13007_s7 + $0x18] sm:$0xff] %v7547_v48  ;;  %v8559_v9 = vpop.f32.mrb[168].mxu1  ;;  %v8497_v63 = vadd.f32 %v8496_v18, %v8495_v3  ;;  %v8498_v23 = vpop.f32.mrb[170].mxu0 }
 0x4a7   :  { %v8560_v62 = vpop.f32.mrb[169].mxu1  ;;  %v8499_v59 = vpop.f32.mrb[171].mxu0 }
 0x4a8   :  { %v7455_v16 = vadd.f32 %v8497_v63, %v12901_v45  ;;  %v8561_v29 = vadd.f32 %v8560_v62, %v8559_v9  ;;  %v8562_v42 = vpop.f32.mrb[170].mxu1  ;;  %v8500_v47 = vadd.f32 %v8499_v59, %v8498_v23 }
 0x4a9   :  { %v8563_v49 = vpop.f32.mrb[171].mxu1 }
 0x4aa   :  { %v7552_v55 = vadd.f32 %v8561_v29, %v7455_v16  ;;  %v7458_v2 = vadd.f32 %v8500_v47, %v12904_v33  ;;  %v8564_v38 = vadd.f32 %v8563_v49, %v8562_v42 }
 0x4ac   :  { %7602 = vst [vmem:[%s13007_s7 + $0x20] sm:$0xff] %v7552_v55  ;;  %v7555_v26 = vadd.f32 %v8564_v38, %v7458_v2  ;;  %v8501_v60 = vpop.f32.mrb[172].mxu0 }
 0x4ad   :  { %v8502_v39 = vpop.f32.mrb[173].mxu0 }
 0x4ae   :  { %7603 = vst [vmem:[%s13007_s7 + $0x28] sm:$0xff] %v7555_v26  ;;  %v8565_v45 = vpop.f32.mrb[172].mxu1  ;;  %v8503_v14 = vadd.f32 %v8502_v39, %v8501_v60  ;;  %v8504_v11 = vpop.f32.mrb[174].mxu0 }
 0x4af   :  { %v8566_v32 = vpop.f32.mrb[173].mxu1  ;;  %v8505_v41 = vpop.f32.mrb[175].mxu0 }
 0x4b0   :  { %v7463_v40 = vadd.f32 %v8503_v14, %v12907_v0  ;;  %v8567_v33 = vadd.f32 %v8566_v32, %v8565_v45  ;;  %v8568_v31 = vpop.f32.mrb[174].mxu1  ;;  %v8506_v6 = vadd.f32 %v8505_v41, %v8504_v11 }
 0x4b1   :  { %v8569_v17 = vpop.f32.mrb[175].mxu1 }
 0x4b2   :  { %v7560_v35 = vadd.f32 %v8567_v33, %v7463_v40  ;;  %v7466_v61 = vadd.f32 %v8506_v6, %v12910_v15  ;;  %v8570_v44 = vadd.f32 %v8569_v17, %v8568_v31 }
 0x4b4   :  { %7604 = vst [vmem:[%s13007_s7 + $0x30] sm:$0xff] %v7560_v35  ;;  %v7563_v57 = vadd.f32 %v8570_v44, %v7466_v61  ;;  %v8507_v53 = vpop.f32.mrb[176].mxu0 }
 0x4b5   :  { %v8508_v1 = vpop.f32.mrb[177].mxu0 }
 0x4b6   :  { %7605 = vst [vmem:[%s13007_s7 + $0x38] sm:$0xff] %v7563_v57  ;;  %v8571_v0 = vpop.f32.mrb[176].mxu1  ;;  %v8509_v54 = vadd.f32 %v8508_v1, %v8507_v53  ;;  %v8510_v24 = vpop.f32.mrb[178].mxu0 }
 0x4b7   :  { %v8572_v28 = vpop.f32.mrb[177].mxu1  ;;  %v8511_v22 = vpop.f32.mrb[179].mxu0 }
 0x4b8   :  { %v7471_v43 = vadd.f32 %v8509_v54, %v12913_v51  ;;  %v8573_v15 = vadd.f32 %v8572_v28, %v8571_v0  ;;  %v8574_v27 = vpop.f32.mrb[178].mxu1  ;;  %v8512_v46 = vadd.f32 %v8511_v22, %v8510_v24 }
 0x4b9   :  { %v8575_v58 = vpop.f32.mrb[179].mxu1 }
 0x4ba   :  { %v7568_v10 = vadd.f32 %v8573_v15, %v7471_v43  ;;  %v7474_v12 = vadd.f32 %v8512_v46, %v12916_v50  ;;  %v8576_v5 = vadd.f32 %v8575_v58, %v8574_v27 }
 0x4bc   :  { %7606 = vst [vmem:[%s13007_s7 + $0x40] sm:$0xff] %v7568_v10  ;;  %v7571_v4 = vadd.f32 %v8576_v5, %v7474_v12  ;;  %v8513_v8 = vpop.f32.mrb[180].mxu0 }
 0x4bd   :  { %v8514_v25 = vpop.f32.mrb[181].mxu0 }
 0x4be   :  { %7607 = vst [vmem:[%s13007_s7 + $0x48] sm:$0xff] %v7571_v4  ;;  %v8577_v51 = vpop.f32.mrb[180].mxu1  ;;  %v8515_v21 = vadd.f32 %v8514_v25, %v8513_v8  ;;  %v8516_v36 = vpop.f32.mrb[182].mxu0 }
 0x4bf   :  { %v8578_v30 = vpop.f32.mrb[181].mxu1  ;;  %v8517_v20 = vpop.f32.mrb[183].mxu0 }
 0x4c0   :  { %v7479_v7 = vadd.f32 %v8515_v21, %v12919_v37  ;;  %v8579_v50 = vadd.f32 %v8578_v30, %v8577_v51  ;;  %v8580_v48 = vpop.f32.mrb[182].mxu1  ;;  %v8518_v3 = vadd.f32 %v8517_v20, %v8516_v36 }
 0x4c1   :  { %v8581_v18 = vpop.f32.mrb[183].mxu1 }
 0x4c2   :  { %v7576_v9 = vadd.f32 %v8579_v50, %v7479_v7  ;;  %v7482_v63 = vadd.f32 %v8518_v3, %v12922_v19  ;;  %v8582_v23 = vadd.f32 %v8581_v18, %v8580_v48 }
 0x4c4   :  { %7608 = vst [vmem:[%s13007_s7 + $0x50] sm:$0xff] %v7576_v9  ;;  %v7579_v62 = vadd.f32 %v8582_v23, %v7482_v63  ;;  %v8519_v59 = vpop.f32.mrb[184].mxu0 }
 0x4c5   :  { %v8520_v16 = vpop.f32.mrb[185].mxu0 }
 0x4c6   :  { %7609 = vst [vmem:[%s13007_s7 + $0x58] sm:$0xff] %v7579_v62  ;;  %v8583_v37 = vpop.f32.mrb[184].mxu1  ;;  %v8521_v29 = vadd.f32 %v8520_v16, %v8519_v59  ;;  %v8522_v42 = vpop.f32.mrb[186].mxu0 }
 0x4c7   :  { %v8584_v47 = vpop.f32.mrb[185].mxu1  ;;  %v8523_v49 = vpop.f32.mrb[187].mxu0 }
 0x4c8   :  { %v7487_v55 = vadd.f32 %v8521_v29, %v12925_v34  ;;  %v8585_v19 = vadd.f32 %v8584_v47, %v8583_v37  ;;  %v8586_v2 = vpop.f32.mrb[186].mxu1  ;;  %v8524_v38 = vadd.f32 %v8523_v49, %v8522_v42 }
 0x4c9   :  { %v8587_v26 = vpop.f32.mrb[187].mxu1 }
 0x4ca   :  { %v7584_v60 = vadd.f32 %v8585_v19, %v7487_v55  ;;  %v7490_v39 = vadd.f32 %v8524_v38, %v12928_v13  ;;  %v8588_v45 = vadd.f32 %v8587_v26, %v8586_v2 }
 0x4cc   :  { %7610 = vst [vmem:[%s13007_s7 + $0x60] sm:$0xff] %v7584_v60  ;;  %v7587_v14 = vadd.f32 %v8588_v45, %v7490_v39  ;;  %v8525_v11 = vpop.f32.mrb[188].mxu0 }
 0x4cd   :  { %v8526_v32 = vpop.f32.mrb[189].mxu0 }
 0x4ce   :  { %7611 = vst [vmem:[%s13007_s7 + $0x68] sm:$0xff] %v7587_v14  ;;  %v8589_v34 = vpop.f32.mrb[188].mxu1  ;;  %v8527_v41 = vadd.f32 %v8526_v32, %v8525_v11  ;;  %v8528_v40 = vpop.f32.mrb[190].mxu0 }
 0x4cf   :  { %v8590_v33 = vpop.f32.mrb[189].mxu1  ;;  %v8529_v31 = vpop.f32.mrb[191].mxu0 }
 0x4d0   :  { %v7495_v6 = vadd.f32 %v8527_v41, %v12931_v56  ;;  %v8591_v13 = vadd.f32 %v8590_v33, %v8589_v34  ;;  %v8592_v17 = vpop.f32.mrb[190].mxu1  ;;  %v8530_v35 = vadd.f32 %v8529_v31, %v8528_v40 }
 0x4d1   :  { %v8593_v61 = vpop.f32.mrb[191].mxu1 }
 0x4d2   :  { %v7592_v44 = vadd.f32 %v8591_v13, %v7495_v6  ;;  %v7498_v57 = vadd.f32 %v8530_v35, %v12934_v52  ;;  %v8594_v53 = vadd.f32 %v8593_v61, %v8592_v17 }
 0x4d4   :  { %7612 = vst [vmem:[%s13007_s7 + $0x70] sm:$0xff] %v7592_v44  ;;  %v7595_v1 = vadd.f32 %v8594_v53, %v7498_v57 }
 0x4d6   :  { %7613 = vst [vmem:[%s13007_s7 + $0x78] sm:$0xff] %v7595_v1 }

</bundles_post_ra>
